<compile_context>
chip_gen: v7x
topology: tpu7x:2x2x1
jax: 0.10.0
libtpu: 0.0.40
codegen_flags: <defaults>
</compile_context>

<pallas_src>
import jax
import jax.numpy as jnp
from jax.experimental import pallas as pl
from jax.experimental.pallas import tpu as pltpu

EPS = 1e-6  # matches the module's LayerNorm(eps=1e-6)


def _round_up(v, m):
    return ((v + m - 1) // m) * m


def _layer_norm_kernel(x_ref, g_ref, b_ref, o_ref):
    # x_ref: (TM, D)  g_ref/b_ref: (1, D) f32  o_ref: (TM, D)
    x = x_ref[...].astype(jnp.float32)
    d = x.shape[-1]
    # two-pass (centered) statistics over the lane (channel) axis — the tile
    # is resident in VMEM so the second pass costs no extra HBM traffic and
    # avoids the cancellation issues of the sum-of-squares form.
    mean = jnp.sum(x, axis=-1, keepdims=True) * (1.0 / d)
    xc = x - mean
    # torch.Tensor.std default is the unbiased estimator (divide by d - 1).
    var = jnp.sum(xc * xc, axis=-1, keepdims=True) * (1.0 / (d - 1))
    std = jnp.sqrt(var)
    # NOTE: eps is added to std, not to var. Exact divide (not approx EUP
    # reciprocal) to stay within the 2e-4 rtol of the reference check.
    inv = 1.0 / (std + EPS)
    o_ref[...] = (xc * inv * g_ref[...] + b_ref[...]).astype(o_ref.dtype)


def layer_norm_pallas(x, gamma, beta, *, tile_m=1024):
    """Custom LayerNorm over the last axis of x (any leading shape)."""
    orig_shape = x.shape
    d = orig_shape[-1]
    tokens = x.reshape(-1, d)
    n = tokens.shape[0]

    itemsize = jnp.dtype(x.dtype).itemsize
    # sublane packing: 8 rows per vreg at 32-bit, 16 at 16-bit, 32 at 8-bit
    sub = max(8, 32 // max(itemsize, 1))

    # Start from the requested tile, never (much) larger than n itself.
    tile = max(sub, min(tile_m, _round_up(n, sub)))
    # Keep the double-buffered in+out blocks comfortably inside every
    # generation's VMEM budget (v5e scoped default, v7x 64 MiB physical).
    max_rows = max(sub, ((24 << 20) // (4 * d * itemsize)) // sub * sub)
    tile = min(tile, max_rows)
    # Megacore (v7x): make sure both TensorCores get work when n allows it.
    if pl.cdiv(n, tile) < 2 and n > 2 * sub:
        tile = max(sub, _round_up(pl.cdiv(n, 2), sub))

    grid = pl.cdiv(n, tile)  # ragged last block handled by Pallas (per-row op)

    # hoist parameter casts out of the kernel
    gamma2d = gamma.astype(jnp.float32).reshape(1, d)
    beta2d = beta.astype(jnp.float32).reshape(1, d)

    # double-buffered input + output tiles + params, with headroom; keep the
    # cap below v7x's 64 MiB physical VMEM.
    tile_bytes = tile * d * itemsize
    vmem_limit = int(min(max(4 * tile_bytes + (2 << 20), 16 << 20), 48 << 20))

    out = pl.pallas_call(
        _layer_norm_kernel,
        out_shape=jax.ShapeDtypeStruct((n, d), x.dtype),
        grid_spec=pltpu.PrefetchScalarGridSpec(
            num_scalar_prefetch=0,
            grid=(grid,),
            in_specs=[
                pl.BlockSpec((tile, d), lambda i: (i, 0)),
                pl.BlockSpec((1, d), lambda i: (0, 0)),
                pl.BlockSpec((1, d), lambda i: (0, 0)),
            ],
            out_specs=pl.BlockSpec((tile, d), lambda i: (i, 0)),
        ),
        # output reuses the tokens buffer (same shape/dtype, block i is fully
        # read before block i is written back)
        input_output_aliases={0: 0},
        compiler_params=pltpu.CompilerParams(
            dimension_semantics=("parallel",),
            vmem_limit_bytes=vmem_limit,
        ),
    )(tokens, gamma2d, beta2d)

    return out.reshape(orig_shape)


def decoder_forward(x, memory, src_mask, tgt_mask, layers, gamma, beta):
    """Decoder.forward: apply the layer stack, then the Pallas LayerNorm.

    `layers` is a sequence of callables f(x, memory, src_mask, tgt_mask) -> x,
    mirroring `for layer in self.layers: x = layer(x, memory, src_mask, tgt_mask)`.
    """
    # TODO(synk): DecoderLayer internals (self-attn / src-attn / FFN) are not
    # defined in the provided spec; layers are applied as opaque JAX callables
    # and only the final LayerNorm runs as a Pallas kernel.
    for layer in layers:
        x = layer(x, memory, src_mask, tgt_mask)
    return layer_norm_pallas(x, gamma, beta)


# ----------------------------- pure-JAX reference -----------------------------

def _layer_norm_ref(x, gamma, beta):
    xf = x.astype(jnp.float32)
    mean = jnp.mean(xf, axis=-1, keepdims=True)
    std = jnp.std(xf, axis=-1, keepdims=True, ddof=1)  # unbiased, like torch.std
    return gamma * (xf - mean) / (std + EPS) + beta


def _decoder_reference(x, memory, src_mask, tgt_mask, layers, gamma, beta):
    for layer in layers:
        x = layer(x, memory, src_mask, tgt_mask)
    return _layer_norm_ref(x, gamma, beta)


if __name__ == "__main__":
    key = jax.random.PRNGKey(0)
    k_x, k_m, k_g, k_b, k_l = jax.random.split(key, 5)

    B, T, S, D_MODEL, N_LAYERS = 2, 320, 48, 512, 2
    x = jax.random.normal(k_x, (B, T, D_MODEL), dtype=jnp.float32)
    memory = jax.random.normal(k_m, (B, S, D_MODEL), dtype=jnp.float32)
    src_mask = jnp.ones((B, 1, S), dtype=jnp.float32)
    tgt_mask = jnp.tril(jnp.ones((T, T), dtype=jnp.float32))[None]  # (1, T, T)

    gamma = 1.0 + 0.1 * jax.random.normal(k_g, (D_MODEL,), dtype=jnp.float32)
    beta = 0.1 * jax.random.normal(k_b, (D_MODEL,), dtype=jnp.float32)

    # Stand-in decoder layers for the demo only (the real DecoderLayer is not
    # part of the spec); they respect the (x, memory, src_mask, tgt_mask)
    # signature and are applied identically in the kernel path and reference.
    def make_layer(k):
        kw, km = jax.random.split(k)
        w = 0.02 * jax.random.normal(kw, (D_MODEL, D_MODEL), dtype=jnp.float32)
        wm = 0.02 * jax.random.normal(km, (D_MODEL, D_MODEL), dtype=jnp.float32)

        def layer(h, mem, s_mask, t_mask):
            msum = jnp.einsum("bqs,bsd->bqd", s_mask, mem) / jnp.maximum(
                jnp.sum(s_mask, axis=-1, keepdims=True), 1.0
            )
            return h + jnp.tanh(h @ w) + 0.1 * jnp.tanh(msum @ wm)

        return layer

    layers = tuple(make_layer(k) for k in jax.random.split(k_l, N_LAYERS))

    out = decoder_forward(x, memory, src_mask, tgt_mask, layers, gamma, beta)
    out = jax.block_until_ready(out)

    ref = jax.block_until_ready(
        _decoder_reference(x, memory, src_mask, tgt_mask, layers, gamma, beta)
    )
    assert out.shape == (B, T, D_MODEL), out.shape
    assert jnp.allclose(out, ref, atol=2e-4, rtol=2e-4), float(
        jnp.max(jnp.abs(out - ref))
    )
    print("KERNEL_OK")
</pallas_src>

<mosaic_0001>
module attributes {stable_mosaic.version = 11 : i64} {
  func.func @_layer_norm_kernel(%arg0: i32, %arg1: memref<320x512xf32, #tpu.memory_space<vmem>>, %arg2: memref<1x512xf32, #tpu.memory_space<vmem>>, %arg3: memref<1x512xf32, #tpu.memory_space<vmem>>, %arg4: memref<320x512xf32, #tpu.memory_space<vmem>>) attributes {dimension_semantics = [#tpu.dimension_semantics<parallel>], iteration_bounds = array<i64: 2>, scalar_prefetch = 0 : i64, scratch_operands = 0 : i64, tpu.core_type = #tpu.core_type<tc>, window_params = [{transform_indices = @transform_0, window_bounds = array<i64: 320, 512>}, {pipeline_mode = #tpu.pipeline_mode<synchronous>, transform_indices = @transform_1, window_bounds = array<i64: 1, 512>}, {pipeline_mode = #tpu.pipeline_mode<synchronous>, transform_indices = @transform_2, window_bounds = array<i64: 1, 512>}, {transform_indices = @transform_3, window_bounds = array<i64: 320, 512>}]} {
    %c0 = arith.constant 0 : index
    %c0_0 = arith.constant 0 : index
    %0 = vector.load %arg1[%c0, %c0_0] : memref<320x512xf32, #tpu.memory_space<vmem>>, vector<320x512xf32>
    %cst = arith.constant dense<0.000000e+00> : vector<320xf32>
    %1 = vector.multi_reduction <add>, %0, %cst [1] : vector<320x512xf32> to vector<320xf32>
    %2 = vector.shape_cast %1 : vector<320xf32> to vector<320x1xf32>
    %cst_1 = arith.constant 0.001953125 : f32
    %3 = vector.broadcast %cst_1 : f32 to vector<320x1xf32>
    %4 = arith.mulf %2, %3 : vector<320x1xf32>
    %5 = vector.broadcast %4 : vector<320x1xf32> to vector<320x512xf32>
    %6 = arith.subf %0, %5 : vector<320x512xf32>
    %7 = arith.mulf %6, %6 : vector<320x512xf32>
    %cst_2 = arith.constant dense<0.000000e+00> : vector<320xf32>
    %8 = vector.multi_reduction <add>, %7, %cst_2 [1] : vector<320x512xf32> to vector<320xf32>
    %9 = vector.shape_cast %8 : vector<320xf32> to vector<320x1xf32>
    %cst_3 = arith.constant 0.00195694715 : f32
    %10 = vector.broadcast %cst_3 : f32 to vector<320x1xf32>
    %11 = arith.mulf %9, %10 : vector<320x1xf32>
    %12 = math.sqrt %11 : vector<320x1xf32>
    %cst_4 = arith.constant 9.99999997E-7 : f32
    %13 = vector.broadcast %cst_4 : f32 to vector<320x1xf32>
    %14 = arith.addf %12, %13 : vector<320x1xf32>
    %cst_5 = arith.constant 1.000000e+00 : f32
    %15 = vector.broadcast %cst_5 : f32 to vector<320x1xf32>
    %16 = arith.divf %15, %14 : vector<320x1xf32>
    %17 = vector.broadcast %16 : vector<320x1xf32> to vector<320x512xf32>
    %18 = arith.mulf %6, %17 : vector<320x512xf32>
    %c0_6 = arith.constant 0 : index
    %c0_7 = arith.constant 0 : index
    %19 = vector.load %arg2[%c0_6, %c0_7] : memref<1x512xf32, #tpu.memory_space<vmem>>, vector<1x512xf32>
    %20 = vector.broadcast %19 : vector<1x512xf32> to vector<320x512xf32>
    %21 = arith.mulf %18, %20 : vector<320x512xf32>
    %c0_8 = arith.constant 0 : index
    %c0_9 = arith.constant 0 : index
    %22 = vector.load %arg3[%c0_8, %c0_9] : memref<1x512xf32, #tpu.memory_space<vmem>>, vector<1x512xf32>
    %23 = vector.broadcast %22 : vector<1x512xf32> to vector<320x512xf32>
    %24 = arith.addf %21, %23 : vector<320x512xf32>
    %c0_10 = arith.constant 0 : index
    %c0_11 = arith.constant 0 : index
    %25 = vector.load %arg4[%c0_10, %c0_11] : memref<320x512xf32, #tpu.memory_space<vmem>>, vector<320x512xf32>
    tpu.vector_store %arg4[%c0_10, %c0_11], %24 {strides = array<i32>} : memref<320x512xf32, #tpu.memory_space<vmem>>, vector<320x512xf32>,
    return
  }
  func.func @transform_0(%arg0: i32) -> (i32, i32) {
    %c0_i32 = arith.constant 0 : i32
    %c0_i32_0 = arith.constant 0 : i32
    return %arg0, %c0_i32 : i32, i32
  }
  func.func @transform_1(%arg0: i32) -> (i32, i32) {
    %c0_i32 = arith.constant 0 : i32
    %c0_i32_0 = arith.constant 0 : i32
    %c0_i32_1 = arith.constant 0 : i32
    return %c0_i32, %c0_i32_0 : i32, i32
  }
  func.func @transform_2(%arg0: i32) -> (i32, i32) {
    %c0_i32 = arith.constant 0 : i32
    %c0_i32_0 = arith.constant 0 : i32
    %c0_i32_1 = arith.constant 0 : i32
    return %c0_i32, %c0_i32_0 : i32, i32
  }
  func.func @transform_3(%arg0: i32) -> (i32, i32) {
    %c0_i32 = arith.constant 0 : i32
    %c0_i32_0 = arith.constant 0 : i32
    return %arg0, %c0_i32 : i32, i32
  }
}

</mosaic_0001>

<bundles_post_ra>
// kernel: tpu_custom_call.1
= control target key start
LH: loop header
LB: loop body
LE: loop exit
PB: predicated region body
PF: predicated region fallthrough
CT: control target
= control target key end

     0   :  { %8 = vsyncpa [#allocation3], 0  ;;  %s5660_s0 = inlined_call_operand.hbm [shape: f32[640,512], index: 0, kind: input, shape index: {}, may-alias: {0,3}]   ;;  %s5661_s1 = inlined_call_operand.vmem [shape: f32[1,512], index: 1, kind: input, shape index: {}]   ;;  %s5662_s2 = inlined_call_operand.vmem [shape: f32[1,512], index: 2, kind: input, shape index: {}]   ;;  %s5663_s3 = inlined_call_operand.hbm [shape: f32[640,512], index: 3, kind: output, shape index: {}, may-alias: {0,3}]  }
   0x1   :  { %10 = vsyncpa [#allocation3 + $0x1], 0 }
   0x2   :  { %11 = vsyncpa [#allocation4], 0 }
   0x3   :  { %13 = vsyncpa [#allocation4 + $0x1], 0  ;;  %s2700_s12 = smov 0   ;;  %s2702_s13 = smov 0  }
   0x4   :  { %s2704_s14 = smov 0   ;;  %s2706_s15 = smov 0  }
   0x5 LB: > { %s2721_s16 = sadd.s32 4294967295, %s2672_s15   ;;  %s2324_s17 = sadd.s32 4294967294, %s2672_s15   ;;  %s2672_s15 = sphi %s2706_s15, %s6338_s15   ;;  %s2668_s14 = sphi %s2704_s14, %s6337_s14   ;;  %s2664_s13 = sphi %s2702_s13, %s6336_s13   ;;  %s2660_s12 = sphi %s2700_s12, %s6335_s12  }
   0x6   : > { %s2725_s18 = sadd.s32 1, %s2672_s15   ;;  %s26_s19 = sadd.s32 1, %s2668_s14 }
   0x7   : > { %s23_s20 = ssub.s32 %s2672_s15, %s2725_s18  ;;  %p33_p0 = scmp.ne.s32.totalorder %s2668_s14, %s2664_s13 }
   0x8   : > { %p24_p1 = scmp.eq.s32.totalorder %s23_s20, 0  ;;  %p34_p2 = scmp.eq.s32.totalorder %s2672_s15, 0 }
   0x9   : > { %p39_p3 = scmp.ne.s32.totalorder %s2664_s13, %s2660_s12  ;;  %p40_p4 = scmp.eq.s32.totalorder %s2721_s16, 0 }
   0xa   : > { %s2737_s21 = scalar_select %p24_p1, %s2668_s14, %s26_s19  }
   0xb   : > { %p35_p5 = por %p34_p2, %p33_p0  ;;  %p2739_p6 = por %p40_p4, %p39_p3 }
   0xc   : > { %p105_p7 = scmp.eq.s32.totalorder %s2721_s16, 1  ;;  %p111_p8 = scmp.eq.s32.totalorder %s2324_s17, 1 }
   0xd   : > { %p2354_p10 = scmp.lt.s32.totalorder %s2672_s15, 2  ;;  %s137_s25 = sand.u32 1, %s2668_s14  }
   0xe   : > { %p2746_p11 = por %p105_p7, %p33_p0  ;;  %p2750_p12 = por %p111_p8, %p39_p3 }
   0xf   : > { %s2338_s26 = smul.u32 20480, %s2672_s15  ;;  %p2761_p13 = pnand %p2354_p10, %p35_p5 }
  0x10   : > { %s5886_s23 = scalar_select %p2746_p11, 1, 0 }
  0x11   : > { %s5887_s24 = scalar_select %p2750_p12, 1, 0 }
  0x12   : > { %s2340_s27 = smul.u32 1280, %s137_s25  ;;  %s2759_s30 = scalar_lea.hbm %s5660_s0, %s2338_s26 }
  0x13   : > { %s2767_s7 = scalar_lea.sflag [#allocation3], %s137_s25  ;;  %s2576_s8 = scalar_lea.hbm %s2759_s30, 20480 }
  0x14   : > { %s141_s5 = scalar_lea.vmem [#allocation2], %s2340_s27  ;;  %p2577_p0 = scmp.ne.s32.totalorder %s2759_s30, %s2576_s8 }
  0x15   : > { %s149_s6 = sshll.u32 %s141_s5, 4  ;;  %p2578_p1 = pneg %p2761_p13  ;;  %s2765_s6 = int_to_ptr.vmem [resolvable:$true] %s149_s6 }
  0x16   : > { %s2581_s11 = scalar_lea.hbm %s5660_s0, 40960  ;;  %p2582_p4 = scmp.lt.u32.totalorder %s2759_s30, %s5660_s0 }
  0x17   : > { %p2579_p2 = pnand %p2578_p1, %p2577_p0  ;;  %p2583_p5 = scmp.lt.u32.totalorder %s2581_s11, %s2576_s8 }
  0x18   : > { %p2585_p8 = scmp.lt.u32.totalorder %s2576_s8, %s2759_s30 }
  0x19   : > { %p2580_p3 = pneg %p2579_p2  ;;  %p2584_p7 = por %p2583_p5, %p2582_p4 }
  0x1b   : > { %p2586_p10 = por %p2585_p8, %p2584_p7 }
  0x1d   : > { %p2587_p9 = pnand %p2586_p10, %p2580_p3 }
  0x1f   : > { %2590 = shalt.err (!%p2587_p9)
}
  0x20   : > { %s2591_s20 = scalar_lea.vmem %s2765_s6, 20480  ;;  %s2674_s25 = smov [#allocation2]  }
  0x21   : > { %p2592_p0 = scmp.ne.s32.totalorder %s2765_s6, %s2591_s20  ;;  %s2596_s26 = sshll.u32 %s2674_s25, 4  ;;  %s2597_s26 = int_to_ptr.vmem [resolvable:$false] %s2596_s26 }
  0x22   : > { %s2598_s27 = scalar_lea.vmem %s2597_s26, 40960  ;;  %p2599_p11 = scmp.lt.s32.totalorder %s2765_s6, %s2597_s26 }
  0x23   : > { %p2594_p2 = pnand %p2592_p0, %p2578_p1  ;;  %p2600_p4 = scmp.lt.s32.totalorder %s2598_s27, %s2591_s20 }
  0x25   : > { %p2595_p12 = pneg %p2594_p2  ;;  %p2601_p5 = por %p2600_p4, %p2599_p11 }
  0x27   : > { %p2602_p7 = pnand %p2601_p5, %p2595_p12 }
  0x29   : > { %2605 = shalt.err (!%p2602_p7)
}
  0x2a   : > { %s2675_s28 = smov 512   ;;  %s2676_s29 = smov 32  }
  0x2b   : > { %2349 = dma.hbm_to_vmem [thread:$0]  (!%p2761_p13), %s2759_s30, 20480, %s2765_s6, %s2767_s7, %s2675_s28, %s2675_s28, %s2676_s29  }
  0x2c   : > { %p2329_p9 = scmp.ge.s32.totalorder %s2672_s15, 1  ;;  %p157_p1 = scmp.lt.s32.totalorder %s2672_s15, 3 }
  0x2e   : > { %p158_p3 = pnand %p2329_p9, %p157_p1 }
  0x30   : > { %161 = sbr.rel (%p158_p3) target bundleno = 630 (0x276), region = 32 }
  0x37   : > { %s2798_s5 = sand.u32 1, %s2664_s13  }
  0x38   : > { %s2341_s8 = smul.u32 1280, %s2798_s5  ;;  %s164_s9 = scalar_lea.sflag [#allocation3], %s2798_s5 }
  0x3a   : > { %s2804_s10 = scalar_lea.vmem [#allocation2], %s2341_s8 }
  0x3b   : > { %2651 = dma.done.wait (%p2739_p6), %s164_s9, 20480  }
  0x3c   : > { %2653 = vsyncadd (%p2739_p6), %s164_s9, 4294946816  ;;  %v2811_v0 = vld [vmem:[%s2804_s10 + $0x40] sm:$0xff]  ;;  %v2814_v1 = vld [vmem:[%s2804_s10 + $0x48] sm:$0xff]  ;;  %s4464_s7 = scalar_lea.vmem [#allocation5], %s2341_s8  ;;  %s2339_s11 = smul.u32 20480, %s2721_s16 }
  0x3d   : > { %v2817_v2 = vld [vmem:[%s2804_s10 + $0x50] sm:$0xff]  ;;  %v362_v3 = vadd.f32 %v2814_v1, %v2811_v0  ;;  %v2822_v4 = vld [vmem:[%s2804_s10] sm:$0xff]  ;;  %v2825_v5 = vld [vmem:[%s2804_s10 + $0x8] sm:$0xff]  ;;  %s2251_s17 = sshll.u32 %s4464_s7, 4  ;;  %s2237_s25 = scalar_lea.sflag [#allocation4], %s2798_s5  ;;  %s5608_s17 = int_to_ptr.vmem [resolvable:$true] %s2251_s17 }
  0x3e   : > { %v2828_v6 = vld [vmem:[%s2804_s10 + $0x58] sm:$0xff]  ;;  %v2831_v7 = vld [vmem:[%s2804_s10 + $0x10] sm:$0xff]  ;;  %v352_v8 = vadd.f32 %v2825_v5, %v2822_v4  ;;  %v2836_v9 = vld [vmem:[%s2804_s10 + $0x60] sm:$0xff]  ;;  %s5606_s20 = scalar_lea.hbm %s5663_s3, %s2339_s11  ;;  %s2606_s26 = scalar_lea.vmem %s5608_s17, 20480 }
  0x3f   : > { %v363_v10 = vadd.f32 %v362_v3, %v2817_v2  ;;  %v2840_v11 = vld [vmem:[%s2804_s10 + $0x18] sm:$0xff]  ;;  %v2843_v12 = vld [vmem:[%s2804_s10 + $0x68] sm:$0xff]  ;;  %v2846_v13 = vld [vmem:[%s2804_s10 + $0x70] sm:$0xff]  ;;  %p2607_p6 = scmp.ne.s32.totalorder %s5608_s17, %s2606_s26  ;;  %p6332_p11 = scmp.ne.s32.totalorder %s5886_s23, 0 }
  0x40   : > { %v353_v14 = vadd.f32 %v352_v8, %v2831_v7  ;;  %v367_v15 = vadd.f32 %v2843_v12, %v2836_v9  ;;  %v2852_v16 = vld [vmem:[%s2804_s10 + $0x20] sm:$0xff]  ;;  %v2855_v17 = vld [vmem:[%s2804_s10 + $0x28] sm:$0xff]  ;;  %v2858_v18 = vld [vmem:[%s2804_s10 + $0x30] sm:$0xff]  ;;  %s2677_s27 = smov [#allocation5]  }
  0x41   : > { %v364_v19 = vadd.f32 %v363_v10, %v2828_v6  ;;  %v2862_v20 = vld [vmem:[%s2804_s10 + $0x78] sm:$0xff]  ;;  %v357_v21 = vadd.f32 %v2855_v17, %v2852_v16  ;;  %v2867_v22 = vld [vmem:[%s2804_s10 + $0xa0] sm:$0xff]  ;;  %v2870_v23 = vld [vmem:[%s2804_s10 + $0xa8] sm:$0xff]  ;;  %p2608_p12 = pnand %p2607_p6, %p6332_p11  ;;  %s2610_s28 = sshll.u32 %s2677_s27, 4  ;;  %s2611_s28 = int_to_ptr.vmem [resolvable:$false] %s2610_s28 }
  0x42   : > { %v354_v24 = vadd.f32 %v353_v14, %v2840_v11  ;;  %v368_v25 = vadd.f32 %v367_v15, %v2846_v13  ;;  %v2875_v26 = vld [vmem:[%s2804_s10 + $0x38] sm:$0xff]  ;;  %v2878_v27 = vld [vmem:[%s2804_s10 + $0xb0] sm:$0xff]  ;;  %v377_v28 = vadd.f32 %v2870_v23, %v2867_v22  ;;  %v2883_v29 = vld [vmem:[%s2804_s10 + $0x80] sm:$0xff]  ;;  %s2612_s29 = scalar_lea.vmem %s2611_s28, 40960  ;;  %p2613_p8 = scmp.lt.s32.totalorder %s5608_s17, %s2611_s28 }
  0x43   : > { %365 = vadd.xlane.f32.xlu1 %v364_v19  ;;  %v358_v30 = vadd.f32 %v357_v21, %v2858_v18  ;;  %v2887_v31 = vld [vmem:[%s2804_s10 + $0xb8] sm:$0xff]  ;;  %v2890_v32 = vld [vmem:[%s2804_s10 + $0x88] sm:$0xff]  ;;  %v2893_v33 = vld [vmem:[%s2804_s10 + $0x90] sm:$0xff]  ;;  %p2609_p13 = pneg %p2608_p12  ;;  %p2614_p10 = scmp.lt.s32.totalorder %s2612_s29, %s2606_s26 }
  0x44   : > { %355 = vadd.xlane.f32.xlu0 %v354_v24  ;;  %v369_v34 = vadd.f32 %v368_v25, %v2862_v20  ;;  %v378_v35 = vadd.f32 %v377_v28, %v2878_v27  ;;  %v372_v36 = vadd.f32 %v2890_v32, %v2883_v29  ;;  %v2900_v37 = vld [vmem:[%s2804_s10 + $0xe0] sm:$0xff]  ;;  %v2903_v38 = vld [vmem:[%s2804_s10 + $0xe8] sm:$0xff]  ;;  %v2906_v39 = vld [vmem:[%s2804_s10 + $0xf0] sm:$0xff] }
  0x45   : > { %v359_v40 = vadd.f32 %v358_v30, %v2875_v26  ;;  %v2910_v41 = vld [vmem:[%s2804_s10 + $0x98] sm:$0xff]  ;;  %v387_v42 = vadd.f32 %v2903_v38, %v2900_v37  ;;  %v2915_v43 = vld [vmem:[%s2804_s10 + $0xc0] sm:$0xff]  ;;  %v2918_v44 = vld [vmem:[%s2804_s10 + $0xc8] sm:$0xff]  ;;  %p2615_p0 = por %p2614_p10, %p2613_p8 }
  0x46   : > { %v373_v45 = vadd.f32 %v372_v36, %v2893_v33  ;;  %v2922_v46 = vld [vmem:[%s2804_s10 + $0xd0] sm:$0xff]  ;;  %v382_v47 = vadd.f32 %v2918_v44, %v2915_v43  ;;  %v2927_v48 = vld [vmem:[%s2804_s10 + $0x120] sm:$0xff]  ;;  %v379_v49 = vadd.f32 %v378_v35, %v2887_v31  ;;  %v2931_v50 = vld [vmem:[%s2804_s10 + $0xf8] sm:$0xff] }
  0x47   : > { %370 = vadd.xlane.f32.xlu1 %v369_v34  ;;  %5889 = vst [vmem:[#allocation8_spill] sm:$0xff] %v2931_v50  ;;  %v388_v51 = vadd.f32 %v387_v42, %v2906_v39  ;;  %v2935_v52 = vld [vmem:[%s2804_s10 + $0xd8] sm:$0xff]  ;;  %v2938_v53 = vld [vmem:[%s2804_s10 + $0x128] sm:$0xff]  ;;  %v2943_v56 = vld [vmem:[%s2804_s10 + $0x130] sm:$0xff]  ;;  %p2616_p2 = pnand %p2615_p0, %p2609_p13 }
  0x48   : > { %360 = vadd.xlane.f32.xlu0 %v359_v40  ;;  %v374_v54 = vadd.f32 %v373_v45, %v2910_v41  ;;  %v383_v55 = vadd.f32 %v382_v47, %v2922_v46  ;;  %5890 = vst [vmem:[#allocation9_spill] sm:$0xff] %v2943_v56  ;;  %v397_v57 = vadd.f32 %v2938_v53, %v2927_v48  ;;  %v2948_v58 = vld [vmem:[%s2804_s10 + $0x100] sm:$0xff]  ;;  %v2951_v59 = vld [vmem:[%s2804_s10 + $0x108] sm:$0xff]  ;;  %v2954_v60 = vld [vmem:[%s2804_s10 + $0x110] sm:$0xff] }
  0x49   : > { %5891 = vst [vmem:[#allocation10_spill] sm:$0xff] %v2954_v60  ;;  %v392_v61 = vadd.f32 %v2951_v59, %v2948_v58  ;;  %v2959_v62 = vld [vmem:[%s2804_s10 + $0x160] sm:$0xff]  ;;  %v2962_v63 = vld [vmem:[%s2804_s10 + $0x168] sm:$0xff]  ;;  %v389_v8 = vadd.f32 %v388_v51, %v2931_v50  ;;  %v2969_v10 = vld [vmem:[%s2804_s10 + $0x138] sm:$0xff] }
  0x4a   : > { %v2965_v3 = vld [vmem:[%s2804_s10 + $0x140] sm:$0xff]  ;;  %5892 = vst [vmem:[#allocation11_spill] sm:$0xff] %v2969_v10  ;;  %v398_v14 = vadd.f32 %v397_v57, %v2943_v56  ;;  %v2973_v15 = vld [vmem:[%s2804_s10 + $0x118] sm:$0xff]  ;;  %v407_v19 = vadd.f32 %v2962_v63, %v2959_v62  ;;  %v2978_v21 = vld [vmem:[%s2804_s10 + $0x148] sm:$0xff]  ;;  %v384_v24 = vadd.f32 %v383_v55, %v2935_v52 }
  0x4b   : > { %380 = vadd.xlane.f32.xlu1 %v379_v49  ;;  %5893 = vst [vmem:[#allocation12_spill] sm:$0xff] %v2973_v15  ;;  %v393_v25 = vadd.f32 %v392_v61, %v2954_v60  ;;  %v2983_v28 = vld [vmem:[%s2804_s10 + $0x170] sm:$0xff]  ;;  %v402_v30 = vadd.f32 %v2978_v21, %v2965_v3  ;;  %v2988_v34 = vld [vmem:[%s2804_s10 + $0x1a0] sm:$0xff]  ;;  %v2991_v35 = vld [vmem:[%s2804_s10 + $0x1a8] sm:$0xff] }
  0x4c   : > { %375 = vadd.xlane.f32.xlu0 %v374_v54  ;;  %5894 = vst [vmem:[#allocation13_spill] sm:$0xff] %v2983_v28  ;;  %5895 = vst [vmem:[#allocation14_spill] sm:$0xff] %v2988_v34  ;;  %v2994_v36 = vld [vmem:[%s2804_s10 + $0x150] sm:$0xff]  ;;  %v2997_v40 = vld [vmem:[%s2804_s10 + $0x180] sm:$0xff]  ;;  %v399_v45 = vadd.f32 %v398_v14, %v2969_v10  ;;  %v408_v49 = vadd.f32 %v407_v19, %v2983_v28  ;;  %v417_v54 = vadd.f32 %v2991_v35, %v2988_v34 }
  0x4d   : > { %5896 = vst [vmem:[#allocation15_spill] sm:$0xff] %v2991_v35  ;;  %5897 = vst [vmem:[#allocation16_spill] sm:$0xff] %v2994_v36  ;;  %v3000_v42 = vld [vmem:[%s2804_s10 + $0x188] sm:$0xff]  ;;  %v3004_v47 = vld [vmem:[%s2804_s10 + $0x178] sm:$0xff]  ;;  %v394_v55 = vadd.f32 %v393_v25, %v2973_v15  ;;  %v403_v57 = vadd.f32 %v402_v30, %v2994_v36 }
  0x4e   : > { %5898 = vst [vmem:[#allocation17_spill] sm:$0xff] %v2997_v40  ;;  %5899 = vst [vmem:[#allocation18_spill] sm:$0xff] %v3000_v42  ;;  %v3008_v51 = vld [vmem:[%s2804_s10 + $0x158] sm:$0xff]  ;;  %v3015_v61 = vld [vmem:[%s2804_s10 + $0x1b0] sm:$0xff]  ;;  %v409_v30 = vadd.f32 %v408_v49, %v3004_v47 }
  0x4f   : > { %390 = vadd.xlane.f32.xlu1 %v389_v8  ;;  %5900 = vst [vmem:[#allocation19_spill] sm:$0xff] %v3004_v47  ;;  %5901 = vst [vmem:[#allocation20_spill] sm:$0xff] %v3008_v51  ;;  %v412_v8 = vadd.f32 %v3000_v42, %v2997_v40  ;;  %v3020_v14 = vld [vmem:[%s2804_s10 + $0x1e0] sm:$0xff]  ;;  %v3023_v19 = vld [vmem:[%s2804_s10 + $0x1e8] sm:$0xff]  ;;  %v418_v10 = vadd.f32 %v417_v54, %v3015_v61  ;;  %v404_v60 = vadd.f32 %v403_v57, %v3008_v51 }
  0x50   : > { %385 = vadd.xlane.f32.xlu0 %v384_v24  ;;  %5902 = vst [vmem:[#allocation21_spill] sm:$0xff] %v3015_v61  ;;  %5903 = vst [vmem:[#allocation22_spill] sm:$0xff] %v3020_v14  ;;  %v3026_v28 = vld [vmem:[%s2804_s10 + $0x190] sm:$0xff]  ;;  %v3029_v24 = vld [vmem:[%s2804_s10 + $0x1c0] sm:$0xff]  ;;  %v427_v15 = vadd.f32 %v3023_v19, %v3020_v14 }
  0x51   : > { %5904 = vst [vmem:[#allocation23_spill] sm:$0xff] %v3023_v19  ;;  %5905 = vst [vmem:[#allocation24_spill] sm:$0xff] %v3026_v28  ;;  %v3032_v25 = vld [vmem:[%s2804_s10 + $0x1c8] sm:$0xff]  ;;  %v3036_v36 = vld [vmem:[%s2804_s10 + $0x1b8] sm:$0xff]  ;;  %v413_v50 = vadd.f32 %v412_v8, %v3026_v28 }
  0x52   : > { %5906 = vst [vmem:[#allocation25_spill] sm:$0xff] %v3029_v24  ;;  %5907 = vst [vmem:[#allocation26_spill] sm:$0xff] %v3032_v25  ;;  %v3040_v56 = vld [vmem:[%s2804_s10 + $0x198] sm:$0xff]  ;;  %v3047_v42 = vld [vmem:[%s2804_s10 + $0x1f0] sm:$0xff]  ;;  %v419_v8 = vadd.f32 %v418_v10, %v3036_v36 }
  0x53   : > { %400 = vadd.xlane.f32.xlu1 %v399_v45  ;;  %5908 = vst [vmem:[#allocation27_spill] sm:$0xff] %v3036_v36  ;;  %5909 = vst [vmem:[#allocation28_spill] sm:$0xff] %v3040_v56  ;;  %v422_v45 = vadd.f32 %v3032_v25, %v3029_v24  ;;  %v3052_v49 = vld [vmem:[%s2804_s10 + $0x220] sm:$0xff]  ;;  %v3055_v54 = vld [vmem:[%s2804_s10 + $0x228] sm:$0xff]  ;;  %v428_v47 = vadd.f32 %v427_v15, %v3047_v42  ;;  %v414_v24 = vadd.f32 %v413_v50, %v3040_v56 }
  0x54   : > { %395 = vadd.xlane.f32.xlu0 %v394_v55  ;;  %5910 = vst [vmem:[#allocation29_spill] sm:$0xff] %v3047_v42  ;;  %5911 = vst [vmem:[#allocation30_spill] sm:$0xff] %v3052_v49  ;;  %v3058_v61 = vld [vmem:[%s2804_s10 + $0x1d0] sm:$0xff]  ;;  %v3061_v55 = vld [vmem:[%s2804_s10 + $0x200] sm:$0xff]  ;;  %v437_v25 = vadd.f32 %v3055_v54, %v3052_v49 }
  0x55   : > { %5912 = vst [vmem:[#allocation31_spill] sm:$0xff] %v3055_v54  ;;  %5913 = vst [vmem:[#allocation32_spill] sm:$0xff] %v3058_v61  ;;  %v3064_v57 = vld [vmem:[%s2804_s10 + $0x208] sm:$0xff]  ;;  %v3068_v28 = vld [vmem:[%s2804_s10 + $0x1f8] sm:$0xff]  ;;  %v423_v19 = vadd.f32 %v422_v45, %v3058_v61 }
  0x56   : > { %5914 = vst [vmem:[#allocation33_spill] sm:$0xff] %v3061_v55  ;;  %5915 = vst [vmem:[#allocation34_spill] sm:$0xff] %v3064_v57  ;;  %v3072_v51 = vld [vmem:[%s2804_s10 + $0x1d8] sm:$0xff]  ;;  %v3079_v14 = vld [vmem:[%s2804_s10 + $0x230] sm:$0xff]  ;;  %v432_v10 = vadd.f32 %v3064_v57, %v3061_v55  ;;  %v429_v45 = vadd.f32 %v428_v47, %v3068_v28 }
  0x57   : > { %410 = vadd.xlane.f32.xlu1 %v409_v30  ;;  %5916 = vst [vmem:[#allocation35_spill] sm:$0xff] %v3068_v28  ;;  %5917 = vst [vmem:[#allocation36_spill] sm:$0xff] %v3072_v51  ;;  %v3084_v30 = vld [vmem:[%s2804_s10 + $0x260] sm:$0xff]  ;;  %v3087_v15 = vld [vmem:[%s2804_s10 + $0x268] sm:$0xff]  ;;  %v438_v36 = vadd.f32 %v437_v25, %v3079_v14  ;;  %v424_v55 = vadd.f32 %v423_v19, %v3072_v51 }
  0x58   : > { %405 = vadd.xlane.f32.xlu0 %v404_v60  ;;  %5918 = vst [vmem:[#allocation37_spill] sm:$0xff] %v3079_v14  ;;  %5919 = vst [vmem:[#allocation38_spill] sm:$0xff] %v3084_v30  ;;  %v3090_v42 = vld [vmem:[%s2804_s10 + $0x210] sm:$0xff]  ;;  %v3093_v60 = vld [vmem:[%s2804_s10 + $0x240] sm:$0xff]  ;;  %v447_v57 = vadd.f32 %v3087_v15, %v3084_v30 }
  0x59   : > { %5920 = vst [vmem:[#allocation39_spill] sm:$0xff] %v3087_v15  ;;  %5921 = vst [vmem:[#allocation40_spill] sm:$0xff] %v3090_v42  ;;  %v3096_v50 = vld [vmem:[%s2804_s10 + $0x248] sm:$0xff]  ;;  %v3100_v61 = vld [vmem:[%s2804_s10 + $0x238] sm:$0xff]  ;;  %v433_v54 = vadd.f32 %v432_v10, %v3090_v42 }
  0x5a   : > { %5922 = vst [vmem:[#allocation41_spill] sm:$0xff] %v3093_v60  ;;  %5923 = vst [vmem:[#allocation42_spill] sm:$0xff] %v3096_v50  ;;  %v3104_v56 = vld [vmem:[%s2804_s10 + $0x218] sm:$0xff]  ;;  %v3111_v49 = vld [vmem:[%s2804_s10 + $0x270] sm:$0xff]  ;;  %v442_v47 = vadd.f32 %v3096_v50, %v3093_v60  ;;  %v439_v10 = vadd.f32 %v438_v36, %v3100_v61 }
  0x5b   : > { %420 = vadd.xlane.f32.xlu1 %v419_v8  ;;  %5924 = vst [vmem:[#allocation43_spill] sm:$0xff] %v3100_v61  ;;  %5925 = vst [vmem:[#allocation44_spill] sm:$0xff] %v3104_v56  ;;  %v3116_v8 = vld [vmem:[%s2804_s10 + $0x2a0] sm:$0xff]  ;;  %v3119_v25 = vld [vmem:[%s2804_s10 + $0x2a8] sm:$0xff]  ;;  %v448_v28 = vadd.f32 %v447_v57, %v3111_v49  ;;  %v434_v60 = vadd.f32 %v433_v54, %v3104_v56 }
  0x5c   : > { %415 = vadd.xlane.f32.xlu0 %v414_v24  ;;  %5926 = vst [vmem:[#allocation45_spill] sm:$0xff] %v3111_v49  ;;  %5927 = vst [vmem:[#allocation46_spill] sm:$0xff] %v3116_v8  ;;  %v3122_v14 = vld [vmem:[%s2804_s10 + $0x250] sm:$0xff]  ;;  %v3125_v24 = vld [vmem:[%s2804_s10 + $0x280] sm:$0xff]  ;;  %v457_v50 = vadd.f32 %v3119_v25, %v3116_v8 }
  0x5d   : > { %5928 = vst [vmem:[#allocation47_spill] sm:$0xff] %v3119_v25  ;;  %5929 = vst [vmem:[#allocation48_spill] sm:$0xff] %v3122_v14  ;;  %v3128_v19 = vld [vmem:[%s2804_s10 + $0x288] sm:$0xff]  ;;  %v3132_v42 = vld [vmem:[%s2804_s10 + $0x278] sm:$0xff]  ;;  %v443_v15 = vadd.f32 %v442_v47, %v3122_v14 }
  0x5e   : > { %5930 = vst [vmem:[#allocation49_spill] sm:$0xff] %v3125_v24  ;;  %5931 = vst [vmem:[#allocation50_spill] sm:$0xff] %v3128_v19  ;;  %v3136_v51 = vld [vmem:[%s2804_s10 + $0x258] sm:$0xff]  ;;  %v3143_v30 = vld [vmem:[%s2804_s10 + $0x2b0] sm:$0xff]  ;;  %v452_v36 = vadd.f32 %v3128_v19, %v3125_v24  ;;  %v449_v47 = vadd.f32 %v448_v28, %v3132_v42 }
  0x5f   : > { %430 = vadd.xlane.f32.xlu1 %v429_v45  ;;  %5932 = vst [vmem:[#allocation51_spill] sm:$0xff] %v3132_v42  ;;  %5933 = vst [vmem:[#allocation52_spill] sm:$0xff] %v3136_v51  ;;  %v3148_v45 = vld [vmem:[%s2804_s10 + $0x2e0] sm:$0xff]  ;;  %v3151_v57 = vld [vmem:[%s2804_s10 + $0x2e8] sm:$0xff]  ;;  %v458_v61 = vadd.f32 %v457_v50, %v3143_v30  ;;  %v444_v24 = vadd.f32 %v443_v15, %v3136_v51 }
  0x60   : > { %425 = vadd.xlane.f32.xlu0 %v424_v55  ;;  %5934 = vst [vmem:[#allocation53_spill] sm:$0xff] %v3143_v30  ;;  %5935 = vst [vmem:[#allocation54_spill] sm:$0xff] %v3148_v45  ;;  %v3154_v49 = vld [vmem:[%s2804_s10 + $0x290] sm:$0xff]  ;;  %v3157_v55 = vld [vmem:[%s2804_s10 + $0x2c0] sm:$0xff]  ;;  %v467_v19 = vadd.f32 %v3151_v57, %v3148_v45 }
  0x61   : > { %5936 = vst [vmem:[#allocation55_spill] sm:$0xff] %v3151_v57  ;;  %5937 = vst [vmem:[#allocation56_spill] sm:$0xff] %v3154_v49  ;;  %v3160_v54 = vld [vmem:[%s2804_s10 + $0x2c8] sm:$0xff]  ;;  %v3164_v14 = vld [vmem:[%s2804_s10 + $0x2b8] sm:$0xff]  ;;  %v453_v25 = vadd.f32 %v452_v36, %v3154_v49 }
  0x62   : > { %5938 = vst [vmem:[#allocation57_spill] sm:$0xff] %v3157_v55  ;;  %5939 = vst [vmem:[#allocation58_spill] sm:$0xff] %v3160_v54  ;;  %v3168_v56 = vld [vmem:[%s2804_s10 + $0x298] sm:$0xff]  ;;  %v3175_v8 = vld [vmem:[%s2804_s10 + $0x2f0] sm:$0xff]  ;;  %v462_v28 = vadd.f32 %v3160_v54, %v3157_v55  ;;  %v459_v36 = vadd.f32 %v458_v61, %v3164_v14 }
  0x63   : > { %440 = vadd.xlane.f32.xlu1 %v439_v10  ;;  %5940 = vst [vmem:[#allocation59_spill] sm:$0xff] %v3164_v14  ;;  %5941 = vst [vmem:[#allocation60_spill] sm:$0xff] %v3168_v56  ;;  %v3180_v10 = vld [vmem:[%s2804_s10 + $0x320] sm:$0xff]  ;;  %v3183_v50 = vld [vmem:[%s2804_s10 + $0x328] sm:$0xff]  ;;  %v468_v42 = vadd.f32 %v467_v19, %v3175_v8  ;;  %v454_v55 = vadd.f32 %v453_v25, %v3168_v56 }
  0x64   : > { %435 = vadd.xlane.f32.xlu0 %v434_v60  ;;  %5942 = vst [vmem:[#allocation61_spill] sm:$0xff] %v3175_v8  ;;  %5943 = vst [vmem:[#allocation62_spill] sm:$0xff] %v3180_v10  ;;  %v3186_v30 = vld [vmem:[%s2804_s10 + $0x2d0] sm:$0xff]  ;;  %v3189_v60 = vld [vmem:[%s2804_s10 + $0x300] sm:$0xff]  ;;  %v477_v54 = vadd.f32 %v3183_v50, %v3180_v10 }
  0x65   : > { %5944 = vst [vmem:[#allocation63_spill] sm:$0xff] %v3183_v50  ;;  %5945 = vst [vmem:[#allocation64_spill] sm:$0xff] %v3186_v30  ;;  %v3192_v15 = vld [vmem:[%s2804_s10 + $0x308] sm:$0xff]  ;;  %v3196_v49 = vld [vmem:[%s2804_s10 + $0x2f8] sm:$0xff]  ;;  %v463_v57 = vadd.f32 %v462_v28, %v3186_v30 }
  0x66   : > { %5946 = vst [vmem:[#allocation65_spill] sm:$0xff] %v3189_v60  ;;  %5947 = vst [vmem:[#allocation66_spill] sm:$0xff] %v3192_v15  ;;  %v3200_v51 = vld [vmem:[%s2804_s10 + $0x2d8] sm:$0xff]  ;;  %v3207_v45 = vld [vmem:[%s2804_s10 + $0x330] sm:$0xff]  ;;  %v472_v61 = vadd.f32 %v3192_v15, %v3189_v60  ;;  %v469_v28 = vadd.f32 %v468_v42, %v3196_v49 }
  0x67   : > { %450 = vadd.xlane.f32.xlu1 %v449_v47  ;;  %5948 = vst [vmem:[#allocation67_spill] sm:$0xff] %v3196_v49  ;;  %5949 = vst [vmem:[#allocation68_spill] sm:$0xff] %v3200_v51  ;;  %v3212_v47 = vld [vmem:[%s2804_s10 + $0x360] sm:$0xff]  ;;  %v3215_v19 = vld [vmem:[%s2804_s10 + $0x368] sm:$0xff]  ;;  %v478_v14 = vadd.f32 %v477_v54, %v3207_v45  ;;  %v464_v60 = vadd.f32 %v463_v57, %v3200_v51 }
  0x68   : > { %445 = vadd.xlane.f32.xlu0 %v444_v24  ;;  %5950 = vst [vmem:[#allocation69_spill] sm:$0xff] %v3207_v45  ;;  %5951 = vst [vmem:[#allocation70_spill] sm:$0xff] %v3212_v47  ;;  %v3218_v8 = vld [vmem:[%s2804_s10 + $0x310] sm:$0xff]  ;;  %v3221_v24 = vld [vmem:[%s2804_s10 + $0x340] sm:$0xff]  ;;  %v487_v15 = vadd.f32 %v3215_v19, %v3212_v47 }
  0x69   : > { %5952 = vst [vmem:[#allocation71_spill] sm:$0xff] %v3215_v19  ;;  %5953 = vst [vmem:[#allocation72_spill] sm:$0xff] %v3218_v8  ;;  %v3224_v25 = vld [vmem:[%s2804_s10 + $0x348] sm:$0xff]  ;;  %v3228_v30 = vld [vmem:[%s2804_s10 + $0x338] sm:$0xff]  ;;  %v473_v50 = vadd.f32 %v472_v61, %v3218_v8 }
  0x6a   : > { %5954 = vst [vmem:[#allocation73_spill] sm:$0xff] %v3221_v24  ;;  %5955 = vst [vmem:[#allocation74_spill] sm:$0xff] %v3224_v25  ;;  %v3232_v56 = vld [vmem:[%s2804_s10 + $0x318] sm:$0xff]  ;;  %v302_v10 = vld [vmem:[%s2804_s10 + $0x370] sm:$0xff]  ;;  %v482_v42 = vadd.f32 %v3224_v25, %v3221_v24 }
  0x6b   : > { %460 = vadd.xlane.f32.xlu1 %v459_v36  ;;  %5956 = vst [vmem:[#allocation75_spill] sm:$0xff] %v3228_v30  ;;  %5957 = vst [vmem:[#allocation76_spill] sm:$0xff] %v3232_v56  ;;  %v3242_v36 = vld [vmem:[%s2804_s10 + $0x3a0] sm:$0xff]  ;;  %v3245_v54 = vld [vmem:[%s2804_s10 + $0x3a8] sm:$0xff]  ;;  %v488_v8 = vadd.f32 %v487_v15, %v302_v10  ;;  %v474_v24 = vadd.f32 %v473_v50, %v3232_v56 }
  0x6c   : > { %455 = vadd.xlane.f32.xlu0 %v454_v55  ;;  %5958 = vst [vmem:[#allocation77_spill] sm:$0xff] %v3242_v36  ;;  %5959 = vst [vmem:[#allocation78_spill] sm:$0xff] %v3245_v54  ;;  %v3248_v45 = vld [vmem:[%s2804_s10 + $0x350] sm:$0xff]  ;;  %v3251_v49 = vld [vmem:[%s2804_s10 + $0x380] sm:$0xff]  ;;  %v479_v55 = vadd.f32 %v478_v14, %v3228_v30  ;;  %v497_v25 = vadd.f32 %v3245_v54, %v3242_v36 }
  0x6d   : > { %5960 = vst [vmem:[#allocation79_spill] sm:$0xff] %v3248_v45  ;;  %5961 = vst [vmem:[#allocation80_spill] sm:$0xff] %v3251_v49  ;;  %v3254_v57 = vld [vmem:[%s2804_s10 + $0x388] sm:$0xff]  ;;  %v3258_v61 = vld [vmem:[%s2804_s10 + $0x378] sm:$0xff]  ;;  %v483_v19 = vadd.f32 %v482_v42, %v3248_v45 }
  0x6e   : > { %5962 = vst [vmem:[#allocation81_spill] sm:$0xff] %v3254_v57  ;;  %5963 = vst [vmem:[#allocation82_spill] sm:$0xff] %v3258_v61  ;;  %v3261_v51 = vld [vmem:[%s2804_s10 + $0x358] sm:$0xff]  ;;  %v310_v47 = vld [vmem:[%s2804_s10 + $0x3b0] sm:$0xff]  ;;  %v492_v14 = vadd.f32 %v3254_v57, %v3251_v49  ;;  %v489_v50 = vadd.f32 %v488_v8, %v3258_v61 }
  0x6f   : > { %470 = vadd.xlane.f32.xlu1 %v469_v28  ;;  %5964 = vst [vmem:[#allocation83_spill] sm:$0xff] %v3261_v51  ;;  %v3271_v28 = vld [vmem:[%s2804_s10 + $0x3e0] sm:$0xff]  ;;  %v3274_v10 = vld [vmem:[%s2804_s10 + $0x3e8] sm:$0xff]  ;;  %v306_v15 = vld [vmem:[%s2804_s10 + $0x390] sm:$0xff]  ;;  %v498_v45 = vadd.f32 %v497_v25, %v310_v47  ;;  %v484_v49 = vadd.f32 %v483_v19, %v3261_v51 }
  0x70   : > { %465 = vadd.xlane.f32.xlu0 %v464_v60  ;;  %5965 = vst [vmem:[#allocation84_spill] sm:$0xff] %v3271_v28  ;;  %5966 = vst [vmem:[#allocation85_spill] sm:$0xff] %v3274_v10  ;;  %v3278_v30 = vld [vmem:[%s2804_s10 + $0x3c0] sm:$0xff]  ;;  %v3281_v60 = vld [vmem:[%s2804_s10 + $0x3c8] sm:$0xff]  ;;  %v507_v57 = vadd.f32 %v3274_v10, %v3271_v28  ;;  %v493_v54 = vadd.f32 %v492_v14, %v306_v15 }
  0x71   : > { %5967 = vst [vmem:[#allocation86_spill] sm:$0xff] %v3278_v30  ;;  %5968 = vst [vmem:[#allocation87_spill] sm:$0xff] %v3281_v60  ;;  %v311_v42 = vld [vmem:[%s2804_s10 + $0x3b8] sm:$0xff]  ;;  %v318_v36 = vld [vmem:[%s2804_s10 + $0x3f0] sm:$0xff] }
  0x72   : > { %v3286_v56 = vld [vmem:[%s2804_s10 + $0x398] sm:$0xff]  ;;  %v3295_v40 = vld [vmem:[%s2804_s10 + $0x420] sm:$0xff]  ;;  %v3298_v8 = vld [vmem:[%s2804_s10 + $0x428] sm:$0xff]  ;;  %v499_v19 = vadd.f32 %v498_v45, %v311_v42  ;;  %v508_v15 = vadd.f32 %v507_v57, %v318_v36 }
  0x73   : > { %480 = vadd.xlane.f32.xlu1 %v479_v55  ;;  %5969 = vst [vmem:[#allocation88_spill] sm:$0xff] %v3286_v56  ;;  %v502_v55 = vadd.f32 %v3281_v60, %v3278_v30  ;;  %5970 = vst [vmem:[#allocation89_spill] sm:$0xff] %v3295_v40  ;;  %v314_v47 = vld [vmem:[%s2804_s10 + $0x3d0] sm:$0xff]  ;;  %v3302_v25 = vld [vmem:[%s2804_s10 + $0x400] sm:$0xff]  ;;  %v517_v51 = vadd.f32 %v3298_v8, %v3295_v40  ;;  %v494_v60 = vadd.f32 %v493_v54, %v3286_v56 }
  0x74   : > { %475 = vadd.xlane.f32.xlu0 %v474_v24  ;;  %5971 = vst [vmem:[#allocation90_spill] sm:$0xff] %v3298_v8  ;;  %5972 = vst [vmem:[#allocation91_spill] sm:$0xff] %v3302_v25  ;;  %v3305_v24 = vld [vmem:[%s2804_s10 + $0x408] sm:$0xff]  ;;  %v319_v14 = vld [vmem:[%s2804_s10 + $0x3f8] sm:$0xff] }
  0x75   : > { %5973 = vst [vmem:[#allocation92_spill] sm:$0xff] %v3305_v24  ;;  %v315_v61 = vld [vmem:[%s2804_s10 + $0x3d8] sm:$0xff]  ;;  %v503_v30 = vadd.f32 %v502_v55, %v314_v47  ;;  %v326_v10 = vld [vmem:[%s2804_s10 + $0x430] sm:$0xff]  ;;  %v512_v28 = vadd.f32 %v3305_v24, %v3302_v25  ;;  %v3316_v35 = vld [vmem:[%s2804_s10 + $0x460] sm:$0xff]  ;;  %v509_v54 = vadd.f32 %v508_v15, %v319_v14 }
  0x76   : > { %5974 = vst [vmem:[#allocation93_spill] sm:$0xff] %v3316_v35  ;;  %v3319_v45 = vld [vmem:[%s2804_s10 + $0x468] sm:$0xff]  ;;  %v322_v36 = vld [vmem:[%s2804_s10 + $0x410] sm:$0xff]  ;;  %v3323_v57 = vld [vmem:[%s2804_s10 + $0x440] sm:$0xff]  ;;  %v518_v42 = vadd.f32 %v517_v51, %v326_v10 }
  0x77   : > { %490 = vadd.xlane.f32.xlu1 %v489_v50  ;;  %5975 = vst [vmem:[#allocation94_spill] sm:$0xff] %v3319_v45  ;;  %5976 = vst [vmem:[#allocation95_spill] sm:$0xff] %v3323_v57  ;;  %v327_v50 = vld [vmem:[%s2804_s10 + $0x438] sm:$0xff]  ;;  %v527_v47 = vadd.f32 %v3319_v45, %v3316_v35  ;;  %v504_v56 = vadd.f32 %v503_v30, %v315_v61  ;;  %v513_v24 = vadd.f32 %v512_v28, %v322_v36  ;;  %v334_v25 = vld [vmem:[%s2804_s10 + $0x470] sm:$0xff] }
  0x78   : > { %485 = vadd.xlane.f32.xlu0 %v484_v49  ;;  %v3326_v49 = vld [vmem:[%s2804_s10 + $0x448] sm:$0xff]  ;;  %v323_v55 = vld [vmem:[%s2804_s10 + $0x418] sm:$0xff]  ;;  %v3336_v40 = vld [vmem:[%s2804_s10 + $0x4a0] sm:$0xff]  ;;  %v519_v30 = vadd.f32 %v518_v42, %v327_v50 }
  0x79   : > { %5977 = vst [vmem:[#allocation96_spill] sm:$0xff] %v3326_v49  ;;  %v522_v8 = vadd.f32 %v3326_v49, %v3323_v57  ;;  %5978 = vst [vmem:[#allocation97_spill] sm:$0xff] %v3336_v40  ;;  %v330_v51 = vld [vmem:[%s2804_s10 + $0x450] sm:$0xff]  ;;  %v3343_v10 = vld [vmem:[%s2804_s10 + $0x480] sm:$0xff]  ;;  %v528_v28 = vadd.f32 %v527_v47, %v334_v25  ;;  %v514_v36 = vadd.f32 %v513_v24, %v323_v55 }
  0x7a   : > { %5980 = vst [vmem:[#allocation99_spill] sm:$0xff] %v3343_v10  ;;  %v3346_v14 = vld [vmem:[%s2804_s10 + $0x488] sm:$0xff]  ;;  %v335_v61 = vld [vmem:[%s2804_s10 + $0x478] sm:$0xff]  ;;  %v342_v57 = vld [vmem:[%s2804_s10 + $0x4b0] sm:$0xff] }
  0x7b   : > { %500 = vadd.xlane.f32.xlu1 %v499_v19  ;;  %v3339_v19 = vld [vmem:[%s2804_s10 + $0x4a8] sm:$0xff]  ;;  %5981 = vst [vmem:[#allocation100_spill] sm:$0xff] %v3346_v14  ;;  %v523_v49 = vadd.f32 %v522_v8, %v330_v51  ;;  %v532_v45 = vadd.f32 %v3346_v14, %v3343_v10  ;;  %v3356_v35 = vld [vmem:[%s2804_s10 + $0x4e0] sm:$0xff]  ;;  %v338_v25 = vld [vmem:[%s2804_s10 + $0x490] sm:$0xff] }
  0x7c   : > { %495 = vadd.xlane.f32.xlu0 %v494_v60  ;;  %5979 = vst [vmem:[#allocation98_spill] sm:$0xff] %v3339_v19  ;;  %v331_v60 = vld [vmem:[%s2804_s10 + $0x458] sm:$0xff]  ;;  %v537_v15 = vadd.f32 %v3339_v19, %v3336_v40  ;;  %v3363_v50 = vld [vmem:[%s2804_s10 + $0x4c0] sm:$0xff]  ;;  %v3366_v42 = vld [vmem:[%s2804_s10 + $0x4c8] sm:$0xff] }
  0x7d   : > { %5983 = vst [vmem:[#allocation102_spill] sm:$0xff] %v3366_v42  ;;  %v524_v55 = vadd.f32 %v523_v49, %v331_v60  ;;  %v343_v47 = vld [vmem:[%s2804_s10 + $0x4b8] sm:$0xff]  ;;  %v533_v51 = vadd.f32 %v532_v45, %v338_v25  ;;  %v350_v14 = vld [vmem:[%s2804_s10 + $0x4f0] sm:$0xff]  ;;  %v542_v10 = vadd.f32 %v3366_v42, %v3363_v50 }
  0x7e   : > { %v538_v8 = vadd.f32 %v537_v15, %v342_v57  ;;  %v339_v19 = vld [vmem:[%s2804_s10 + $0x498] sm:$0xff]  ;;  %v346_v40 = vld [vmem:[%s2804_s10 + $0x4d0] sm:$0xff] }
  0x7f   : > { %510 = vadd.xlane.f32.xlu1 %v509_v54  ;;  %v3359_v54 = vld [vmem:[%s2804_s10 + $0x4e8] sm:$0xff]  ;;  %v351_v57 = vld [vmem:[%s2804_s10 + $0x4f8] sm:$0xff] }
  0x80   : > { %505 = vadd.xlane.f32.xlu0 %v504_v56  ;;  %5982 = vst [vmem:[#allocation101_spill] sm:$0xff] %v3359_v54  ;;  %v529_v56 = vadd.f32 %v528_v28, %v335_v61  ;;  %v547_v24 = vadd.f32 %v3359_v54, %v3356_v35  ;;  %v539_v34 = vadd.f32 %v538_v8, %v343_v47  ;;  %v347_v15 = vld [vmem:[%s2804_s10 + $0x4d8] sm:$0xff] }
  0x81   : > { %v534_v61 = vadd.f32 %v533_v51, %v339_v19  ;;  %v543_v28 = vadd.f32 %v542_v10, %v346_v40 }
  0x83   : > { %520 = vadd.xlane.f32.xlu1 %v519_v30  ;;  %v548_v30 = vadd.f32 %v547_v24, %v350_v14  ;;  %v544_v49 = vadd.f32 %v543_v28, %v347_v15 }
  0x84   : > { %515 = vadd.xlane.f32.xlu0 %v514_v36 }
  0x85   : > { %v549_v54 = vadd.f32 %v548_v30, %v351_v57 }
  0x87   : > { %530 = vadd.xlane.f32.xlu1 %v529_v56 }
  0x88   : > { %525 = vadd.xlane.f32.xlu0 %v524_v55 }
  0x8b   : > { %540 = vadd.xlane.f32.xlu1 %v539_v34 }
  0x8c   : > { %535 = vadd.xlane.f32.xlu0 %v534_v61 }
  0x8f   : > { %550 = vadd.xlane.f32.xlu1 %v549_v54 }
  0x90   : > { %545 = vadd.xlane.f32.xlu0 %v544_v49 }
  0xd0   : > { %v366_v45 = vpop.xlane.xlu1 %365 }
  0xd1   : > { %v554_v60 = vmul.f32 0.001953125, %v366_v45  ;;  %v356_v36 = vpop.xlane.xlu0 %355 }
  0xd2   : > { %v552_v25 = vmul.f32 0.001953125, %v356_v36 }
  0xd3   : > { %v3379_v42 = vsub.f32 %v2811_v0, %v554_v60  ;;  %v3382_v14 = vsub.f32 %v2814_v1, %v554_v60  ;;  %v3385_v19 = vsub.f32 %v2817_v2, %v554_v60  ;;  %v3388_v34 = vsub.f32 %v2828_v6, %v554_v60 }
  0xd4   : > { %v3391_v40 = vsub.f32 %v2822_v4, %v552_v25  ;;  %v3394_v10 = vsub.f32 %v2825_v5, %v552_v25  ;;  %v371_v54 = vpop.xlane.xlu1 %370  ;;  %v3397_v56 = vsub.f32 %v2831_v7, %v552_v25  ;;  %v3400_v0 = vsub.f32 %v2840_v11, %v552_v25 }
  0xd5   : > { %v555_v1 = vmul.f32 0.001953125, %v371_v54  ;;  %v361_v8 = vpop.xlane.xlu0 %360  ;;  %v760_v2 = vmul.f32 %v3379_v42, %v3379_v42  ;;  %v761_v6 = vmul.f32 %v3382_v14, %v3382_v14  ;;  %v762_v4 = vmul.f32 %v3385_v19, %v3385_v19 }
  0xd6   : > { %v553_v5 = vmul.f32 0.001953125, %v361_v8  ;;  %v752_v24 = vmul.f32 %v3391_v40, %v3391_v40  ;;  %v753_v7 = vmul.f32 %v3394_v10, %v3394_v10  ;;  %v754_v11 = vmul.f32 %v3397_v56, %v3397_v56 }
  0xd7   : > { %v3415_v55 = vsub.f32 %v2836_v9, %v555_v1  ;;  %v3418_v47 = vsub.f32 %v2843_v12, %v555_v1  ;;  %v755_v51 = vmul.f32 %v3400_v0, %v3400_v0  ;;  %v763_v30 = vmul.f32 %v3388_v34, %v3388_v34 }
  0xd8   : > { %v3425_v61 = vsub.f32 %v2852_v16, %v553_v5  ;;  %v3428_v57 = vsub.f32 %v2855_v17, %v553_v5  ;;  %v381_v28 = vpop.xlane.xlu1 %380  ;;  %v912_v15 = vadd.f32 %v753_v7, %v752_v24  ;;  %v922_v49 = vadd.f32 %v761_v6, %v760_v2 }
  0xd9   : > { %v557_v9 = vmul.f32 0.001953125, %v381_v28  ;;  %v376_v45 = vpop.xlane.xlu0 %375  ;;  %v3431_v12 = vsub.f32 %v2858_v18, %v553_v5  ;;  %v3434_v60 = vsub.f32 %v2875_v26, %v553_v5  ;;  %v3437_v36 = vsub.f32 %v2846_v13, %v555_v1 }
  0xda   : > { %v556_v25 = vmul.f32 0.001953125, %v376_v45  ;;  %v913_v16 = vadd.f32 %v912_v15, %v754_v11  ;;  %v923_v54 = vadd.f32 %v922_v49, %v762_v4  ;;  %v756_v17 = vmul.f32 %v3425_v61, %v3425_v61 }
  0xdb   : > { %v3442_v8 = vsub.f32 %v2867_v22, %v557_v9  ;;  %v3445_v2 = vsub.f32 %v2870_v23, %v557_v9  ;;  %v757_v18 = vmul.f32 %v3428_v57, %v3428_v57  ;;  %v758_v26 = vmul.f32 %v3431_v12, %v3431_v12 }
  0xdc   : > { %v3452_v13 = vsub.f32 %v2883_v29, %v556_v25  ;;  %v3455_v6 = vsub.f32 %v2890_v32, %v556_v25  ;;  %v391_v4 = vpop.xlane.xlu1 %390  ;;  %v914_v5 = vadd.f32 %v913_v16, %v755_v51  ;;  %v924_v24 = vadd.f32 %v923_v54, %v763_v30 }
  0xdd   : > { %5984 = vst [vmem:[#allocation103_spill] sm:$0xff] %v3442_v8  ;;  %5985 = vst [vmem:[#allocation104_spill] sm:$0xff] %v3445_v2  ;;  %v3457_v22 = vmul.f32 0.001953125, %v391_v4  ;;  %v386_v7 = vpop.xlane.xlu0 %385  ;;  %v759_v23 = vmul.f32 %v3434_v60, %v3434_v60  ;;  %v917_v11 = vadd.f32 %v757_v18, %v756_v17  ;;  %v3462_v28 = vsub.f32 %v2862_v20, %v555_v1 }
  0xde   : > { %v558_v15 = vmul.f32 0.001953125, %v386_v7  ;;  %915 = vadd.xlane.f32.xlu0 %v914_v5  ;;  %v764_v29 = vmul.f32 %v3415_v55, %v3415_v55  ;;  %v765_v32 = vmul.f32 %v3418_v47, %v3418_v47  ;;  %v766_v51 = vmul.f32 %v3437_v36, %v3437_v36 }
  0xdf   : > { %v3472_v30 = vsub.f32 %v2900_v37, %v3457_v22  ;;  %v3476_v49 = vsub.f32 %v2903_v38, %v3457_v22  ;;  %v918_v20 = vadd.f32 %v917_v11, %v758_v26  ;;  %v767_v1 = vmul.f32 %v3462_v28, %v3462_v28 }
  0xe0   : > { %v3481_v45 = vsub.f32 %v2915_v43, %v558_v15  ;;  %v3484_v16 = vsub.f32 %v2918_v44, %v558_v15  ;;  %v401_v54 = vpop.xlane.xlu1 %400  ;;  %v927_v17 = vadd.f32 %v765_v32, %v764_v29  ;;  %v3487_v18 = vsub.f32 %v2893_v33, %v556_v25 }
  0xe1   : > { %5986 = vst [vmem:[#allocation105_spill] sm:$0xff] %v3472_v30  ;;  %5987 = vst [vmem:[#allocation106_spill] sm:$0xff] %v3476_v49  ;;  %v3489_v37 = vmul.f32 0.001953125, %v401_v54  ;;  %v396_v4 = vpop.xlane.xlu0 %395  ;;  %v919_v38 = vadd.f32 %v918_v20, %v759_v23  ;;  %v3492_v26 = vsub.f32 %v2910_v41, %v556_v25  ;;  %v768_v5 = vmul.f32 %v3452_v13, %v3452_v13 }
  0xe2   : > { %5988 = vst [vmem:[#allocation107_spill] sm:$0xff] %v3481_v45  ;;  %5989 = vst [vmem:[#allocation108_spill] sm:$0xff] %v3484_v16  ;;  %v560_v43 = vmul.f32 0.001953125, %v396_v4  ;;  %925 = vadd.xlane.f32.xlu0 %v924_v24  ;;  %v928_v7 = vadd.f32 %v927_v17, %v766_v51  ;;  %v769_v44 = vmul.f32 %v3455_v6, %v3455_v6 }
  0xe3   : > { %5990 = vst [vmem:[#allocation109_spill] sm:$0xff] %v3487_v18  ;;  %5991 = vst [vmem:[#allocation110_spill] sm:$0xff] %v3492_v26  ;;  %v770_v33 = vmul.f32 %v3487_v18, %v3487_v18  ;;  %v3502_v11 = vsub.f32 %v2927_v48, %v3489_v37  ;;  %v3506_v41 = vsub.f32 %v2938_v53, %v3489_v37  ;;  %920 = vadd.xlane.f32.xlu1 %v919_v38 }
  0xe4   : > { %v771_v25 = vmul.f32 %v3492_v26, %v3492_v26  ;;  %v3511_v24 = vsub.f32 %v2878_v27, %v557_v9  ;;  %v3514_v23 = vsub.f32 %v2948_v58, %v560_v43  ;;  %v3517_v29 = vsub.f32 %v2951_v59, %v560_v43  ;;  %v411_v32 = vpop.xlane.xlu1 %410 }
  0xe5   : > { %5992 = vst [vmem:[#allocation111_spill] sm:$0xff] %v3502_v11  ;;  %5993 = vst [vmem:[#allocation112_spill] sm:$0xff] %v3506_v41  ;;  %v929_v48 = vadd.f32 %v928_v7, %v767_v1  ;;  %v932_v51 = vadd.f32 %v769_v44, %v768_v5  ;;  %v3519_v20 = vmul.f32 0.001953125, %v411_v32  ;;  %v406_v53 = vpop.xlane.xlu0 %405  ;;  %v3522_v54 = vsub.f32 %v2887_v31, %v557_v9 }
  0xe6   : > { %5994 = vst [vmem:[#allocation113_spill] sm:$0xff] %v3511_v24  ;;  %5995 = vst [vmem:[#allocation114_spill] sm:$0xff] %v3514_v23  ;;  %v772_v17 = vmul.f32 %v3442_v8, %v3442_v8  ;;  %v773_v27 = vmul.f32 %v3445_v2, %v3445_v2  ;;  %v3528_v58 = vmul.f32 0.001953125, %v406_v53  ;;  %v774_v59 = vmul.f32 %v3511_v24, %v3511_v24 }
  0xe7   : > { %5996 = vst [vmem:[#allocation115_spill] sm:$0xff] %v3517_v29  ;;  %5997 = vst [vmem:[#allocation116_spill] sm:$0xff] %v3522_v54  ;;  %v933_v4 = vadd.f32 %v932_v51, %v770_v33  ;;  %v3533_v1 = vsub.f32 %v2922_v46, %v558_v15  ;;  %v3537_v38 = vsub.f32 %v2959_v62, %v3519_v20  ;;  %930 = vadd.xlane.f32.xlu1 %v929_v48 }
  0xe8   : > { %v3541_v31 = vsub.f32 %v2962_v63, %v3519_v20  ;;  %v775_v9 = vmul.f32 %v3522_v54, %v3522_v54  ;;  %v937_v5 = vadd.f32 %v773_v27, %v772_v17  ;;  %v3547_v7 = vsub.f32 %v2965_v3, %v3528_v58  ;;  %v421_v62 = vpop.xlane.xlu1 %420  ;;  %v6007_v27 = vld [vmem:[#allocation15_spill] sm:$0xff] }
  0xe9   : > { %5998 = vst [vmem:[#allocation117_spill] sm:$0xff] %v3533_v1  ;;  %5999 = vst [vmem:[#allocation118_spill] sm:$0xff] %v3537_v38  ;;  %v3551_v46 = vsub.f32 %v2978_v21, %v3528_v58  ;;  %v934_v44 = vadd.f32 %v933_v4, %v771_v25  ;;  %v3554_v33 = vsub.f32 %v2935_v52, %v558_v15  ;;  %v3556_v63 = vmul.f32 0.001953125, %v421_v62  ;;  %v416_v32 = vpop.xlane.xlu0 %415  ;;  %v6005_v25 = vld [vmem:[#allocation14_spill] sm:$0xff] }
  0xea   : > { %6000 = vst [vmem:[#allocation119_spill] sm:$0xff] %v3541_v31  ;;  %6001 = vst [vmem:[#allocation120_spill] sm:$0xff] %v3547_v7  ;;  %v938_v48 = vadd.f32 %v937_v5, %v774_v59  ;;  %v776_v51 = vmul.f32 %v3481_v45, %v3481_v45  ;;  %v777_v3 = vmul.f32 %v3484_v16, %v3484_v16  ;;  %v3562_v53 = vmul.f32 0.001953125, %v416_v32  ;;  %v6011_v32 = vld [vmem:[#allocation18_spill] sm:$0xff] }
  0xeb   : > { %6002 = vst [vmem:[#allocation121_spill] sm:$0xff] %v3551_v46  ;;  %6003 = vst [vmem:[#allocation122_spill] sm:$0xff] %v3554_v33  ;;  %935 = vadd.xlane.f32.xlu0 %v934_v44  ;;  %v778_v21 = vmul.f32 %v3533_v1, %v3533_v1  ;;  %v779_v52 = vmul.f32 %v3554_v33, %v3554_v33  ;;  %v3570_v15 = vsub.f32 %v2906_v39, %v3457_v22  ;;  %v6009_v44 = vld [vmem:[#allocation17_spill] sm:$0xff]  ;;  %v6013_v1 = vld [vmem:[#allocation8_spill] sm:$0xff] }
  0xec   : > { %v3574_v17 = vsub.f32 %v6005_v25, %v3556_v63  ;;  %v3578_v4 = vsub.f32 %v6007_v27, %v3556_v63  ;;  %v939_v59 = vadd.f32 %v938_v48, %v775_v9  ;;  %v942_v5 = vadd.f32 %v777_v3, %v776_v51  ;;  %v431_v39 = vpop.xlane.xlu1 %430 }
  0xed   : > { %6004 = vst [vmem:[#allocation123_spill] sm:$0xff] %v3570_v15  ;;  %v3582_v62 = vsub.f32 %v6009_v44, %v3562_v53  ;;  %v3586_v33 = vsub.f32 %v6011_v32, %v3562_v53  ;;  %v3590_v16 = vsub.f32 %v6013_v1, %v3457_v22  ;;  %v780_v25 = vmul.f32 %v3472_v30, %v3472_v30  ;;  %v426_v48 = vpop.xlane.xlu0 %425  ;;  %v6015_v1 = vld [vmem:[#allocation10_spill] sm:$0xff]  ;;  %v6017_v30 = vld [vmem:[#allocation12_spill] sm:$0xff] }
  0xee   : > { %6006 = vst [vmem:[#allocation14_spill] sm:$0xff] %v3574_v17  ;;  %6008 = vst [vmem:[#allocation15_spill] sm:$0xff] %v3578_v4  ;;  %940 = vadd.xlane.f32.xlu1 %v939_v59  ;;  %v943_v27 = vadd.f32 %v942_v5, %v778_v21  ;;  %v3594_v9 = vmul.f32 0.001953125, %v431_v39  ;;  %v781_v51 = vmul.f32 %v3476_v49, %v3476_v49  ;;  %v3600_v44 = vmul.f32 0.001953125, %v426_v48  ;;  %v6019_v5 = vld [vmem:[#allocation22_spill] sm:$0xff]  ;;  %v6021_v49 = vld [vmem:[#allocation23_spill] sm:$0xff] }
  0xef   : > { %6010 = vst [vmem:[#allocation17_spill] sm:$0xff] %v3582_v62  ;;  %6012 = vst [vmem:[#allocation18_spill] sm:$0xff] %v3586_v33  ;;  %v782_v3 = vmul.f32 %v3570_v15, %v3570_v15  ;;  %v783_v22 = vmul.f32 %v3590_v16, %v3590_v16  ;;  %v3605_v32 = vsub.f32 %v6015_v1, %v560_v43  ;;  %v6023_v15 = vld [vmem:[#allocation25_spill] sm:$0xff]  ;;  %v6025_v1 = vld [vmem:[#allocation26_spill] sm:$0xff] }
  0xf0   : > { %6014 = vst [vmem:[#allocation8_spill] sm:$0xff] %v3590_v16  ;;  %v3608_v59 = vsub.f32 %v6017_v30, %v560_v43  ;;  %v944_v21 = vadd.f32 %v943_v27, %v779_v52  ;;  %v3612_v39 = vsub.f32 %v6019_v5, %v3594_v9  ;;  %v3616_v45 = vsub.f32 %v6021_v49, %v3594_v9  ;;  %v441_v52 = vpop.xlane.xlu1 %440 }
  0xf1   : > { %6016 = vst [vmem:[#allocation10_spill] sm:$0xff] %v3605_v32  ;;  %v947_v48 = vadd.f32 %v781_v51, %v780_v25  ;;  %v3620_v54 = vsub.f32 %v6023_v15, %v3600_v44  ;;  %v3624_v16 = vsub.f32 %v6025_v1, %v3600_v44  ;;  %v784_v30 = vmul.f32 %v3514_v23, %v3514_v23  ;;  %v436_v51 = vpop.xlane.xlu0 %435  ;;  %v6027_v23 = vld [vmem:[#allocation9_spill] sm:$0xff] }
  0xf2   : > { %6018 = vst [vmem:[#allocation12_spill] sm:$0xff] %v3608_v59  ;;  %6020 = vst [vmem:[#allocation22_spill] sm:$0xff] %v3612_v39  ;;  %v785_v43 = vmul.f32 %v3517_v29, %v3517_v29  ;;  %945 = vadd.xlane.f32.xlu0 %v944_v21  ;;  %v786_v49 = vmul.f32 %v3605_v32, %v3605_v32  ;;  %v787_v15 = vmul.f32 %v3608_v59, %v3608_v59  ;;  %v6029_v29 = vld [vmem:[#allocation11_spill] sm:$0xff] }
  0xf3   : > { %6022 = vst [vmem:[#allocation23_spill] sm:$0xff] %v3616_v45  ;;  %6024 = vst [vmem:[#allocation25_spill] sm:$0xff] %v3620_v54  ;;  %v948_v27 = vadd.f32 %v947_v48, %v782_v3  ;;  %v3634_v25 = vmul.f32 0.001953125, %v441_v52  ;;  %v3636_v1 = vmul.f32 0.001953125, %v436_v51  ;;  %v3640_v24 = vsub.f32 %v6027_v23, %v3489_v37  ;;  %v6031_v48 = vld [vmem:[#allocation30_spill] sm:$0xff]  ;;  %v6033_v52 = vld [vmem:[#allocation31_spill] sm:$0xff] }
  0xf4   : > { %6026 = vst [vmem:[#allocation26_spill] sm:$0xff] %v3624_v16  ;;  %v952_v5 = vadd.f32 %v785_v43, %v784_v30  ;;  %v3644_v21 = vsub.f32 %v6029_v29, %v3489_v37  ;;  %v788_v30 = vmul.f32 %v3502_v11, %v3502_v11  ;;  %v6035_v23 = vld [vmem:[#allocation33_spill] sm:$0xff]  ;;  %v6037_v37 = vld [vmem:[#allocation34_spill] sm:$0xff] }
  0xf5   : > { %6028 = vst [vmem:[#allocation9_spill] sm:$0xff] %v3640_v24  ;;  %v949_v3 = vadd.f32 %v948_v27, %v783_v22  ;;  %v3648_v32 = vsub.f32 %v6031_v48, %v3634_v25  ;;  %v3652_v59 = vsub.f32 %v6033_v52, %v3634_v25  ;;  %v3658_v51 = vsub.f32 %v6035_v23, %v3636_v1  ;;  %v451_v27 = vpop.xlane.xlu1 %450  ;;  %v6041_v23 = vld [vmem:[#allocation20_spill] sm:$0xff] }
  0xf6   : > { %6030 = vst [vmem:[#allocation11_spill] sm:$0xff] %v3644_v21  ;;  %v953_v43 = vadd.f32 %v952_v5, %v786_v49  ;;  %v3662_v29 = vsub.f32 %v6037_v37, %v3636_v1  ;;  %v789_v22 = vmul.f32 %v3506_v41, %v3506_v41  ;;  %v790_v48 = vmul.f32 %v3640_v24, %v3640_v24  ;;  %v6039_v49 = vld [vmem:[#allocation16_spill] sm:$0xff]  ;;  %v446_v37 = vpop.xlane.xlu0 %445 }
  0xf7   : > { %6032 = vst [vmem:[#allocation30_spill] sm:$0xff] %v3648_v32  ;;  %6034 = vst [vmem:[#allocation31_spill] sm:$0xff] %v3652_v59  ;;  %950 = vadd.xlane.f32.xlu1 %v949_v3  ;;  %v791_v52 = vmul.f32 %v3644_v21, %v3644_v21  ;;  %v3672_v5 = vsub.f32 %v6039_v49, %v3528_v58  ;;  %v3676_v11 = vsub.f32 %v6041_v23, %v3528_v58 }
  0xf8   : > { %6036 = vst [vmem:[#allocation33_spill] sm:$0xff] %v3658_v51  ;;  %6038 = vst [vmem:[#allocation34_spill] sm:$0xff] %v3662_v29  ;;  %v954_v2 = vadd.f32 %v953_v43, %v787_v15  ;;  %v957_v8 = vadd.f32 %v789_v22, %v788_v30  ;;  %v792_v3 = vmul.f32 %v3547_v7, %v3547_v7  ;;  %v3686_v41 = vmul.f32 0.001953125, %v451_v27  ;;  %v6043_v30 = vld [vmem:[#allocation13_spill] sm:$0xff]  ;;  %v6045_v22 = vld [vmem:[#allocation19_spill] sm:$0xff] }
  0xf9   : > { %6040 = vst [vmem:[#allocation16_spill] sm:$0xff] %v3672_v5  ;;  %6042 = vst [vmem:[#allocation20_spill] sm:$0xff] %v3676_v11  ;;  %v793_v24 = vmul.f32 %v3551_v46, %v3551_v46  ;;  %v794_v21 = vmul.f32 %v3672_v5, %v3672_v5  ;;  %v795_v49 = vmul.f32 %v3676_v11, %v3676_v11  ;;  %v3688_v26 = vmul.f32 0.001953125, %v446_v37  ;;  %v6047_v5 = vld [vmem:[#allocation38_spill] sm:$0xff]  ;;  %v6049_v27 = vld [vmem:[#allocation39_spill] sm:$0xff] }
  0xfa   : > { %955 = vadd.xlane.f32.xlu0 %v954_v2  ;;  %v958_v58 = vadd.f32 %v957_v8, %v790_v48  ;;  %v3692_v43 = vsub.f32 %v6043_v30, %v3519_v20  ;;  %v3696_v23 = vsub.f32 %v6045_v22, %v3519_v20  ;;  %v3700_v46 = vsub.f32 %v6047_v5, %v3686_v41  ;;  %v6051_v2 = vld [vmem:[#allocation41_spill] sm:$0xff]  ;;  %v461_v30 = vpop.xlane.xlu1 %460  ;;  %v456_v22 = vpop.xlane.xlu0 %455  ;;  %v6055_v7 = vld [vmem:[#allocation24_spill] sm:$0xff] }
  0xfb   : > { %v962_v15 = vadd.f32 %v793_v24, %v792_v3  ;;  %v3704_v11 = vsub.f32 %v6049_v27, %v3686_v41  ;;  %v3708_v8 = vsub.f32 %v6051_v2, %v3688_v26  ;;  %v6053_v24 = vld [vmem:[#allocation42_spill] sm:$0xff]  ;;  %v796_v20 = vmul.f32 %v3537_v38, %v3537_v38 }
  0xfc   : > { %6044 = vst [vmem:[#allocation13_spill] sm:$0xff] %v3692_v43  ;;  %6046 = vst [vmem:[#allocation19_spill] sm:$0xff] %v3696_v23  ;;  %v3712_v48 = vsub.f32 %v6053_v24, %v3688_v26  ;;  %v959_v37 = vadd.f32 %v958_v58, %v791_v52  ;;  %v797_v5 = vmul.f32 %v3541_v31, %v3541_v31  ;;  %v3738_v38 = vmul.f32 0.001953125, %v461_v30  ;;  %v6065_v30 = vld [vmem:[#allocation47_spill] sm:$0xff] }
  0xfd   : > { %6048 = vst [vmem:[#allocation38_spill] sm:$0xff] %v3700_v46  ;;  %6050 = vst [vmem:[#allocation39_spill] sm:$0xff] %v3704_v11  ;;  %v963_v3 = vadd.f32 %v962_v15, %v794_v21  ;;  %v798_v27 = vmul.f32 %v3692_v43, %v3692_v43  ;;  %v799_v2 = vmul.f32 %v3696_v23, %v3696_v23  ;;  %v6057_v21 = vld [vmem:[#allocation28_spill] sm:$0xff]  ;;  %v3740_v18 = vmul.f32 0.001953125, %v456_v22  ;;  %v6067_v22 = vld [vmem:[#allocation49_spill] sm:$0xff] }
  0xfe   : > { %6052 = vst [vmem:[#allocation41_spill] sm:$0xff] %v3708_v8  ;;  %6054 = vst [vmem:[#allocation42_spill] sm:$0xff] %v3712_v48  ;;  %v3724_v24 = vsub.f32 %v6055_v7, %v3562_v53  ;;  %v3728_v52 = vsub.f32 %v6057_v21, %v3562_v53  ;;  %960 = vadd.xlane.f32.xlu1 %v959_v37  ;;  %v967_v15 = vadd.f32 %v797_v5, %v796_v20  ;;  %v6059_v37 = vld [vmem:[#allocation21_spill] sm:$0xff]  ;;  %v6061_v20 = vld [vmem:[#allocation27_spill] sm:$0xff] }
  0xff   : > { %v964_v58 = vadd.f32 %v963_v3, %v795_v49  ;;  %v800_v31 = vmul.f32 %v3582_v62, %v3582_v62  ;;  %v801_v43 = vmul.f32 %v3586_v33, %v3586_v33  ;;  %v3744_v3 = vsub.f32 %v6059_v37, %v3556_v63  ;;  %v6063_v21 = vld [vmem:[#allocation46_spill] sm:$0xff]  ;;  %v6071_v33 = vld [vmem:[#allocation32_spill] sm:$0xff] }
 0x100   : > { %6056 = vst [vmem:[#allocation24_spill] sm:$0xff] %v3724_v24  ;;  %6058 = vst [vmem:[#allocation28_spill] sm:$0xff] %v3728_v52  ;;  %v802_v23 = vmul.f32 %v3724_v24, %v3724_v24  ;;  %v803_v7 = vmul.f32 %v3728_v52, %v3728_v52  ;;  %v968_v53 = vadd.f32 %v967_v15, %v798_v27 }
 0x101   : > { %965 = vadd.xlane.f32.xlu0 %v964_v58  ;;  %v972_v49 = vadd.f32 %v801_v43, %v800_v31  ;;  %6060 = vst [vmem:[#allocation21_spill] sm:$0xff] %v3744_v3  ;;  %v3748_v5 = vsub.f32 %v6061_v20, %v3556_v63  ;;  %v3752_v24 = vsub.f32 %v6063_v21, %v3738_v38  ;;  %v6069_v31 = vld [vmem:[#allocation50_spill] sm:$0xff]  ;;  %v471_v20 = vpop.xlane.xlu1 %470  ;;  %v466_v21 = vpop.xlane.xlu0 %465 }
 0x102   : > { %v3756_v52 = vsub.f32 %v6065_v30, %v3738_v38  ;;  %v3760_v27 = vsub.f32 %v6067_v22, %v3740_v18  ;;  %v3764_v43 = vsub.f32 %v6069_v31, %v3740_v18  ;;  %v969_v58 = vadd.f32 %v968_v53, %v799_v2 }
 0x103   : > { %6062 = vst [vmem:[#allocation27_spill] sm:$0xff] %v3748_v5  ;;  %6064 = vst [vmem:[#allocation46_spill] sm:$0xff] %v3752_v24  ;;  %v973_v15 = vadd.f32 %v972_v49, %v802_v23  ;;  %v804_v63 = vmul.f32 %v3574_v17, %v3574_v17  ;;  %v805_v37 = vmul.f32 %v3578_v4, %v3578_v4  ;;  %v6073_v23 = vld [vmem:[#allocation36_spill] sm:$0xff]  ;;  %v3790_v17 = vmul.f32 0.001953125, %v471_v20  ;;  %v6081_v20 = vld [vmem:[#allocation55_spill] sm:$0xff] }
 0x104   : > { %6066 = vst [vmem:[#allocation47_spill] sm:$0xff] %v3756_v52  ;;  %6068 = vst [vmem:[#allocation49_spill] sm:$0xff] %v3760_v27  ;;  %v806_v30 = vmul.f32 %v3744_v3, %v3744_v3  ;;  %v807_v22 = vmul.f32 %v3748_v5, %v3748_v5  ;;  %v3776_v31 = vsub.f32 %v6071_v33, %v3600_v44  ;;  %970 = vadd.xlane.f32.xlu1 %v969_v58  ;;  %v6075_v58 = vld [vmem:[#allocation29_spill] sm:$0xff] }
 0x105   : > { %6070 = vst [vmem:[#allocation50_spill] sm:$0xff] %v3764_v43  ;;  %v3780_v2 = vsub.f32 %v6073_v23, %v3600_v44  ;;  %v974_v53 = vadd.f32 %v973_v15, %v803_v7  ;;  %v977_v49 = vadd.f32 %v805_v37, %v804_v63  ;;  %v808_v4 = vmul.f32 %v3620_v54, %v3620_v54  ;;  %v6077_v63 = vld [vmem:[#allocation35_spill] sm:$0xff]  ;;  %v6079_v23 = vld [vmem:[#allocation54_spill] sm:$0xff] }
 0x106   : > { %6072 = vst [vmem:[#allocation32_spill] sm:$0xff] %v3776_v31  ;;  %v809_v3 = vmul.f32 %v3624_v16, %v3624_v16  ;;  %v810_v5 = vmul.f32 %v3776_v31, %v3776_v31  ;;  %v3792_v62 = vmul.f32 0.001953125, %v466_v21  ;;  %v3796_v15 = vsub.f32 %v6075_v58, %v3594_v9  ;;  %v6083_v21 = vld [vmem:[#allocation57_spill] sm:$0xff]  ;;  %v6087_v16 = vld [vmem:[#allocation40_spill] sm:$0xff] }
 0x107   : > { %6074 = vst [vmem:[#allocation36_spill] sm:$0xff] %v3780_v2  ;;  %v811_v33 = vmul.f32 %v3780_v2, %v3780_v2  ;;  %975 = vadd.xlane.f32.xlu0 %v974_v53  ;;  %v978_v44 = vadd.f32 %v977_v49, %v806_v30  ;;  %v3800_v37 = vsub.f32 %v6077_v63, %v3594_v9  ;;  %v481_v63 = vpop.xlane.xlu1 %480 }
 0x108   : > { %v982_v7 = vadd.f32 %v809_v3, %v808_v4  ;;  %6076 = vst [vmem:[#allocation29_spill] sm:$0xff] %v3796_v15  ;;  %v3804_v31 = vsub.f32 %v6079_v23, %v3790_v17  ;;  %v3808_v2 = vsub.f32 %v6081_v20, %v3790_v17  ;;  %v3812_v30 = vsub.f32 %v6083_v21, %v3792_v62  ;;  %v6085_v4 = vld [vmem:[#allocation58_spill] sm:$0xff]  ;;  %v476_v23 = vpop.xlane.xlu0 %475 }
 0x109   : > { %6078 = vst [vmem:[#allocation35_spill] sm:$0xff] %v3800_v37  ;;  %v3816_v3 = vsub.f32 %v6085_v4, %v3792_v62  ;;  %v979_v53 = vadd.f32 %v978_v44, %v807_v22  ;;  %v812_v9 = vmul.f32 %v3612_v39, %v3612_v39  ;;  %v813_v58 = vmul.f32 %v3616_v45, %v3616_v45 }
 0x10a   : > { %6080 = vst [vmem:[#allocation54_spill] sm:$0xff] %v3804_v31  ;;  %6082 = vst [vmem:[#allocation55_spill] sm:$0xff] %v3808_v2  ;;  %v983_v49 = vadd.f32 %v982_v7, %v810_v5  ;;  %v814_v20 = vmul.f32 %v3796_v15, %v3796_v15  ;;  %v815_v21 = vmul.f32 %v3800_v37, %v3800_v37  ;;  %v6089_v5 = vld [vmem:[#allocation44_spill] sm:$0xff]  ;;  %v3842_v39 = vmul.f32 0.001953125, %v481_v63  ;;  %v6097_v63 = vld [vmem:[#allocation63_spill] sm:$0xff] }
 0x10b   : > { %6084 = vst [vmem:[#allocation57_spill] sm:$0xff] %v3812_v30  ;;  %6086 = vst [vmem:[#allocation58_spill] sm:$0xff] %v3816_v3  ;;  %v3828_v4 = vsub.f32 %v6087_v16, %v3636_v1  ;;  %v3832_v22 = vsub.f32 %v6089_v5, %v3636_v1  ;;  %980 = vadd.xlane.f32.xlu1 %v979_v53  ;;  %v987_v7 = vadd.f32 %v813_v58, %v812_v9  ;;  %v6091_v53 = vld [vmem:[#allocation37_spill] sm:$0xff]  ;;  %v6093_v9 = vld [vmem:[#allocation43_spill] sm:$0xff] }
 0x10c   : > { %v984_v44 = vadd.f32 %v983_v49, %v811_v33  ;;  %v816_v45 = vmul.f32 %v3658_v51, %v3658_v51  ;;  %v817_v15 = vmul.f32 %v3662_v29, %v3662_v29  ;;  %v3844_v54 = vmul.f32 0.001953125, %v476_v23  ;;  %v6095_v5 = vld [vmem:[#allocation62_spill] sm:$0xff]  ;;  %v6099_v23 = vld [vmem:[#allocation65_spill] sm:$0xff]  ;;  %v6103_v29 = vld [vmem:[#allocation48_spill] sm:$0xff] }
 0x10d   : > { %6088 = vst [vmem:[#allocation40_spill] sm:$0xff] %v3828_v4  ;;  %6090 = vst [vmem:[#allocation44_spill] sm:$0xff] %v3832_v22  ;;  %v818_v37 = vmul.f32 %v3828_v4, %v3828_v4  ;;  %v819_v16 = vmul.f32 %v3832_v22, %v3832_v22  ;;  %v988_v1 = vadd.f32 %v987_v7, %v814_v20 }
 0x10e   : > { %985 = vadd.xlane.f32.xlu0 %v984_v44  ;;  %v992_v33 = vadd.f32 %v817_v15, %v816_v45  ;;  %v3848_v49 = vsub.f32 %v6091_v53, %v3634_v25  ;;  %v3852_v58 = vsub.f32 %v6093_v9, %v3634_v25  ;;  %v3856_v4 = vsub.f32 %v6095_v5, %v3842_v39  ;;  %v6101_v45 = vld [vmem:[#allocation66_spill] sm:$0xff]  ;;  %v491_v9 = vpop.xlane.xlu1 %490  ;;  %v486_v5 = vpop.xlane.xlu0 %485 }
 0x10f   : > { %v3860_v22 = vsub.f32 %v6097_v63, %v3842_v39  ;;  %v3864_v20 = vsub.f32 %v6099_v23, %v3844_v54  ;;  %v3868_v15 = vsub.f32 %v6101_v45, %v3844_v54  ;;  %v989_v44 = vadd.f32 %v988_v1, %v815_v21 }
 0x110   : > { %6092 = vst [vmem:[#allocation37_spill] sm:$0xff] %v3848_v49  ;;  %6094 = vst [vmem:[#allocation43_spill] sm:$0xff] %v3852_v58  ;;  %v993_v7 = vadd.f32 %v992_v33, %v818_v37  ;;  %v820_v25 = vmul.f32 %v3648_v32, %v3648_v32  ;;  %v821_v53 = vmul.f32 %v3652_v59, %v3652_v59  ;;  %v6105_v37 = vld [vmem:[#allocation52_spill] sm:$0xff]  ;;  %v3894_v32 = vmul.f32 0.001953125, %v491_v9  ;;  %v6113_v9 = vld [vmem:[#allocation71_spill] sm:$0xff] }
 0x111   : > { %6096 = vst [vmem:[#allocation62_spill] sm:$0xff] %v3856_v4  ;;  %6098 = vst [vmem:[#allocation63_spill] sm:$0xff] %v3860_v22  ;;  %v822_v63 = vmul.f32 %v3848_v49, %v3848_v49  ;;  %v823_v23 = vmul.f32 %v3852_v58, %v3852_v58  ;;  %v3880_v45 = vsub.f32 %v6103_v29, %v3688_v26  ;;  %990 = vadd.xlane.f32.xlu1 %v989_v44  ;;  %v6107_v44 = vld [vmem:[#allocation45_spill] sm:$0xff] }
 0x112   : > { %6100 = vst [vmem:[#allocation65_spill] sm:$0xff] %v3864_v20  ;;  %6102 = vst [vmem:[#allocation66_spill] sm:$0xff] %v3868_v15  ;;  %v3884_v21 = vsub.f32 %v6105_v37, %v3688_v26  ;;  %v994_v1 = vadd.f32 %v993_v7, %v819_v16  ;;  %v997_v33 = vadd.f32 %v821_v53, %v820_v25  ;;  %v3896_v51 = vmul.f32 0.001953125, %v486_v5  ;;  %v6109_v25 = vld [vmem:[#allocation51_spill] sm:$0xff]  ;;  %v6111_v37 = vld [vmem:[#allocation70_spill] sm:$0xff] }
 0x113   : > { %6104 = vst [vmem:[#allocation48_spill] sm:$0xff] %v3880_v45  ;;  %v824_v59 = vmul.f32 %v3708_v8, %v3708_v8  ;;  %v825_v49 = vmul.f32 %v3712_v48, %v3712_v48  ;;  %v826_v58 = vmul.f32 %v3880_v45, %v3880_v45  ;;  %v3900_v7 = vsub.f32 %v6107_v44, %v3686_v41  ;;  %v6115_v5 = vld [vmem:[#allocation73_spill] sm:$0xff]  ;;  %v6119_v48 = vld [vmem:[#allocation56_spill] sm:$0xff] }
 0x114   : > { %6106 = vst [vmem:[#allocation52_spill] sm:$0xff] %v3884_v21  ;;  %v827_v29 = vmul.f32 %v3884_v21, %v3884_v21  ;;  %995 = vadd.xlane.f32.xlu0 %v994_v1  ;;  %v998_v26 = vadd.f32 %v997_v33, %v822_v63  ;;  %v3904_v53 = vsub.f32 %v6109_v25, %v3686_v41  ;;  %v501_v25 = vpop.xlane.xlu1 %500 }
 0x115   : > { %v1002_v16 = vadd.f32 %v825_v49, %v824_v59  ;;  %6108 = vst [vmem:[#allocation45_spill] sm:$0xff] %v3900_v7  ;;  %v3908_v45 = vsub.f32 %v6111_v37, %v3894_v32  ;;  %v3912_v21 = vsub.f32 %v6113_v9, %v3894_v32  ;;  %v3916_v63 = vsub.f32 %v6115_v5, %v3896_v51  ;;  %v6117_v59 = vld [vmem:[#allocation74_spill] sm:$0xff]  ;;  %v496_v37 = vpop.xlane.xlu0 %495 }
 0x116   : > { %6110 = vst [vmem:[#allocation51_spill] sm:$0xff] %v3904_v53  ;;  %v3920_v49 = vsub.f32 %v6117_v59, %v3896_v51  ;;  %v999_v1 = vadd.f32 %v998_v26, %v823_v23  ;;  %v828_v41 = vmul.f32 %v3700_v46, %v3700_v46  ;;  %v829_v44 = vmul.f32 %v3704_v11, %v3704_v11 }
 0x117   : > { %6112 = vst [vmem:[#allocation70_spill] sm:$0xff] %v3908_v45  ;;  %6114 = vst [vmem:[#allocation71_spill] sm:$0xff] %v3912_v21  ;;  %v1003_v33 = vadd.f32 %v1002_v16, %v826_v58  ;;  %v830_v9 = vmul.f32 %v3900_v7, %v3900_v7  ;;  %v831_v5 = vmul.f32 %v3904_v53, %v3904_v53  ;;  %v6121_v58 = vld [vmem:[#allocation60_spill] sm:$0xff]  ;;  %v3946_v46 = vmul.f32 0.001953125, %v501_v25  ;;  %v6129_v25 = vld [vmem:[#allocation78_spill] sm:$0xff] }
 0x118   : > { %6116 = vst [vmem:[#allocation73_spill] sm:$0xff] %v3916_v63  ;;  %6118 = vst [vmem:[#allocation74_spill] sm:$0xff] %v3920_v49  ;;  %v3932_v59 = vsub.f32 %v6119_v48, %v3740_v18  ;;  %v3936_v23 = vsub.f32 %v6121_v58, %v3740_v18  ;;  %1000 = vadd.xlane.f32.xlu1 %v999_v1  ;;  %v1007_v16 = vadd.f32 %v829_v44, %v828_v41  ;;  %v6123_v1 = vld [vmem:[#allocation53_spill] sm:$0xff]  ;;  %v6125_v41 = vld [vmem:[#allocation59_spill] sm:$0xff] }
 0x119   : > { %v1004_v26 = vadd.f32 %v1003_v33, %v827_v29  ;;  %v832_v11 = vmul.f32 %v3760_v27, %v3760_v27  ;;  %v833_v7 = vmul.f32 %v3764_v43, %v3764_v43  ;;  %v3948_v8 = vmul.f32 0.001953125, %v496_v37  ;;  %v6127_v58 = vld [vmem:[#allocation77_spill] sm:$0xff]  ;;  %v6131_v37 = vld [vmem:[#allocation80_spill] sm:$0xff] }
 0x11a   : > { %6120 = vst [vmem:[#allocation56_spill] sm:$0xff] %v3932_v59  ;;  %6122 = vst [vmem:[#allocation60_spill] sm:$0xff] %v3936_v23  ;;  %v834_v53 = vmul.f32 %v3932_v59, %v3932_v59  ;;  %v835_v48 = vmul.f32 %v3936_v23, %v3936_v23  ;;  %v1008_v18 = vadd.f32 %v1007_v16, %v830_v9  ;;  %v6135_v43 = vld [vmem:[#allocation64_spill] sm:$0xff] }
 0x11b   : > { %1005 = vadd.xlane.f32.xlu0 %v1004_v26  ;;  %v1012_v29 = vadd.f32 %v833_v7, %v832_v11  ;;  %v3952_v33 = vsub.f32 %v6123_v1, %v3738_v38  ;;  %v3956_v44 = vsub.f32 %v6125_v41, %v3738_v38  ;;  %v3960_v59 = vsub.f32 %v6127_v58, %v3946_v46  ;;  %v6133_v11 = vld [vmem:[#allocation81_spill] sm:$0xff]  ;;  %v511_v41 = vpop.xlane.xlu1 %510  ;;  %v506_v58 = vpop.xlane.xlu0 %505 }
 0x11c   : > { %v3964_v23 = vsub.f32 %v6129_v25, %v3946_v46  ;;  %v3968_v9 = vsub.f32 %v6131_v37, %v3948_v8  ;;  %v3972_v7 = vsub.f32 %v6133_v11, %v3948_v8  ;;  %v1009_v26 = vadd.f32 %v1008_v18, %v831_v5 }
 0x11d   : > { %6124 = vst [vmem:[#allocation53_spill] sm:$0xff] %v3952_v33  ;;  %6126 = vst [vmem:[#allocation59_spill] sm:$0xff] %v3956_v44  ;;  %v1013_v16 = vadd.f32 %v1012_v29, %v834_v53  ;;  %v836_v38 = vmul.f32 %v3752_v24, %v3752_v24  ;;  %v837_v1 = vmul.f32 %v3756_v52, %v3756_v52  ;;  %v6137_v53 = vld [vmem:[#allocation68_spill] sm:$0xff]  ;;  %v3998_v24 = vmul.f32 0.001953125, %v511_v41  ;;  %v6144_v41 = vld [vmem:[#allocation85_spill] sm:$0xff] }
 0x11e   : > { %6128 = vst [vmem:[#allocation77_spill] sm:$0xff] %v3960_v59  ;;  %6130 = vst [vmem:[#allocation78_spill] sm:$0xff] %v3964_v23  ;;  %v838_v25 = vmul.f32 %v3952_v33, %v3952_v33  ;;  %v839_v37 = vmul.f32 %v3956_v44, %v3956_v44  ;;  %v3984_v11 = vsub.f32 %v6135_v43, %v3792_v62  ;;  %1010 = vadd.xlane.f32.xlu1 %v1009_v26  ;;  %v6139_v26 = vld [vmem:[#allocation61_spill] sm:$0xff] }
 0x11f   : > { %6132 = vst [vmem:[#allocation80_spill] sm:$0xff] %v3968_v9  ;;  %6134 = vst [vmem:[#allocation81_spill] sm:$0xff] %v3972_v7  ;;  %v3988_v5 = vsub.f32 %v6137_v53, %v3792_v62  ;;  %v1014_v18 = vadd.f32 %v1013_v16, %v835_v48  ;;  %v1017_v29 = vadd.f32 %v837_v1, %v836_v38  ;;  %v4000_v27 = vmul.f32 0.001953125, %v506_v58  ;;  %v6141_v38 = vld [vmem:[#allocation67_spill] sm:$0xff]  ;;  %v6143_v53 = vld [vmem:[#allocation84_spill] sm:$0xff] }
 0x120   : > { %6136 = vst [vmem:[#allocation64_spill] sm:$0xff] %v3984_v11  ;;  %v840_v52 = vmul.f32 %v3812_v30, %v3812_v30  ;;  %v841_v33 = vmul.f32 %v3816_v3, %v3816_v3  ;;  %v842_v44 = vmul.f32 %v3984_v11, %v3984_v11  ;;  %v4004_v16 = vsub.f32 %v6139_v26, %v3790_v17  ;;  %v6146_v58 = vld [vmem:[#allocation86_spill] sm:$0xff]  ;;  %v6148_v3 = vld [vmem:[#allocation72_spill] sm:$0xff] }
 0x121   : > { %6138 = vst [vmem:[#allocation68_spill] sm:$0xff] %v3988_v5  ;;  %v843_v43 = vmul.f32 %v3988_v5, %v3988_v5  ;;  %1015 = vadd.xlane.f32.xlu0 %v1014_v18  ;;  %v1018_v62 = vadd.f32 %v1017_v29, %v838_v25  ;;  %v4008_v1 = vsub.f32 %v6141_v38, %v3790_v17  ;;  %v521_v38 = vpop.xlane.xlu1 %520 }
 0x122   : > { %v1022_v48 = vadd.f32 %v841_v33, %v840_v52  ;;  %6140 = vst [vmem:[#allocation61_spill] sm:$0xff] %v4004_v16  ;;  %v4012_v11 = vsub.f32 %v6143_v53, %v3998_v24  ;;  %v4016_v5 = vsub.f32 %v6144_v41, %v3998_v24  ;;  %v4020_v25 = vsub.f32 %v6146_v58, %v4000_v27  ;;  %v6147_v52 = vld [vmem:[#allocation87_spill] sm:$0xff]  ;;  %v516_v53 = vpop.xlane.xlu0 %515 }
 0x123   : > { %6142 = vst [vmem:[#allocation67_spill] sm:$0xff] %v4008_v1  ;;  %v4024_v33 = vsub.f32 %v6147_v52, %v4000_v27  ;;  %v1019_v18 = vadd.f32 %v1018_v62, %v839_v37  ;;  %v844_v17 = vmul.f32 %v3804_v31, %v3804_v31  ;;  %v845_v26 = vmul.f32 %v3808_v2, %v3808_v2 }
 0x124   : > { %6145 = vst [vmem:[#allocation84_spill] sm:$0xff] %v4016_v5  ;;  %v1023_v29 = vadd.f32 %v1022_v48, %v842_v44  ;;  %v846_v41 = vmul.f32 %v4004_v16, %v4004_v16  ;;  %v847_v58 = vmul.f32 %v4008_v1, %v4008_v1  ;;  %v4036_v52 = vsub.f32 %v6148_v3, %v3844_v54  ;;  %v6150_v44 = vld [vmem:[#allocation76_spill] sm:$0xff] }
 0x125   : > { %v4040_v37 = vsub.f32 %v6150_v44, %v3844_v54  ;;  %1020 = vadd.xlane.f32.xlu1 %v1019_v18  ;;  %v1027_v48 = vadd.f32 %v845_v26, %v844_v17  ;;  %v848_v2 = vmul.f32 %v3864_v20, %v3864_v20  ;;  %v849_v16 = vmul.f32 %v3868_v15, %v3868_v15  ;;  %v6152_v18 = vld [vmem:[#allocation69_spill] sm:$0xff]  ;;  %v6154_v17 = vld [vmem:[#allocation75_spill] sm:$0xff] }
 0x126   : > { %6149 = vst [vmem:[#allocation85_spill] sm:$0xff] %v4036_v52  ;;  %v1024_v62 = vadd.f32 %v1023_v29, %v843_v43  ;;  %v850_v1 = vmul.f32 %v4036_v52, %v4036_v52  ;;  %v4050_v31 = vmul.f32 0.001953125, %v521_v38  ;;  %v4052_v30 = vmul.f32 0.001953125, %v516_v53  ;;  %v6156_v44 = vld [vmem:[#allocation89_spill] sm:$0xff]  ;;  %v6157_v38 = vld [vmem:[#allocation90_spill] sm:$0xff]  ;;  %v6159_v53 = vld [vmem:[#allocation91_spill] sm:$0xff] }
 0x127   : > { %6151 = vst [vmem:[#allocation86_spill] sm:$0xff] %v4040_v37  ;;  %v851_v3 = vmul.f32 %v4040_v37, %v4040_v37  ;;  %v1028_v54 = vadd.f32 %v1027_v48, %v846_v41  ;;  %v1032_v43 = vadd.f32 %v849_v16, %v848_v2  ;;  %v4056_v29 = vsub.f32 %v6152_v18, %v3842_v39  ;;  %v6160_v2 = vld [vmem:[#allocation92_spill] sm:$0xff] }
 0x128   : > { %1025 = vadd.xlane.f32.xlu0 %v1024_v62  ;;  %v4060_v26 = vsub.f32 %v6154_v17, %v3842_v39  ;;  %v4064_v52 = vsub.f32 %v6156_v44, %v4050_v31  ;;  %v4068_v37 = vsub.f32 %v6157_v38, %v4050_v31  ;;  %v4072_v41 = vsub.f32 %v6159_v53, %v4052_v30  ;;  %v531_v17 = vpop.xlane.xlu1 %530  ;;  %v526_v44 = vpop.xlane.xlu0 %525 }
 0x129   : > { %6153 = vst [vmem:[#allocation87_spill] sm:$0xff] %v4056_v29  ;;  %v4076_v16 = vsub.f32 %v6160_v2, %v4052_v30  ;;  %v1029_v62 = vadd.f32 %v1028_v54, %v847_v58  ;;  %v1033_v48 = vadd.f32 %v1032_v43, %v850_v1  ;;  %v852_v39 = vmul.f32 %v3856_v4, %v3856_v4  ;;  %v6161_v2 = vld [vmem:[#allocation79_spill] sm:$0xff] }
 0x12a   : > { %6155 = vst [vmem:[#allocation72_spill] sm:$0xff] %v4060_v26  ;;  %6158 = vst [vmem:[#allocation76_spill] sm:$0xff] %v4068_v37  ;;  %v853_v18 = vmul.f32 %v3860_v22, %v3860_v22  ;;  %v854_v38 = vmul.f32 %v4056_v29, %v4056_v29  ;;  %v855_v53 = vmul.f32 %v4060_v26, %v4060_v26  ;;  %v6163_v1 = vld [vmem:[#allocation83_spill] sm:$0xff]  ;;  %v4102_v4 = vmul.f32 0.001953125, %v531_v17  ;;  %v6169_v17 = vld [vmem:[#allocation94_spill] sm:$0xff] }
 0x12b   : > { %v4088_v15 = vsub.f32 %v6161_v2, %v3896_v51  ;;  %v4092_v58 = vsub.f32 %v6163_v1, %v3896_v51  ;;  %1030 = vadd.xlane.f32.xlu1 %v1029_v62  ;;  %v1034_v54 = vadd.f32 %v1033_v48, %v851_v3  ;;  %v856_v22 = vmul.f32 %v3916_v63, %v3916_v63  ;;  %v2552_v62 = vld [vmem:[%s2804_s10 + $0x370] sm:$0xff]  ;;  %v6168_v1 = vld [vmem:[#allocation93_spill] sm:$0xff] }
 0x12c   : > { %v1037_v43 = vadd.f32 %v853_v18, %v852_v39  ;;  %v857_v29 = vmul.f32 %v3920_v49, %v3920_v49  ;;  %v4104_v20 = vmul.f32 0.001953125, %v526_v44  ;;  %v4108_v48 = vsub.f32 %v2552_v62, %v3894_v32  ;;  %v6166_v39 = vld [vmem:[#allocation82_spill] sm:$0xff] }
 0x12d   : > { %6162 = vst [vmem:[#allocation69_spill] sm:$0xff] %v4088_v15  ;;  %6164 = vst [vmem:[#allocation75_spill] sm:$0xff] %v4092_v58  ;;  %v858_v26 = vmul.f32 %v4088_v15, %v4088_v15  ;;  %v859_v2 = vmul.f32 %v4092_v58, %v4092_v58  ;;  %1035 = vadd.xlane.f32.xlu0 %v1034_v54  ;;  %v4112_v18 = vsub.f32 %v6166_v39, %v3894_v32  ;;  %v536_v58 = vpop.xlane.xlu0 %535  ;;  %v2553_v49 = vld [vmem:[%s2804_s10 + $0x390] sm:$0xff] }
 0x12e   : > { %v1038_v51 = vadd.f32 %v1037_v43, %v854_v38  ;;  %v1042_v3 = vadd.f32 %v857_v29, %v856_v22  ;;  %6165 = vst [vmem:[#allocation89_spill] sm:$0xff] %v4108_v48  ;;  %v4116_v15 = vsub.f32 %v6168_v1, %v4102_v4  ;;  %v4120_v44 = vsub.f32 %v6169_v17, %v4102_v4  ;;  %v6170_v38 = vld [vmem:[#allocation95_spill] sm:$0xff]  ;;  %v6171_v29 = vld [vmem:[#allocation96_spill] sm:$0xff]  ;;  %v541_v1 = vpop.xlane.xlu1 %540 }
 0x12f   : > { %6167 = vst [vmem:[#allocation90_spill] sm:$0xff] %v4112_v18  ;;  %v4124_v22 = vsub.f32 %v6170_v38, %v4104_v20  ;;  %v4128_v54 = vsub.f32 %v6171_v29, %v4104_v20  ;;  %v860_v32 = vmul.f32 %v3908_v45, %v3908_v45  ;;  %v861_v39 = vmul.f32 %v3912_v21, %v3912_v21 }
 0x130   : > { %v1039_v43 = vadd.f32 %v1038_v51, %v855_v53  ;;  %v1043_v62 = vadd.f32 %v1042_v3, %v858_v26  ;;  %v862_v17 = vmul.f32 %v4108_v48, %v4108_v48  ;;  %v863_v38 = vmul.f32 %v4112_v18, %v4112_v18  ;;  %v6173_v26 = vld [vmem:[#allocation88_spill] sm:$0xff] }
 0x131   : > { %v4140_v29 = vsub.f32 %v2553_v49, %v3948_v8  ;;  %v4144_v53 = vsub.f32 %v6173_v26, %v3948_v8  ;;  %v1047_v3 = vadd.f32 %v861_v39, %v860_v32  ;;  %v864_v21 = vmul.f32 %v3968_v9, %v3968_v9  ;;  %v2555_v32 = vld [vmem:[%s2804_s10 + $0x3b8] sm:$0xff]  ;;  %v6177_v26 = vld [vmem:[#allocation97_spill] sm:$0xff] }
 0x132   : > { %1040 = vadd.xlane.f32.xlu1 %v1039_v43  ;;  %v1044_v51 = vadd.f32 %v1043_v62, %v859_v2  ;;  %v865_v48 = vmul.f32 %v3972_v7, %v3972_v7  ;;  %v4154_v45 = vmul.f32 0.001953125, %v541_v1  ;;  %v4156_v63 = vmul.f32 0.001953125, %v536_v58  ;;  %v2554_v43 = vld [vmem:[%s2804_s10 + $0x3b0] sm:$0xff] }
 0x133   : > { %6172 = vst [vmem:[#allocation91_spill] sm:$0xff] %v4140_v29  ;;  %6174 = vst [vmem:[#allocation92_spill] sm:$0xff] %v4144_v53  ;;  %v866_v18 = vmul.f32 %v4140_v29, %v4140_v29  ;;  %v867_v49 = vmul.f32 %v4144_v53, %v4144_v53  ;;  %v1048_v8 = vadd.f32 %v1047_v3, %v862_v17  ;;  %v6179_v58 = vld [vmem:[#allocation98_spill] sm:$0xff]  ;;  %v6182_v17 = vld [vmem:[#allocation100_spill] sm:$0xff]  ;;  %v546_v29 = vpop.xlane.xlu0 %545 }
 0x134   : > { %1045 = vadd.xlane.f32.xlu0 %v1044_v51  ;;  %v1052_v2 = vadd.f32 %v865_v48, %v864_v21  ;;  %v4160_v62 = vsub.f32 %v2554_v43, %v3946_v46  ;;  %v4164_v39 = vsub.f32 %v2555_v32, %v3946_v46  ;;  %v4168_v53 = vsub.f32 %v6177_v26, %v4154_v45  ;;  %v6181_v21 = vld [vmem:[#allocation99_spill] sm:$0xff]  ;;  %v551_v26 = vpop.xlane.xlu1 %550  ;;  %v2556_v7 = vld [vmem:[%s2804_s10 + $0x3d0] sm:$0xff] }
 0x135   : > { %v4172_v1 = vsub.f32 %v6179_v58, %v4154_v45  ;;  %v4176_v48 = vsub.f32 %v6181_v21, %v4156_v63  ;;  %v4180_v51 = vsub.f32 %v6182_v17, %v4156_v63  ;;  %v1049_v3 = vadd.f32 %v1048_v8, %v863_v38 }
 0x136   : > { %6175 = vst [vmem:[#allocation79_spill] sm:$0xff] %v4160_v62  ;;  %6176 = vst [vmem:[#allocation83_spill] sm:$0xff] %v4164_v39  ;;  %v1053_v43 = vadd.f32 %v1052_v2, %v866_v18  ;;  %v868_v46 = vmul.f32 %v3960_v59, %v3960_v59  ;;  %v869_v32 = vmul.f32 %v3964_v23, %v3964_v23  ;;  %v2557_v18 = vld [vmem:[%s2804_s10 + $0x3d8] sm:$0xff]  ;;  %v4206_v59 = vmul.f32 0.001953125, %v551_v26 }
 0x137   : > { %6178 = vst [vmem:[#allocation82_spill] sm:$0xff] %v4168_v53  ;;  %6180 = vst [vmem:[#allocation93_spill] sm:$0xff] %v4172_v1  ;;  %v870_v58 = vmul.f32 %v4160_v62, %v4160_v62  ;;  %v871_v21 = vmul.f32 %v4164_v39, %v4164_v39  ;;  %v4192_v17 = vsub.f32 %v2556_v7, %v4000_v27  ;;  %1050 = vadd.xlane.f32.xlu1 %v1049_v3  ;;  %v2558_v3 = vld [vmem:[%s2804_s10 + $0x3f0] sm:$0xff] }
 0x138   : > { %v4196_v38 = vsub.f32 %v2557_v18, %v4000_v27  ;;  %v1054_v8 = vadd.f32 %v1053_v43, %v867_v49  ;;  %v1057_v2 = vadd.f32 %v869_v32, %v868_v46  ;;  %v872_v23 = vmul.f32 %v4020_v25, %v4020_v25  ;;  %v2559_v46 = vld [vmem:[%s2804_s10 + $0x3f8] sm:$0xff] }
 0x139   : > { %v873_v62 = vmul.f32 %v4024_v33, %v4024_v33  ;;  %v874_v39 = vmul.f32 %v4192_v17, %v4192_v17  ;;  %v4208_v9 = vmul.f32 0.001953125, %v546_v29  ;;  %v4212_v43 = vsub.f32 %v2558_v3, %v3998_v24  ;;  %v6186_v29 = vld [vmem:[#allocation101_spill] sm:$0xff] }
 0x13a   : > { %v875_v7 = vmul.f32 %v4196_v38, %v4196_v38  ;;  %1055 = vadd.xlane.f32.xlu0 %v1054_v8  ;;  %v1058_v27 = vadd.f32 %v1057_v2, %v870_v58  ;;  %v4216_v32 = vsub.f32 %v2559_v46, %v3998_v24  ;;  %v4220_v18 = vsub.f32 %v3356_v35, %v4206_v59  ;;  %v2560_v46 = vld [vmem:[%s2804_s10 + $0x410] sm:$0xff] }
 0x13b   : > { %v1062_v49 = vadd.f32 %v873_v62, %v872_v23  ;;  %6183 = vst [vmem:[#allocation94_spill] sm:$0xff] %v4212_v43  ;;  %v4224_v26 = vsub.f32 %v6186_v29, %v4206_v59  ;;  %v4228_v23 = vsub.f32 %v3363_v50, %v4208_v9  ;;  %v6189_v62 = vld [vmem:[#allocation102_spill] sm:$0xff]  ;;  %v876_v24 = vmul.f32 %v4012_v11, %v4012_v11 }
 0x13c   : > { %6184 = vst [vmem:[#allocation95_spill] sm:$0xff] %v4216_v32  ;;  %6185 = vst [vmem:[#allocation96_spill] sm:$0xff] %v4220_v18  ;;  %v4232_v58 = vsub.f32 %v6189_v62, %v4208_v9  ;;  %v1059_v8 = vadd.f32 %v1058_v27, %v871_v21  ;;  %v877_v35 = vmul.f32 %v4016_v5, %v4016_v5  ;;  %v2561_v21 = vld [vmem:[%s2804_s10 + $0x418] sm:$0xff]  ;;  %v2562_v5 = vld [vmem:[%s2804_s10 + $0x430] sm:$0xff] }
 0x13d   : > { %6187 = vst [vmem:[#allocation88_spill] sm:$0xff] %v4224_v26  ;;  %6188 = vst [vmem:[#allocation97_spill] sm:$0xff] %v4228_v23  ;;  %v1063_v2 = vadd.f32 %v1062_v49, %v874_v39  ;;  %v878_v3 = vmul.f32 %v4212_v43, %v4212_v43  ;;  %v879_v50 = vmul.f32 %v4216_v32, %v4216_v32 }
 0x13e   : > { %6190 = vst [vmem:[#allocation98_spill] sm:$0xff] %v4232_v58  ;;  %v4244_v29 = vsub.f32 %v2560_v46, %v4052_v30  ;;  %v4248_v39 = vsub.f32 %v2561_v21, %v4052_v30  ;;  %1060 = vadd.xlane.f32.xlu1 %v1059_v8  ;;  %v1067_v49 = vadd.f32 %v877_v35, %v876_v24 }
 0x13f   : > { %v1064_v27 = vadd.f32 %v1063_v2, %v875_v7  ;;  %v880_v62 = vmul.f32 %v4072_v41, %v4072_v41  ;;  %v881_v43 = vmul.f32 %v4076_v16, %v4076_v16  ;;  %v4260_v30 = vsub.f32 %v2562_v5, %v4050_v31  ;;  %v2563_v7 = vld [vmem:[%s2804_s10 + $0x438] sm:$0xff] }
 0x140   : > { %6191 = vst [vmem:[#allocation99_spill] sm:$0xff] %v4244_v29  ;;  %6192 = vst [vmem:[#allocation100_spill] sm:$0xff] %v4248_v39  ;;  %v882_v32 = vmul.f32 %v4244_v29, %v4244_v29  ;;  %v883_v46 = vmul.f32 %v4248_v39, %v4248_v39  ;;  %v4264_v8 = vsub.f32 %v2563_v7, %v4050_v31  ;;  %v2564_v29 = vld [vmem:[%s2804_s10 + $0x450] sm:$0xff] }
 0x141   : > { %6193 = vst [vmem:[#allocation101_spill] sm:$0xff] %v4260_v30  ;;  %1065 = vadd.xlane.f32.xlu0 %v1064_v27  ;;  %v1068_v2 = vadd.f32 %v1067_v49, %v878_v3  ;;  %v1072_v24 = vadd.f32 %v881_v43, %v880_v62  ;;  %v884_v35 = vmul.f32 %v4064_v52, %v4064_v52  ;;  %v2565_v3 = vld [vmem:[%s2804_s10 + $0x458] sm:$0xff] }
 0x142   : > { %6194 = vst [vmem:[#allocation102_spill] sm:$0xff] %v4264_v8  ;;  %v885_v21 = vmul.f32 %v4068_v37, %v4068_v37  ;;  %v886_v39 = vmul.f32 %v4260_v30, %v4260_v30  ;;  %v887_v5 = vmul.f32 %v4264_v8, %v4264_v8  ;;  %v4276_v31 = vsub.f32 %v2564_v29, %v4104_v20  ;;  %v2566_v37 = vld [vmem:[%s2804_s10 + $0x470] sm:$0xff] }
 0x143   : > { %v4280_v43 = vsub.f32 %v2565_v3, %v4104_v20  ;;  %v1069_v27 = vadd.f32 %v1068_v2, %v879_v50  ;;  %v1073_v49 = vadd.f32 %v1072_v24, %v882_v32  ;;  %v888_v7 = vmul.f32 %v4124_v22, %v4124_v22  ;;  %v2567_v2 = vld [vmem:[%s2804_s10 + $0x478] sm:$0xff] }
 0x144   : > { %v1077_v62 = vadd.f32 %v885_v21, %v884_v35  ;;  %v889_v30 = vmul.f32 %v4128_v54, %v4128_v54  ;;  %v890_v8 = vmul.f32 %v4276_v31, %v4276_v31  ;;  %v4292_v20 = vsub.f32 %v2566_v37, %v4102_v4  ;;  %v2568_v37 = vld [vmem:[%s2804_s10 + $0x490] sm:$0xff] }
 0x145   : > { %6195 = vst [vmem:[#allocation124_spill] sm:$0xff] %v4280_v43  ;;  %v891_v29 = vmul.f32 %v4280_v43, %v4280_v43  ;;  %1070 = vadd.xlane.f32.xlu1 %v1069_v27  ;;  %v1074_v32 = vadd.f32 %v1073_v49, %v883_v46  ;;  %v4296_v24 = vsub.f32 %v2567_v2, %v4102_v4  ;;  %v2569_v27 = vld [vmem:[%s2804_s10 + $0x498] sm:$0xff] }
 0x146   : > { %v1078_v50 = vadd.f32 %v1077_v62, %v886_v39  ;;  %v892_v35 = vmul.f32 %v4116_v15, %v4116_v15  ;;  %v1082_v21 = vadd.f32 %v889_v30, %v888_v7  ;;  %v893_v3 = vmul.f32 %v4120_v44, %v4120_v44 }
 0x147   : > { %v894_v43 = vmul.f32 %v4292_v20, %v4292_v20  ;;  %v4306_v46 = vsub.f32 %v2568_v37, %v4156_v63  ;;  %1075 = vadd.xlane.f32.xlu0 %v1074_v32  ;;  %v895_v4 = vmul.f32 %v4296_v24, %v4296_v24  ;;  %v4312_v30 = vsub.f32 %v2569_v27, %v4156_v63  ;;  %v2571_v37 = vld [vmem:[%s2804_s10 + $0x4b8] sm:$0xff] }
 0x148   : > { %v1079_v39 = vadd.f32 %v1078_v50, %v887_v5  ;;  %v896_v49 = vmul.f32 %v4176_v48, %v4176_v48  ;;  %v1083_v62 = vadd.f32 %v1082_v21, %v890_v8  ;;  %v1087_v7 = vadd.f32 %v893_v3, %v892_v35  ;;  %v2570_v50 = vld [vmem:[%s2804_s10 + $0x4b0] sm:$0xff] }
 0x149   : > { %6196 = vst [vmem:[#allocation125_spill] sm:$0xff] %v4306_v46  ;;  %6197 = vst [vmem:[#allocation126_spill] sm:$0xff] %v4312_v30  ;;  %v897_v2 = vmul.f32 %v4180_v51, %v4180_v51  ;;  %v898_v32 = vmul.f32 %v4306_v46, %v4306_v46  ;;  %v899_v5 = vmul.f32 %v4312_v30, %v4312_v30  ;;  %v2572_v46 = vld [vmem:[%s2804_s10 + $0x4d0] sm:$0xff] }
 0x14a   : > { %1080 = vadd.xlane.f32.xlu1 %v1079_v39  ;;  %v4324_v63 = vsub.f32 %v2570_v50, %v4154_v45  ;;  %v4328_v8 = vsub.f32 %v2571_v37, %v4154_v45  ;;  %v900_v35 = vmul.f32 %v4168_v53, %v4168_v53  ;;  %v1084_v21 = vadd.f32 %v1083_v62, %v891_v29  ;;  %v2573_v37 = vld [vmem:[%s2804_s10 + $0x4d8] sm:$0xff] }
 0x14b   : > { %v1088_v3 = vadd.f32 %v1087_v7, %v894_v43  ;;  %v1092_v27 = vadd.f32 %v897_v2, %v896_v49  ;;  %v901_v39 = vmul.f32 %v4172_v1, %v4172_v1  ;;  %v4340_v45 = vsub.f32 %v2572_v46, %v4208_v9 }
 0x14c   : > { %6198 = vst [vmem:[#allocation127_spill] sm:$0xff] %v4324_v63  ;;  %6199 = vst [vmem:[#allocation128_spill] sm:$0xff] %v4328_v8  ;;  %v902_v30 = vmul.f32 %v4324_v63, %v4324_v63  ;;  %v903_v50 = vmul.f32 %v4328_v8, %v4328_v8  ;;  %v4344_v29 = vsub.f32 %v2573_v37, %v4208_v9  ;;  %1085 = vadd.xlane.f32.xlu0 %v1084_v21  ;;  %v2574_v63 = vld [vmem:[%s2804_s10 + $0x4f0] sm:$0xff]  ;;  %v2575_v21 = vld [vmem:[%s2804_s10 + $0x4f8] sm:$0xff] }
 0x14d   : > { %6200 = vst [vmem:[#allocation129_spill] sm:$0xff] %v4340_v45  ;;  %v1089_v43 = vadd.f32 %v1088_v3, %v895_v4  ;;  %v1093_v49 = vadd.f32 %v1092_v27, %v898_v32  ;;  %v1097_v62 = vadd.f32 %v901_v39, %v900_v35  ;;  %v904_v7 = vmul.f32 %v4228_v23, %v4228_v23 }
 0x14e   : > { %6201 = vst [vmem:[#allocation130_spill] sm:$0xff] %v4344_v29  ;;  %v905_v2 = vmul.f32 %v4232_v58, %v4232_v58  ;;  %v906_v8 = vmul.f32 %v4340_v45, %v4340_v45  ;;  %v4354_v46 = vsub.f32 %v2574_v63, %v4206_v59  ;;  %v4358_v4 = vsub.f32 %v2575_v21, %v4206_v59 }
 0x14f   : > { %1090 = vadd.xlane.f32.xlu1 %v1089_v43  ;;  %v1094_v9 = vadd.f32 %v1093_v49, %v899_v5  ;;  %v1098_v37 = vadd.f32 %v1097_v62, %v902_v30  ;;  %v908_v32 = vmul.f32 %v4220_v18, %v4220_v18  ;;  %v907_v35 = vmul.f32 %v4344_v29, %v4344_v29 }
 0x150   : > { %6202 = vst [vmem:[#allocation131_spill] sm:$0xff] %v4354_v46  ;;  %6203 = vst [vmem:[#allocation132_spill] sm:$0xff] %v4358_v4  ;;  %v1102_v3 = vadd.f32 %v905_v2, %v904_v7  ;;  %v909_v27 = vmul.f32 %v4224_v26, %v4224_v26  ;;  %v910_v63 = vmul.f32 %v4354_v46, %v4354_v46  ;;  %v1714_v26 = vlaneseq }
 0x151   : > { %1095 = vadd.xlane.f32.xlu0 %v1094_v9  ;;  %v1099_v5 = vadd.f32 %v1098_v37, %v903_v50  ;;  %v911_v59 = vmul.f32 %v4358_v4, %v4358_v4 }
 0x152   : > { %v1103_v30 = vadd.f32 %v1102_v3, %v906_v8  ;;  %v1107_v39 = vadd.f32 %v909_v27, %v908_v32  ;;  %v4370_v8 = vshrl.u32 %v1714_v26, 7 }
 0x153   : > { %1100 = vadd.xlane.f32.xlu1 %v1099_v5 }
 0x154   : > { %v1104_v43 = vadd.f32 %v1103_v30, %v907_v35  ;;  %v1108_v49 = vadd.f32 %v1107_v39, %v910_v63  ;;  %v1716_v3 = vsub.s32 0, %v4370_v8  ;;  %v1712_v63 = vld [vmem:[%s5661_s1] sm:$0xf]  ;;  %v1720_v30 = vsub.s32 1, %v4370_v8 }
 0x156   : > { %1105 = vadd.xlane.f32.xlu0 %v1104_v43  ;;  %v1109_v62 = vadd.f32 %v1108_v49, %v911_v59  ;;  %v4385_v49 = vrot.slane %v1712_v63, %v1716_v3 }
 0x158   : > { %1110 = vadd.xlane.f32.xlu1 %v1109_v62  ;;  %v1724_v62 = vsub.s32 2, %v4370_v8 }
 0x16b   : > { %v916_v7 = vpop.xlane.xlu0 %915 }
 0x16c   : > { %v1112_v2 = vmul.f32 0.0019569471, %v916_v7  ;;  %v1728_v7 = vsub.s32 3, %v4370_v8 }
 0x16e   : > { %2392 = vrsqrt.f32 %v1112_v2  ;;  %vm1154_vm0 = vcmp.eq.f32.partialorder %v1112_v2, inf  ;;  %v1157_v5 = vand.u32 2147483648, %v1112_v2  ;;  %vm1156_vm1 = vcmp.eq.f32.partialorder %v1112_v2, 0.0 }
 0x16f   : > { %v926_v21 = vpop.xlane.xlu0 %925 }
 0x170   : > { %v921_v18 = vpop.xlane.xlu1 %920  ;;  %v1114_v46 = vmul.f32 0.0019569471, %v926_v21 }
 0x171   : > { %v1113_v9 = vmul.f32 0.0019569471, %v921_v18 }
 0x172   : > { %2394 = vrsqrt.f32 %v1114_v46  ;;  %vm1168_vm2 = vcmp.eq.f32.partialorder %v1114_v46, inf  ;;  %vm1170_vm4 = vcmp.eq.f32.partialorder %v1114_v46, 0.0 }
 0x173   : > { %2396 = vrsqrt.f32 %v1113_v9  ;;  %vm1161_vm3 = vcmp.eq.f32.partialorder %v1113_v9, inf  ;;  %v1164_v29 = vand.u32 2147483648, %v1113_v9  ;;  %vm1163_vm5 = vcmp.eq.f32.partialorder %v1113_v9, 0.0 }
 0x174   : > { %v931_v50 = vpop.xlane.xlu1 %930 }
 0x175   : > { %v4372_v37 = vmul.f32 0.0019569471, %v931_v50 }
 0x177   : > { %2398 = vrsqrt.f32 %v4372_v37  ;;  %vm1175_vm6 = vcmp.eq.f32.partialorder %v4372_v37, inf  ;;  %vm1177_vm7 = vcmp.eq.f32.partialorder %v4372_v37, 0.0 }
 0x178   : > { %v936_v32 = vpop.xlane.xlu0 %935  ;;  %v2393_v35 = vpop.eup %2392 }
 0x179   : > { %v4376_v27 = vmul.f32 0.0019569471, %v936_v32  ;;  %v1153_v18 = vmul.f32 %v2393_v35, %v1112_v2 }
 0x17b   : > { %2400 = vrsqrt.f32 %v4376_v27  ;;  %v941_v26 = vpop.xlane.xlu1 %940  ;;  %v1155_v59 = vsel %vm1154_vm0, %v1112_v2, %v1153_v18  ;;  %v1171_v2 = vand.u32 2147483648, %v1114_v46  ;;  %vm1182_vm8 = vcmp.eq.f32.partialorder %v4376_v27, inf }
 0x17c   : > { %v4383_v39 = vmul.f32 0.0019569471, %v941_v26  ;;  %v2395_v43 = vpop.eup %2394  ;;  %v1158_v21 = vsel %vm1156_vm1, %v1157_v5, %v1155_v59  ;;  %v1894_v26 = vld [vmem:[%s5662_s2] sm:$0xf]  ;;  %v4395_v5 = vrot.slane %v1712_v63, %v1720_v30  ;;  %vm1184_vm9 = vcmp.eq.f32.partialorder %v4376_v27, 0.0 }
 0x17d   : > { %v2397_v50 = vpop.eup %2396  ;;  %v1432_v32 = vadd.f32 1e-06, %v1158_v21  ;;  %v1167_v35 = vmul.f32 %v2395_v43, %v1114_v46  ;;  %v4400_v1 = vrot.slane %v1894_v26, %v1716_v3  ;;  %v4402_v53 = vrot.slane %v1894_v26, %v1720_v30 }
 0x17e   : > { %2402 = vrsqrt.f32 %v4383_v39  ;;  %v1160_v4 = vmul.f32 %v2397_v50, %v1113_v9  ;;  %v4397_v50 = vrot.slane %v1712_v63, %v1724_v62  ;;  %v4413_v30 = vrot.slane %v1894_v26, %v1724_v62 }
 0x17f   : > { %v946_v18 = vpop.xlane.xlu0 %945  ;;  %2404 = vrcp.f32 %v1432_v32  ;;  %v1169_v45 = vsel %vm1168_vm2, %v1114_v46, %v1167_v35  ;;  %vm1189_vm10 = vcmp.eq.f32.partialorder %v4383_v39, inf  ;;  %vm1191_vm11 = vcmp.eq.f32.partialorder %v4383_v39, 0.0 }
 0x180   : > { %v4393_v8 = vmul.f32 0.0019569471, %v946_v18  ;;  %v1162_v59 = vsel %vm1161_vm3, %v1113_v9, %v1160_v4  ;;  %v1172_v43 = vsel %vm1170_vm4, %v1171_v2, %v1169_v45  ;;  %v1178_v45 = vand.u32 2147483648, %v4372_v37 }
 0x181   : > { %v2399_v21 = vpop.eup %2398  ;;  %v1165_v58 = vsel %vm1163_vm5, %v1164_v29, %v1162_v59  ;;  %v1434_v23 = vadd.f32 1e-06, %v1172_v43  ;;  %v4409_v29 = vrot.slane %v1712_v63, %v1728_v7  ;;  %v1185_v43 = vand.u32 2147483648, %v4376_v27 }
 0x182   : > { %2406 = vrsqrt.f32 %v4393_v8  ;;  %v1433_v32 = vadd.f32 1e-06, %v1165_v58  ;;  %v1174_v46 = vmul.f32 %v2399_v21, %v4372_v37  ;;  %v4415_v58 = vrot.slane %v1894_v26, %v1728_v7 }
 0x183   : > { %2408 = vrcp.f32 %v1434_v23  ;;  %vm1196_vm12 = vcmp.eq.f32.partialorder %v4393_v8, inf  ;;  %vm1198_vm13 = vcmp.eq.f32.partialorder %v4393_v8, 0.0 }
 0x184   : > { %v951_v35 = vpop.xlane.xlu1 %950  ;;  %2410 = vrcp.f32 %v1433_v32  ;;  %v1176_v3 = vsel %vm1175_vm6, %v4372_v37, %v1174_v46  ;;  %v1192_v46 = vand.u32 2147483648, %v4383_v39 }
 0x185   : > { %v4407_v4 = vmul.f32 0.0019569471, %v951_v35  ;;  %v2401_v9 = vpop.eup %2400  ;;  %v1179_v2 = vsel %vm1177_vm7, %v1178_v45, %v1176_v3  ;;  %v1199_v35 = vand.u32 2147483648, %v4393_v8 }
 0x186   : > { %v1181_v23 = vmul.f32 %v2401_v9, %v4376_v27  ;;  %v1435_v59 = vadd.f32 1e-06, %v1179_v2 }
 0x187   : > { %v956_v18 = vpop.xlane.xlu0 %955  ;;  %2412 = vrsqrt.f32 %v4407_v4  ;;  %vm1203_vm14 = vcmp.eq.f32.partialorder %v4407_v4, inf  ;;  %vm1205_vm0 = vcmp.eq.f32.partialorder %v4407_v4, 0.0 }
 0x188   : > { %v4420_v63 = vmul.f32 0.0019569471, %v956_v18  ;;  %v2403_v21 = vpop.eup %2402  ;;  %v1183_v32 = vsel %vm1182_vm8, %v4376_v27, %v1181_v23  ;;  %2414 = vrcp.f32 %v1435_v59  ;;  %v1206_v59 = vand.u32 2147483648, %v4407_v4 }
 0x189   : > { %v1186_v37 = vsel %vm1184_vm9, %v1185_v43, %v1183_v32  ;;  %v1188_v62 = vmul.f32 %v2403_v21, %v4383_v39  ;;  %v2405_v7 = vpop.eup %2404 }
 0x18a   : > { %v1436_v26 = vadd.f32 1e-06, %v1186_v37  ;;  %2416 = vrsqrt.f32 %v4420_v63  ;;  %v1552_v27 = vmul.f32 %v2405_v7, %v3391_v40  ;;  %v1553_v9 = vmul.f32 %v2405_v7, %v3394_v10 }
 0x18b   : > { %v961_v45 = vpop.xlane.xlu1 %960  ;;  %v1554_v3 = vmul.f32 %v2405_v7, %v3397_v56  ;;  %v1555_v2 = vmul.f32 %v2405_v7, %v3400_v0  ;;  %v1190_v18 = vsel %vm1189_vm10, %v4383_v39, %v1188_v62  ;;  %v1213_v62 = vand.u32 2147483648, %v4420_v63 }
 0x18c   : > { %v2407_v23 = vpop.eup %2406  ;;  %2418 = vrcp.f32 %v1436_v26  ;;  %v4439_v43 = vmul.f32 0.0019569471, %v961_v45  ;;  %v1734_v21 = vmul.f32 %v4385_v49, %v1552_v27  ;;  %v1735_v40 = vmul.f32 %v4395_v5, %v1553_v9 }
 0x18d   : > { %v1736_v10 = vmul.f32 %v4397_v50, %v1554_v3  ;;  %v1737_v56 = vmul.f32 %v4409_v29, %v1555_v2  ;;  %v2409_v0 = vpop.eup %2408  ;;  %v4447_v32 = vsel %vm1191_vm11, %v1192_v46, %v1190_v18  ;;  %v4450_v37 = vmul.f32 %v2407_v23, %v4393_v8 }
 0x18e   : > { %2420 = vrsqrt.f32 %v4439_v43  ;;  %v2411_v7 = vpop.eup %2410  ;;  %v1916_v26 = vadd.f32 %v4400_v1, %v1734_v21  ;;  %v1917_v45 = vadd.f32 %v4402_v53, %v1735_v40  ;;  %v1560_v23 = vmul.f32 %v2409_v0, %v3379_v42 }
 0x18f   : > { %v1918_v27 = vadd.f32 %v4413_v30, %v1736_v10  ;;  %v1919_v9 = vadd.f32 %v4415_v58, %v1737_v56  ;;  %v1556_v39 = vmul.f32 %v2411_v7, %v3425_v61  ;;  %v1557_v46 = vmul.f32 %v2411_v7, %v3428_v57 }
 0x190   : > { %v1558_v3 = vmul.f32 %v2411_v7, %v3431_v12  ;;  %v1559_v2 = vmul.f32 %v2411_v7, %v3434_v60  ;;  %2076 = vst [vmem:[%s4464_s7] sm:$0xff] %v1916_v26  ;;  %2077 = vst [vmem:[%s4464_s7 + $0x8] sm:$0xff] %v1917_v45  ;;  %v1561_v61 = vmul.f32 %v2409_v0, %v3382_v14  ;;  %vm1210_vm15 = vcmp.eq.f32.partialorder %v4420_v63, inf }
 0x191   : > { %2078 = vst [vmem:[%s4464_s7 + $0x10] sm:$0xff] %v1918_v27  ;;  %2079 = vst [vmem:[%s4464_s7 + $0x18] sm:$0xff] %v1919_v9  ;;  %v1562_v57 = vmul.f32 %v2409_v0, %v3385_v19  ;;  %v1563_v12 = vmul.f32 %v2409_v0, %v3388_v34  ;;  %v4474_v60 = vpop.eup %2412  ;;  %v1738_v18 = vmul.f32 %v4385_v49, %v1556_v39  ;;  %vm1212_vm1 = vcmp.eq.f32.partialorder %v4420_v63, 0.0 }
 0x192   : > { %v1739_v21 = vmul.f32 %v4395_v5, %v1557_v46  ;;  %v1740_v40 = vmul.f32 %v4397_v50, %v1558_v3  ;;  %v1741_v10 = vmul.f32 %v4409_v29, %v1559_v2  ;;  %v2415_v56 = vpop.eup %2414  ;;  %v1742_v7 = vmul.f32 %v4385_v49, %v1560_v23  ;;  %v4496_v2 = vpop.xlane.xlu0 %965 }
 0x193   : > { %v1743_v42 = vmul.f32 %v4395_v5, %v1561_v61  ;;  %v1744_v14 = vmul.f32 %v4397_v50, %v1562_v57  ;;  %v1745_v19 = vmul.f32 %v4409_v29, %v1563_v12  ;;  %v1920_v0 = vadd.f32 %v4400_v1, %v1738_v18 }
 0x194   : > { %v2417_v34 = vpop.eup %2416  ;;  %v1921_v26 = vadd.f32 %v4402_v53, %v1739_v21  ;;  %v1922_v45 = vadd.f32 %v4413_v30, %v1740_v40  ;;  %v1923_v27 = vadd.f32 %v4415_v58, %v1741_v10  ;;  %v1924_v9 = vadd.f32 %v4400_v1, %v1742_v7  ;;  %v6204_v40 = vld [vmem:[#allocation109_spill] sm:$0xff]  ;;  %v6205_v10 = vld [vmem:[#allocation110_spill] sm:$0xff]  ;;  %v971_v7 = vpop.xlane.xlu1 %970 }
 0x195   : > { %v1925_v39 = vadd.f32 %v4402_v53, %v1743_v42  ;;  %v1926_v46 = vadd.f32 %v4413_v30, %v1744_v14  ;;  %v1927_v3 = vadd.f32 %v4415_v58, %v1745_v19  ;;  %2080 = vst [vmem:[%s4464_s7 + $0x20] sm:$0xff] %v1920_v0  ;;  %v1564_v61 = vmul.f32 %v2415_v56, %v3415_v55 }
 0x196   : > { %v2419_v23 = vpop.eup %2418  ;;  %2081 = vst [vmem:[%s4464_s7 + $0x28] sm:$0xff] %v1921_v26  ;;  %2082 = vst [vmem:[%s4464_s7 + $0x30] sm:$0xff] %v1922_v45  ;;  %v1565_v57 = vmul.f32 %v2415_v56, %v3418_v47  ;;  %v1566_v12 = vmul.f32 %v2415_v56, %v3437_v36  ;;  %v1567_v18 = vmul.f32 %v2415_v56, %v3462_v28  ;;  %vm1217_vm2 = vcmp.eq.f32.partialorder %v4439_v43, inf }
 0x197   : > { %2083 = vst [vmem:[%s4464_s7 + $0x38] sm:$0xff] %v1923_v27  ;;  %2084 = vst [vmem:[%s4464_s7 + $0x40] sm:$0xff] %v1924_v9  ;;  %v1568_v21 = vmul.f32 %v2419_v23, %v3452_v13  ;;  %v1569_v55 = vmul.f32 %v2419_v23, %v3455_v6  ;;  %v1570_v47 = vmul.f32 %v2419_v23, %v6204_v40  ;;  %vm1219_vm3 = vcmp.eq.f32.partialorder %v4439_v43, 0.0 }
 0x198   : > { %2085 = vst [vmem:[%s4464_s7 + $0x48] sm:$0xff] %v1925_v39  ;;  %2086 = vst [vmem:[%s4464_s7 + $0x50] sm:$0xff] %v1926_v46  ;;  %v1571_v36 = vmul.f32 %v2419_v23, %v6205_v10  ;;  %v2421_v28 = vpop.eup %2420  ;;  %v1746_v56 = vmul.f32 %v4385_v49, %v1564_v61  ;;  %v1747_v42 = vmul.f32 %v4395_v5, %v1565_v57  ;;  %v976_v57 = vpop.xlane.xlu0 %975 }
 0x199   : > { %2087 = vst [vmem:[%s4464_s7 + $0x58] sm:$0xff] %v1927_v3  ;;  %v1748_v14 = vmul.f32 %v4397_v50, %v1566_v12  ;;  %v1749_v19 = vmul.f32 %v4409_v29, %v1567_v18  ;;  %v1750_v13 = vmul.f32 %v4385_v49, %v1568_v21  ;;  %v1751_v6 = vmul.f32 %v4395_v5, %v1569_v55 }
 0x19a   : > { %v1752_v0 = vmul.f32 %v4397_v50, %v1570_v47  ;;  %v1753_v26 = vmul.f32 %v4409_v29, %v1571_v36  ;;  %v1928_v45 = vadd.f32 %v4400_v1, %v1746_v56  ;;  %v1929_v27 = vadd.f32 %v4402_v53, %v1747_v42  ;;  %v981_v47 = vpop.xlane.xlu1 %980 }
 0x19b   : > { %v1930_v9 = vadd.f32 %v4413_v30, %v1748_v14  ;;  %v1931_v39 = vadd.f32 %v4415_v58, %v1749_v19  ;;  %v1932_v46 = vadd.f32 %v4400_v1, %v1750_v13  ;;  %v1933_v3 = vadd.f32 %v4402_v53, %v1751_v6 }
 0x19c   : > { %v1934_v23 = vadd.f32 %v4413_v30, %v1752_v0  ;;  %v1935_v61 = vadd.f32 %v4415_v58, %v1753_v26  ;;  %2088 = vst [vmem:[%s4464_s7 + $0x60] sm:$0xff] %v1928_v45  ;;  %2089 = vst [vmem:[%s4464_s7 + $0x68] sm:$0xff] %v1929_v27  ;;  %v1437_v12 = vadd.f32 1e-06, %v4447_v32  ;;  %v1197_v18 = vsel %vm1196_vm12, %v4393_v8, %v4450_v37  ;;  %v6206_v45 = vld [vmem:[#allocation103_spill] sm:$0xff] }
 0x19d   : > { %2090 = vst [vmem:[%s4464_s7 + $0x70] sm:$0xff] %v1930_v9  ;;  %2091 = vst [vmem:[%s4464_s7 + $0x78] sm:$0xff] %v1931_v39  ;;  %v1202_v21 = vmul.f32 %v4474_v60, %v4407_v4  ;;  %v1209_v55 = vmul.f32 %v2417_v34, %v4420_v63  ;;  %v1200_v40 = vsel %vm1198_vm13, %v1199_v35, %v1197_v18  ;;  %v1220_v37 = vand.u32 2147483648, %v4439_v43  ;;  %v6207_v9 = vld [vmem:[#allocation104_spill] sm:$0xff] }
 0x19e   : > { %2092 = vst [vmem:[%s4464_s7 + $0x80] sm:$0xff] %v1932_v46  ;;  %2093 = vst [vmem:[%s4464_s7 + $0x88] sm:$0xff] %v1933_v3  ;;  %v1216_v32 = vmul.f32 %v2421_v28, %v4439_v43  ;;  %2422 = vrcp.f32 %v1437_v12  ;;  %v1438_v60 = vadd.f32 1e-06, %v1200_v40  ;;  %v4574_v28 = vmul.f32 0.0019569471, %v4496_v2 }
 0x19f   : > { %2094 = vst [vmem:[%s4464_s7 + $0x90] sm:$0xff] %v1934_v23  ;;  %2095 = vst [vmem:[%s4464_s7 + $0x98] sm:$0xff] %v1935_v61  ;;  %v1204_v34 = vsel %vm1203_vm14, %v4407_v4, %v1202_v21  ;;  %v1211_v10 = vsel %vm1210_vm15, %v4420_v63, %v1209_v55  ;;  %v986_v4 = vpop.xlane.xlu0 %985  ;;  %v4579_v63 = vmul.f32 0.0019569471, %v976_v57  ;;  %v6208_v46 = vld [vmem:[#allocation113_spill] sm:$0xff]  ;;  %v6209_v23 = vld [vmem:[#allocation116_spill] sm:$0xff] }
 0x1a0   : > { %v1207_v8 = vsel %vm1205_vm0, %v1206_v59, %v1204_v34  ;;  %v1214_v35 = vsel %vm1212_vm1, %v1213_v62, %v1211_v10  ;;  %v1218_v36 = vsel %vm1217_vm2, %v4439_v43, %v1216_v32  ;;  %2424 = vrcp.f32 %v1438_v60  ;;  %v991_v43 = vpop.xlane.xlu1 %990  ;;  %v6210_v34 = vld [vmem:[#allocation107_spill] sm:$0xff] }
 0x1a1   : > { %v1439_v56 = vadd.f32 1e-06, %v1207_v8  ;;  %v1440_v42 = vadd.f32 1e-06, %v1214_v35  ;;  %v1221_v14 = vsel %vm1219_vm3, %v1220_v37, %v1218_v36  ;;  %2426 = vrsqrt.f32 %v4574_v28  ;;  %v6211_v8 = vld [vmem:[#allocation108_spill] sm:$0xff]  ;;  %v6212_v36 = vld [vmem:[#allocation117_spill] sm:$0xff] }
 0x1a2   : > { %v1441_v19 = vadd.f32 1e-06, %v1221_v14  ;;  %v4577_v59 = vmul.f32 0.0019569471, %v971_v7  ;;  %v4581_v62 = vmul.f32 0.0019569471, %v981_v47 }
 0x1a3   : > { %2428 = vrcp.f32 %v1439_v56  ;;  %v4583_v2 = vmul.f32 0.0019569471, %v986_v4  ;;  %v4587_v13 = vmul.f32 0.0019569471, %v991_v43  ;;  %v996_v6 = vpop.xlane.xlu0 %995  ;;  %v1227_v0 = vand.u32 2147483648, %v4574_v28 }
 0x1a4   : > { %2430 = vrcp.f32 %v1440_v42  ;;  %v1234_v26 = vand.u32 2147483648, %v4577_v59  ;;  %v1241_v12 = vand.u32 2147483648, %v4579_v63  ;;  %v1248_v18 = vand.u32 2147483648, %v4581_v62  ;;  %v6213_v42 = vld [vmem:[#allocation122_spill] sm:$0xff] }
 0x1a5   : > { %2432 = vrcp.f32 %v1441_v19  ;;  %v4600_v21 = vmul.f32 0.0019569471, %v996_v6  ;;  %vm1224_vm4 = vcmp.eq.f32.partialorder %v4574_v28, inf  ;;  %vm1231_vm5 = vcmp.eq.f32.partialorder %v4577_v59, inf }
 0x1a6   : > { %2434 = vrsqrt.f32 %v4577_v59  ;;  %vm1238_vm6 = vcmp.eq.f32.partialorder %v4579_v63, inf  ;;  %vm1245_vm7 = vcmp.eq.f32.partialorder %v4581_v62, inf  ;;  %vm1226_vm8 = vcmp.eq.f32.partialorder %v4574_v28, 0.0 }
 0x1a7   : > { %2436 = vrsqrt.f32 %v4579_v63  ;;  %vm1233_vm9 = vcmp.eq.f32.partialorder %v4577_v59, 0.0  ;;  %vm1240_vm10 = vcmp.eq.f32.partialorder %v4579_v63, 0.0  ;;  %vm1247_vm11 = vcmp.eq.f32.partialorder %v4581_v62, 0.0 }
 0x1a8   : > { %2438 = vrsqrt.f32 %v4581_v62  ;;  %v2423_v7 = vpop.eup %2422  ;;  %vm1252_vm12 = vcmp.eq.f32.partialorder %v4583_v2, inf  ;;  %vm1254_vm13 = vcmp.eq.f32.partialorder %v4583_v2, 0.0  ;;  %vm1259_vm14 = vcmp.eq.f32.partialorder %v4587_v13, inf }
 0x1a9   : > { %2440 = vrsqrt.f32 %v4583_v2  ;;  %v1572_v27 = vmul.f32 %v2423_v7, %v6206_v45  ;;  %v1573_v39 = vmul.f32 %v2423_v7, %v6207_v9  ;;  %v1574_v3 = vmul.f32 %v2423_v7, %v6208_v46 }
 0x1aa   : > { %v1575_v61 = vmul.f32 %v2423_v7, %v6209_v23  ;;  %v2425_v57 = vpop.eup %2424  ;;  %2442 = vrsqrt.f32 %v4587_v13  ;;  %v6214_v23 = vld [vmem:[#allocation105_spill] sm:$0xff]  ;;  %vm1261_vm15 = vcmp.eq.f32.partialorder %v4587_v13, 0.0  ;;  %vm1266_vm0 = vcmp.eq.f32.partialorder %v4600_v21, inf }
 0x1ab   : > { %v4602_v55 = vpop.eup %2426  ;;  %v1754_v40 = vmul.f32 %v4385_v49, %v1572_v27  ;;  %v1755_v32 = vmul.f32 %v4395_v5, %v1573_v39  ;;  %v1756_v37 = vmul.f32 %v4397_v50, %v1574_v3  ;;  %v1576_v10 = vmul.f32 %v2425_v57, %v6210_v34 }
 0x1ac   : > { %v1757_v47 = vmul.f32 %v4409_v29, %v1575_v61  ;;  %v1577_v35 = vmul.f32 %v2425_v57, %v6211_v8  ;;  %v1578_v56 = vmul.f32 %v2425_v57, %v6212_v36  ;;  %v1579_v14 = vmul.f32 %v2425_v57, %v6213_v42  ;;  %v6215_v57 = vld [vmem:[#allocation106_spill] sm:$0xff] }
 0x1ad   : > { %v2429_v60 = vpop.eup %2428  ;;  %v1936_v4 = vadd.f32 %v4400_v1, %v1754_v40  ;;  %v1937_v43 = vadd.f32 %v4402_v53, %v1755_v32  ;;  %v1938_v6 = vadd.f32 %v4413_v30, %v1756_v37  ;;  %v1758_v27 = vmul.f32 %v4385_v49, %v1576_v10  ;;  %v6216_v32 = vld [vmem:[#allocation123_spill] sm:$0xff] }
 0x1ae   : > { %v2431_v19 = vpop.eup %2430  ;;  %v1939_v7 = vadd.f32 %v4415_v58, %v1757_v47  ;;  %v1759_v9 = vmul.f32 %v4395_v5, %v1577_v35  ;;  %v1760_v39 = vmul.f32 %v4397_v50, %v1578_v56  ;;  %v1761_v46 = vmul.f32 %v4409_v29, %v1579_v14  ;;  %v6217_v47 = vld [vmem:[#allocation8_spill] sm:$0xff] }
 0x1af   : > { %v2433_v45 = vpop.eup %2432  ;;  %2096 = vst [vmem:[%s4464_s7 + $0xa0] sm:$0xff] %v1936_v4  ;;  %2097 = vst [vmem:[%s4464_s7 + $0xa8] sm:$0xff] %v1937_v43  ;;  %v1580_v61 = vmul.f32 %v2429_v60, %v6214_v23  ;;  %v1581_v40 = vmul.f32 %v2429_v60, %v6215_v57  ;;  %v1582_v37 = vmul.f32 %v2429_v60, %v6216_v32  ;;  %2444 = vrsqrt.f32 %v4600_v21 }
 0x1b0   : > { %v4620_v3 = vpop.eup %2434  ;;  %2098 = vst [vmem:[%s4464_s7 + $0xb0] sm:$0xff] %v1938_v6  ;;  %2099 = vst [vmem:[%s4464_s7 + $0xb8] sm:$0xff] %v1939_v7  ;;  %v1583_v34 = vmul.f32 %v2429_v60, %v6217_v47  ;;  %v1940_v8 = vadd.f32 %v4400_v1, %v1758_v27  ;;  %v1941_v35 = vadd.f32 %v4402_v53, %v1759_v9  ;;  %v6218_v7 = vld [vmem:[#allocation114_spill] sm:$0xff]  ;;  %v6219_v9 = vld [vmem:[#allocation115_spill] sm:$0xff]  ;;  %vm1268_vm1 = vcmp.eq.f32.partialorder %v4600_v21, 0.0 }
 0x1b1   : > { %v2437_v10 = vpop.eup %2436  ;;  %v1942_v36 = vadd.f32 %v4413_v30, %v1760_v39  ;;  %v1943_v56 = vadd.f32 %v4415_v58, %v1761_v46  ;;  %v1762_v14 = vmul.f32 %v4385_v49, %v1580_v61  ;;  %v1763_v4 = vmul.f32 %v4395_v5, %v1581_v40  ;;  %v6220_v46 = vld [vmem:[#allocation10_spill] sm:$0xff]  ;;  %v6221_v61 = vld [vmem:[#allocation12_spill] sm:$0xff] }
 0x1b2   : > { %v2439_v42 = vpop.eup %2438  ;;  %v1764_v60 = vmul.f32 %v4397_v50, %v1582_v37  ;;  %v1765_v43 = vmul.f32 %v4409_v29, %v1583_v34  ;;  %2100 = vst [vmem:[%s4464_s7 + $0xc0] sm:$0xff] %v1940_v8  ;;  %2101 = vst [vmem:[%s4464_s7 + $0xc8] sm:$0xff] %v1941_v35  ;;  %v1584_v27 = vmul.f32 %v2431_v19, %v6218_v7  ;;  %v6224_v7 = vld [vmem:[#allocation9_spill] sm:$0xff] }
 0x1b3   : > { %v4642_v6 = vpop.eup %2440  ;;  %2102 = vst [vmem:[%s4464_s7 + $0xd0] sm:$0xff] %v1942_v36  ;;  %2103 = vst [vmem:[%s4464_s7 + $0xd8] sm:$0xff] %v1943_v56  ;;  %v1585_v39 = vmul.f32 %v2431_v19, %v6219_v9  ;;  %v1586_v23 = vmul.f32 %v2431_v19, %v6220_v46  ;;  %v1587_v57 = vmul.f32 %v2431_v19, %v6221_v61  ;;  %v4660_v19 = vpop.xlane.xlu1 %1000  ;;  %v6225_v9 = vld [vmem:[#allocation11_spill] sm:$0xff] }
 0x1b4   : > { %v1944_v40 = vadd.f32 %v4400_v1, %v1762_v14  ;;  %v1945_v32 = vadd.f32 %v4402_v53, %v1763_v4  ;;  %v1946_v37 = vadd.f32 %v4413_v30, %v1764_v60  ;;  %v1947_v47 = vadd.f32 %v4415_v58, %v1765_v43  ;;  %v2443_v34 = vpop.eup %2442  ;;  %v6222_v14 = vld [vmem:[#allocation111_spill] sm:$0xff]  ;;  %v6223_v60 = vld [vmem:[#allocation112_spill] sm:$0xff] }
 0x1b5   : > { %v1766_v8 = vmul.f32 %v4385_v49, %v1584_v27  ;;  %v1767_v35 = vmul.f32 %v4395_v5, %v1585_v39  ;;  %v1768_v36 = vmul.f32 %v4397_v50, %v1586_v23  ;;  %v1769_v56 = vmul.f32 %v4409_v29, %v1587_v57 }
 0x1b6   : > { %2104 = vst [vmem:[%s4464_s7 + $0xe0] sm:$0xff] %v1944_v40  ;;  %2105 = vst [vmem:[%s4464_s7 + $0xe8] sm:$0xff] %v1945_v32  ;;  %v1588_v4 = vmul.f32 %v2433_v45, %v6222_v14  ;;  %v1589_v43 = vmul.f32 %v2433_v45, %v6223_v60  ;;  %v1590_v27 = vmul.f32 %v2433_v45, %v6224_v7 }
 0x1b7   : > { %2106 = vst [vmem:[%s4464_s7 + $0xf0] sm:$0xff] %v1946_v37  ;;  %2107 = vst [vmem:[%s4464_s7 + $0xf8] sm:$0xff] %v1947_v47  ;;  %v1591_v39 = vmul.f32 %v2433_v45, %v6225_v9  ;;  %v1948_v46 = vadd.f32 %v4400_v1, %v1766_v8  ;;  %v1949_v23 = vadd.f32 %v4402_v53, %v1767_v35  ;;  %v1011_v7 = vpop.xlane.xlu1 %1010 }
 0x1b8   : > { %v1950_v61 = vadd.f32 %v4413_v30, %v1768_v36  ;;  %v1951_v57 = vadd.f32 %v4415_v58, %v1769_v56  ;;  %v1770_v40 = vmul.f32 %v4385_v49, %v1588_v4  ;;  %v1771_v32 = vmul.f32 %v4395_v5, %v1589_v43  ;;  %v1006_v56 = vpop.xlane.xlu0 %1005 }
 0x1b9   : > { %v1772_v37 = vmul.f32 %v4397_v50, %v1590_v27  ;;  %v1773_v45 = vmul.f32 %v4409_v29, %v1591_v39  ;;  %2108 = vst [vmem:[%s4464_s7 + $0x100] sm:$0xff] %v1948_v46  ;;  %2109 = vst [vmem:[%s4464_s7 + $0x108] sm:$0xff] %v1949_v23  ;;  %v1223_v47 = vmul.f32 %v4602_v55, %v4574_v28 }
 0x1ba   : > { %2110 = vst [vmem:[%s4464_s7 + $0x110] sm:$0xff] %v1950_v61  ;;  %2111 = vst [vmem:[%s4464_s7 + $0x118] sm:$0xff] %v1951_v57  ;;  %v1230_v8 = vmul.f32 %v4620_v3, %v4577_v59  ;;  %v1237_v35 = vmul.f32 %v2437_v10, %v4579_v63  ;;  %v1244_v36 = vmul.f32 %v2439_v42, %v4581_v62 }
 0x1bb   : > { %v1952_v14 = vadd.f32 %v4400_v1, %v1770_v40  ;;  %v1953_v4 = vadd.f32 %v4402_v53, %v1771_v32  ;;  %v1954_v60 = vadd.f32 %v4413_v30, %v1772_v37  ;;  %v1955_v43 = vadd.f32 %v4415_v58, %v1773_v45 }
 0x1bc   : > { %v1225_v55 = vsel %vm1224_vm4, %v4574_v28, %v1223_v47  ;;  %v1232_v3 = vsel %vm1231_vm5, %v4577_v59, %v1230_v8  ;;  %v1239_v10 = vsel %vm1238_vm6, %v4579_v63, %v1237_v35  ;;  %v1246_v42 = vsel %vm1245_vm7, %v4581_v62, %v1244_v36 }
 0x1bd   : > { %2112 = vst [vmem:[%s4464_s7 + $0x120] sm:$0xff] %v1952_v14  ;;  %2113 = vst [vmem:[%s4464_s7 + $0x128] sm:$0xff] %v1953_v4  ;;  %v1228_v27 = vsel %vm1226_vm8, %v1227_v0, %v1225_v55  ;;  %v1235_v9 = vsel %vm1233_vm9, %v1234_v26, %v1232_v3  ;;  %v1242_v39 = vsel %vm1240_vm10, %v1241_v12, %v1239_v10  ;;  %v1255_v59 = vand.u32 2147483648, %v4583_v2  ;;  %v1016_v12 = vpop.xlane.xlu0 %1015  ;;  %v2445_v4 = vpop.eup %2444 }
 0x1be   : > { %2114 = vst [vmem:[%s4464_s7 + $0x130] sm:$0xff] %v1954_v60  ;;  %2115 = vst [vmem:[%s4464_s7 + $0x138] sm:$0xff] %v1955_v43  ;;  %v1249_v46 = vsel %vm1247_vm11, %v1248_v18, %v1246_v42  ;;  %v1442_v23 = vadd.f32 1e-06, %v1228_v27  ;;  %v1443_v61 = vadd.f32 1e-06, %v1235_v9  ;;  %v1251_v28 = vmul.f32 %v4642_v6, %v4583_v2 }
 0x1bf   : > { %v1444_v57 = vadd.f32 1e-06, %v1242_v39  ;;  %v1445_v0 = vadd.f32 1e-06, %v1249_v46  ;;  %v1258_v26 = vmul.f32 %v2443_v34, %v4587_v13  ;;  %v1262_v62 = vand.u32 2147483648, %v4587_v13  ;;  %v1021_v34 = vpop.xlane.xlu1 %1020  ;;  %v6226_v9 = vld [vmem:[#allocation120_spill] sm:$0xff] }
 0x1c0   : > { %2446 = vrcp.f32 %v1442_v23  ;;  %v1253_v63 = vsel %vm1252_vm12, %v4583_v2, %v1251_v28  ;;  %v4745_v37 = vmul.f32 0.0019569471, %v4660_v19  ;;  %v4747_v47 = vmul.f32 0.0019569471, %v1006_v56  ;;  %v6227_v46 = vld [vmem:[#allocation121_spill] sm:$0xff]  ;;  %v6229_v28 = vld [vmem:[#allocation20_spill] sm:$0xff] }
 0x1c1   : > { %2448 = vrcp.f32 %v1443_v61  ;;  %v1256_v18 = vsel %vm1254_vm13, %v1255_v59, %v1253_v63  ;;  %v1260_v6 = vsel %vm1259_vm14, %v4587_v13, %v1258_v26  ;;  %v4749_v8 = vmul.f32 0.0019569471, %v1011_v7  ;;  %v1026_v35 = vpop.xlane.xlu0 %1025  ;;  %v6228_v61 = vld [vmem:[#allocation16_spill] sm:$0xff]  ;;  %v6230_v26 = vld [vmem:[#allocation118_spill] sm:$0xff]  ;;  %v6241_v43 = vld [vmem:[#allocation27_spill] sm:$0xff] }
 0x1c2   : > { %2450 = vrcp.f32 %v1444_v57  ;;  %v1446_v40 = vadd.f32 1e-06, %v1256_v18  ;;  %v1263_v32 = vsel %vm1261_vm15, %v1262_v62, %v1260_v6  ;;  %v4751_v2 = vmul.f32 0.0019569471, %v1016_v12  ;;  %v6231_v62 = vld [vmem:[#allocation119_spill] sm:$0xff]  ;;  %v6232_v18 = vld [vmem:[#allocation13_spill] sm:$0xff] }
 0x1c3   : > { %2452 = vrcp.f32 %v1445_v0  ;;  %v1447_v45 = vadd.f32 1e-06, %v1263_v32  ;;  %v4754_v13 = vmul.f32 0.0019569471, %v1021_v34  ;;  %v1031_v36 = vpop.xlane.xlu1 %1030  ;;  %v1269_v19 = vand.u32 2147483648, %v4600_v21  ;;  %v6233_v34 = vld [vmem:[#allocation19_spill] sm:$0xff] }
 0x1c4   : > { %2454 = vrcp.f32 %v1446_v40  ;;  %v1276_v14 = vand.u32 2147483648, %v4745_v37  ;;  %v1283_v56 = vand.u32 2147483648, %v4747_v47  ;;  %v4764_v7 = vmul.f32 0.0019569471, %v1026_v35 }
 0x1c5   : > { %2456 = vrcp.f32 %v1447_v45  ;;  %v4767_v3 = vmul.f32 %v2445_v4, %v4600_v21  ;;  %v4771_v42 = vmul.f32 0.0019569471, %v1031_v36  ;;  %vm1273_vm2 = vcmp.eq.f32.partialorder %v4745_v37, inf }
 0x1c6   : > { %2458 = vrsqrt.f32 %v4745_v37  ;;  %vm1280_vm3 = vcmp.eq.f32.partialorder %v4747_v47, inf  ;;  %vm1287_vm4 = vcmp.eq.f32.partialorder %v4749_v8, inf  ;;  %vm1275_vm5 = vcmp.eq.f32.partialorder %v4745_v37, 0.0 }
 0x1c7   : > { %2460 = vrsqrt.f32 %v4747_v47  ;;  %vm1282_vm6 = vcmp.eq.f32.partialorder %v4747_v47, 0.0  ;;  %vm1289_vm7 = vcmp.eq.f32.partialorder %v4749_v8, 0.0  ;;  %vm1294_vm8 = vcmp.eq.f32.partialorder %v4751_v2, inf }
 0x1c8   : > { %2462 = vrsqrt.f32 %v4749_v8  ;;  %vm1296_vm9 = vcmp.eq.f32.partialorder %v4751_v2, 0.0  ;;  %vm1301_vm10 = vcmp.eq.f32.partialorder %v4754_v13, inf  ;;  %vm1303_vm11 = vcmp.eq.f32.partialorder %v4754_v13, 0.0 }
 0x1c9   : > { %2464 = vrsqrt.f32 %v4751_v2  ;;  %vm1308_vm12 = vcmp.eq.f32.partialorder %v4764_v7, inf  ;;  %vm1310_vm13 = vcmp.eq.f32.partialorder %v4764_v7, 0.0  ;;  %vm1315_vm14 = vcmp.eq.f32.partialorder %v4771_v42, inf }
 0x1ca   : > { %v2447_v55 = vpop.eup %2446  ;;  %2466 = vrsqrt.f32 %v4754_v13  ;;  %vm1317_vm15 = vcmp.eq.f32.partialorder %v4771_v42, 0.0 }
 0x1cb   : > { %v2449_v27 = vpop.eup %2448  ;;  %v1592_v39 = vmul.f32 %v2447_v55, %v6226_v9  ;;  %v1593_v23 = vmul.f32 %v2447_v55, %v6227_v46  ;;  %v1594_v57 = vmul.f32 %v2447_v55, %v6228_v61  ;;  %v1595_v0 = vmul.f32 %v2447_v55, %v6229_v28 }
 0x1cc   : > { %v2451_v59 = vpop.eup %2450  ;;  %v1596_v63 = vmul.f32 %v2449_v27, %v6230_v26  ;;  %v1597_v12 = vmul.f32 %v2449_v27, %v6231_v62  ;;  %v1598_v6 = vmul.f32 %v2449_v27, %v6232_v18  ;;  %v1599_v40 = vmul.f32 %v2449_v27, %v6233_v34  ;;  %v6234_v34 = vld [vmem:[#allocation17_spill] sm:$0xff] }
 0x1cd   : > { %v2453_v32 = vpop.eup %2452  ;;  %v1774_v45 = vmul.f32 %v4385_v49, %v1592_v39  ;;  %v1775_v35 = vmul.f32 %v4395_v5, %v1593_v23  ;;  %v1776_v36 = vmul.f32 %v4397_v50, %v1594_v57  ;;  %v1777_v4 = vmul.f32 %v4409_v29, %v1595_v0 }
 0x1ce   : > { %v4785_v9 = vpop.eup %2454  ;;  %v1778_v55 = vmul.f32 %v4385_v49, %v1596_v63  ;;  %v1779_v46 = vmul.f32 %v4395_v5, %v1597_v12  ;;  %v1780_v27 = vmul.f32 %v4397_v50, %v1598_v6  ;;  %v1781_v39 = vmul.f32 %v4409_v29, %v1599_v40 }
 0x1cf   : > { %v4791_v61 = vpop.eup %2456  ;;  %v1956_v23 = vadd.f32 %v4400_v1, %v1774_v45  ;;  %v1957_v57 = vadd.f32 %v4402_v53, %v1775_v35  ;;  %v1958_v28 = vadd.f32 %v4413_v30, %v1776_v36  ;;  %v1959_v0 = vadd.f32 %v4415_v58, %v1777_v4  ;;  %v6235_v45 = vld [vmem:[#allocation18_spill] sm:$0xff]  ;;  %v6236_v36 = vld [vmem:[#allocation24_spill] sm:$0xff] }
 0x1d0   : > { %v4797_v26 = vpop.eup %2458  ;;  %v1960_v63 = vadd.f32 %v4400_v1, %v1778_v55  ;;  %v1961_v62 = vadd.f32 %v4402_v53, %v1779_v46  ;;  %v1962_v12 = vadd.f32 %v4413_v30, %v1780_v27  ;;  %v1963_v18 = vadd.f32 %v4415_v58, %v1781_v39  ;;  %v6237_v55 = vld [vmem:[#allocation28_spill] sm:$0xff]  ;;  %v6238_v27 = vld [vmem:[#allocation14_spill] sm:$0xff] }
 0x1d1   : > { %v4803_v6 = vpop.eup %2460  ;;  %2116 = vst [vmem:[%s4464_s7 + $0x140] sm:$0xff] %v1956_v23  ;;  %2117 = vst [vmem:[%s4464_s7 + $0x148] sm:$0xff] %v1957_v57  ;;  %v1600_v40 = vmul.f32 %v2451_v59, %v6234_v34  ;;  %v1601_v35 = vmul.f32 %v2451_v59, %v6235_v45  ;;  %v1602_v4 = vmul.f32 %v2451_v59, %v6236_v36  ;;  %v6239_v23 = vld [vmem:[#allocation15_spill] sm:$0xff]  ;;  %2468 = vrsqrt.f32 %v4764_v7 }
 0x1d2   : > { %2118 = vst [vmem:[%s4464_s7 + $0x150] sm:$0xff] %v1958_v28  ;;  %2119 = vst [vmem:[%s4464_s7 + $0x158] sm:$0xff] %v1959_v0  ;;  %v1603_v10 = vmul.f32 %v2451_v59, %v6237_v55  ;;  %v4813_v46 = vpop.eup %2462  ;;  %v1604_v39 = vmul.f32 %v2453_v32, %v6238_v27  ;;  %v1605_v57 = vmul.f32 %v2453_v32, %v6239_v23  ;;  %v6240_v28 = vld [vmem:[#allocation21_spill] sm:$0xff] }
 0x1d3   : > { %2120 = vst [vmem:[%s4464_s7 + $0x160] sm:$0xff] %v1960_v63  ;;  %2121 = vst [vmem:[%s4464_s7 + $0x168] sm:$0xff] %v1961_v62  ;;  %v1606_v0 = vmul.f32 %v2453_v32, %v6240_v28  ;;  %v1607_v34 = vmul.f32 %v2453_v32, %v6241_v43  ;;  %v4823_v60 = vpop.eup %2464  ;;  %v1782_v45 = vmul.f32 %v4385_v49, %v1600_v40 }
 0x1d4   : > { %2122 = vst [vmem:[%s4464_s7 + $0x170] sm:$0xff] %v1962_v12  ;;  %2123 = vst [vmem:[%s4464_s7 + $0x178] sm:$0xff] %v1963_v18  ;;  %v1783_v59 = vmul.f32 %v4395_v5, %v1601_v35  ;;  %v1784_v36 = vmul.f32 %v4397_v50, %v1602_v4  ;;  %v1785_v63 = vmul.f32 %v4409_v29, %v1603_v10  ;;  %v4829_v62 = vpop.eup %2466 }
 0x1d5   : > { %v1786_v12 = vmul.f32 %v4385_v49, %v1604_v39  ;;  %v1787_v18 = vmul.f32 %v4395_v5, %v1605_v57  ;;  %v1788_v55 = vmul.f32 %v4397_v50, %v1606_v0  ;;  %v1789_v43 = vmul.f32 %v4409_v29, %v1607_v34  ;;  %v6242_v57 = vld [vmem:[#allocation25_spill] sm:$0xff]  ;;  %v6243_v0 = vld [vmem:[#allocation26_spill] sm:$0xff] }
 0x1d6   : > { %v1964_v32 = vadd.f32 %v4400_v1, %v1782_v45  ;;  %v1965_v10 = vadd.f32 %v4402_v53, %v1783_v59  ;;  %v1966_v40 = vadd.f32 %v4413_v30, %v1784_v36  ;;  %v1967_v35 = vadd.f32 %v4415_v58, %v1785_v63  ;;  %v6244_v45 = vld [vmem:[#allocation32_spill] sm:$0xff] }
 0x1d7   : > { %v1968_v4 = vadd.f32 %v4400_v1, %v1786_v12  ;;  %v1969_v27 = vadd.f32 %v4402_v53, %v1787_v18  ;;  %v1970_v39 = vadd.f32 %v4413_v30, %v1788_v55  ;;  %v1971_v23 = vadd.f32 %v4415_v58, %v1789_v43  ;;  %v6245_v36 = vld [vmem:[#allocation36_spill] sm:$0xff]  ;;  %v6246_v12 = vld [vmem:[#allocation22_spill] sm:$0xff]  ;;  %v6247_v55 = vld [vmem:[#allocation23_spill] sm:$0xff] }
 0x1d8   : > { %2124 = vst [vmem:[%s4464_s7 + $0x180] sm:$0xff] %v1964_v32  ;;  %2125 = vst [vmem:[%s4464_s7 + $0x188] sm:$0xff] %v1965_v10  ;;  %v1608_v28 = vmul.f32 %v4785_v9, %v6242_v57  ;;  %v1609_v34 = vmul.f32 %v4785_v9, %v6243_v0  ;;  %v1610_v59 = vmul.f32 %v4785_v9, %v6244_v45  ;;  %v6248_v32 = vld [vmem:[#allocation29_spill] sm:$0xff]  ;;  %v6249_v10 = vld [vmem:[#allocation35_spill] sm:$0xff]  ;;  %v1036_v0 = vpop.xlane.xlu0 %1035 }
 0x1d9   : > { %2126 = vst [vmem:[%s4464_s7 + $0x190] sm:$0xff] %v1966_v40  ;;  %2127 = vst [vmem:[%s4464_s7 + $0x198] sm:$0xff] %v1967_v35  ;;  %v1611_v63 = vmul.f32 %v4785_v9, %v6245_v36  ;;  %v1612_v18 = vmul.f32 %v4791_v61, %v6246_v12  ;;  %v1613_v43 = vmul.f32 %v4791_v61, %v6247_v55 }
 0x1da   : > { %2128 = vst [vmem:[%s4464_s7 + $0x1a0] sm:$0xff] %v1968_v4  ;;  %2129 = vst [vmem:[%s4464_s7 + $0x1a8] sm:$0xff] %v1969_v27  ;;  %v1614_v9 = vmul.f32 %v4791_v61, %v6248_v32  ;;  %v1615_v40 = vmul.f32 %v4791_v61, %v6249_v10  ;;  %v1790_v35 = vmul.f32 %v4385_v49, %v1608_v28 }
 0x1db   : > { %2130 = vst [vmem:[%s4464_s7 + $0x1b0] sm:$0xff] %v1970_v39  ;;  %2131 = vst [vmem:[%s4464_s7 + $0x1b8] sm:$0xff] %v1971_v23  ;;  %v1791_v57 = vmul.f32 %v4395_v5, %v1609_v34  ;;  %v1792_v4 = vmul.f32 %v4397_v50, %v1610_v59  ;;  %v1793_v27 = vmul.f32 %v4409_v29, %v1611_v63 }
 0x1dc   : > { %v1794_v39 = vmul.f32 %v4385_v49, %v1612_v18  ;;  %v1795_v61 = vmul.f32 %v4395_v5, %v1613_v43  ;;  %v1796_v23 = vmul.f32 %v4397_v50, %v1614_v9  ;;  %v1797_v28 = vmul.f32 %v4409_v29, %v1615_v40 }
 0x1dd   : > { %v1972_v34 = vadd.f32 %v4400_v1, %v1790_v35  ;;  %v1973_v45 = vadd.f32 %v4402_v53, %v1791_v57  ;;  %v1974_v59 = vadd.f32 %v4413_v30, %v1792_v4  ;;  %v1975_v36 = vadd.f32 %v4415_v58, %v1793_v27 }
 0x1de   : > { %v1976_v63 = vadd.f32 %v4400_v1, %v1794_v39  ;;  %v1977_v12 = vadd.f32 %v4402_v53, %v1795_v61  ;;  %v1978_v18 = vadd.f32 %v4413_v30, %v1796_v23  ;;  %v1979_v55 = vadd.f32 %v4415_v58, %v1797_v28  ;;  %v1046_v39 = vpop.xlane.xlu0 %1045 }
 0x1df   : > { %2132 = vst [vmem:[%s4464_s7 + $0x1c0] sm:$0xff] %v1972_v34  ;;  %2133 = vst [vmem:[%s4464_s7 + $0x1c8] sm:$0xff] %v1973_v45  ;;  %v1267_v43 = vsel %vm1266_vm0, %v4600_v21, %v4767_v3  ;;  %v1272_v32 = vmul.f32 %v4797_v26, %v4745_v37  ;;  %v1279_v9 = vmul.f32 %v4803_v6, %v4747_v47  ;;  %v1041_v6 = vpop.xlane.xlu1 %1040  ;;  %v6252_v28 = vand.u32 2147483648, %v4754_v13 }
 0x1e0   : > { %2134 = vst [vmem:[%s4464_s7 + $0x1d0] sm:$0xff] %v1974_v59  ;;  %2135 = vst [vmem:[%s4464_s7 + $0x1d8] sm:$0xff] %v1975_v36  ;;  %v1286_v10 = vmul.f32 %v4813_v46, %v4749_v8  ;;  %v1270_v40 = vsel %vm1268_vm1, %v1269_v19, %v1267_v43  ;;  %v1293_v3 = vmul.f32 %v4823_v60, %v4751_v2  ;;  %v4956_v59 = vmul.f32 0.0019569471, %v1036_v0 }
 0x1e1   : > { %2136 = vst [vmem:[%s4464_s7 + $0x1e0] sm:$0xff] %v1976_v63  ;;  %2137 = vst [vmem:[%s4464_s7 + $0x1e8] sm:$0xff] %v1977_v12  ;;  %v1300_v26 = vmul.f32 %v4829_v62, %v4754_v13  ;;  %v1448_v35 = vadd.f32 1e-06, %v1270_v40  ;;  %v1274_v46 = vsel %vm1273_vm2, %v4745_v37, %v1272_v32  ;;  %v1281_v57 = vsel %vm1280_vm3, %v4747_v47, %v1279_v9 }
 0x1e2   : > { %2138 = vst [vmem:[%s4464_s7 + $0x1f0] sm:$0xff] %v1978_v18  ;;  %2139 = vst [vmem:[%s4464_s7 + $0x1f8] sm:$0xff] %v1979_v55  ;;  %v1288_v21 = vsel %vm1287_vm4, %v4749_v8, %v1286_v10  ;;  %v1277_v19 = vsel %vm1275_vm5, %v1276_v14, %v1274_v46  ;;  %v1284_v60 = vsel %vm1282_vm6, %v1283_v56, %v1281_v57  ;;  %v6250_v62 = vand.u32 2147483648, %v4749_v8  ;;  %v1056_v12 = vpop.xlane.xlu0 %1055  ;;  %v2469_v55 = vpop.eup %2468  ;;  %v6253_v57 = vld [vmem:[#allocation33_spill] sm:$0xff] }
 0x1e3   : > { %v1295_v27 = vsel %vm1294_vm8, %v4751_v2, %v1293_v3  ;;  %2470 = vrcp.f32 %v1448_v35  ;;  %v1449_v61 = vadd.f32 1e-06, %v1277_v19  ;;  %v1450_v23 = vadd.f32 1e-06, %v1284_v60  ;;  %v1051_v36 = vpop.xlane.xlu1 %1050  ;;  %v6254_v19 = vld [vmem:[#allocation34_spill] sm:$0xff] }
 0x1e4   : > { %v1291_v4 = vsel %vm1289_vm7, %v6250_v62, %v1288_v21  ;;  %v6251_v14 = vand.u32 2147483648, %v4751_v2  ;;  %v1302_v56 = vsel %vm1301_vm10, %v4754_v13, %v1300_v26  ;;  %2472 = vrsqrt.f32 %v4771_v42  ;;  %v6255_v62 = vld [vmem:[#allocation40_spill] sm:$0xff] }
 0x1e5   : > { %v1451_v37 = vadd.f32 1e-06, %v1291_v4  ;;  %2474 = vrcp.f32 %v1449_v61  ;;  %v1305_v34 = vsel %vm1303_vm11, %v6252_v28, %v1302_v56  ;;  %v4958_v2 = vmul.f32 0.0019569471, %v1041_v6 }
 0x1e6   : > { %v1298_v47 = vsel %vm1296_vm9, %v6251_v14, %v1295_v27  ;;  %2476 = vrcp.f32 %v1450_v23  ;;  %v1453_v45 = vadd.f32 1e-06, %v1305_v34  ;;  %v4960_v63 = vmul.f32 0.0019569471, %v1046_v39  ;;  %v6256_v27 = vld [vmem:[#allocation44_spill] sm:$0xff] }
 0x1e7   : > { %v1452_v8 = vadd.f32 1e-06, %v1298_v47  ;;  %2478 = vrcp.f32 %v1451_v37  ;;  %v4962_v18 = vmul.f32 0.0019569471, %v1051_v36  ;;  %v1307_v13 = vmul.f32 %v2469_v55, %v4764_v7  ;;  %v1061_v40 = vpop.xlane.xlu1 %1060 }
 0x1e8   : > { %v1311_v0 = vand.u32 2147483648, %v4764_v7  ;;  %v4970_v43 = vmul.f32 0.0019569471, %v1056_v12  ;;  %v1318_v32 = vand.u32 2147483648, %v4771_v42  ;;  %v1325_v9 = vand.u32 2147483648, %v4956_v59  ;;  %v6258_v12 = vld [vmem:[#allocation31_spill] sm:$0xff] }
 0x1e9   : > { %2480 = vrcp.f32 %v1452_v8  ;;  %v1332_v10 = vand.u32 2147483648, %v4958_v2  ;;  %v1309_v26 = vsel %vm1308_vm12, %v4764_v7, %v1307_v13  ;;  %v1339_v6 = vand.u32 2147483648, %v4960_v63  ;;  %v6257_v7 = vld [vmem:[#allocation30_spill] sm:$0xff]  ;;  %v6259_v13 = vld [vmem:[#allocation37_spill] sm:$0xff] }
 0x1ea   : > { %2482 = vrcp.f32 %v1453_v45  ;;  %v1346_v35 = vand.u32 2147483648, %v4962_v18  ;;  %v4986_v23 = vsel %vm1310_vm13, %v1311_v0, %v1309_v26  ;;  %v4992_v14 = vmul.f32 0.0019569471, %v1061_v40  ;;  %v6260_v40 = vld [vmem:[#allocation43_spill] sm:$0xff] }
 0x1eb   : > { %2484 = vrsqrt.f32 %v4956_v59  ;;  %vm1322_vm0 = vcmp.eq.f32.partialorder %v4956_v59, inf  ;;  %vm1329_vm1 = vcmp.eq.f32.partialorder %v4958_v2, inf  ;;  %vm1324_vm2 = vcmp.eq.f32.partialorder %v4956_v59, 0.0 }
 0x1ec   : > { %2486 = vrsqrt.f32 %v4958_v2  ;;  %vm1331_vm3 = vcmp.eq.f32.partialorder %v4958_v2, 0.0  ;;  %vm1336_vm4 = vcmp.eq.f32.partialorder %v4960_v63, inf  ;;  %vm1338_vm5 = vcmp.eq.f32.partialorder %v4960_v63, 0.0 }
 0x1ed   : > { %2488 = vrsqrt.f32 %v4960_v63  ;;  %v2471_v3 = vpop.eup %2470  ;;  %vm1343_vm6 = vcmp.eq.f32.partialorder %v4962_v18, inf  ;;  %vm1350_vm7 = vcmp.eq.f32.partialorder %v4970_v43, inf  ;;  %vm1345_vm8 = vcmp.eq.f32.partialorder %v4962_v18, 0.0 }
 0x1ee   : > { %2490 = vrsqrt.f32 %v4962_v18  ;;  %v2473_v46 = vpop.eup %2472  ;;  %v1616_v21 = vmul.f32 %v2471_v3, %v6253_v57  ;;  %v1617_v60 = vmul.f32 %v2471_v3, %v6254_v19  ;;  %v1618_v4 = vmul.f32 %v2471_v3, %v6255_v62 }
 0x1ef   : > { %v1619_v39 = vmul.f32 %v2471_v3, %v6256_v27  ;;  %v2475_v61 = vpop.eup %2474  ;;  %v4989_v37 = vmul.f32 %v2473_v46, %v4771_v42  ;;  %2492 = vrsqrt.f32 %v4970_v43  ;;  %vm1352_vm9 = vcmp.eq.f32.partialorder %v4970_v43, 0.0 }
 0x1f0   : > { %v2477_v47 = vpop.eup %2476  ;;  %v1798_v56 = vmul.f32 %v4385_v49, %v1616_v21  ;;  %v1799_v8 = vmul.f32 %v4395_v5, %v1617_v60  ;;  %v1800_v28 = vmul.f32 %v4397_v50, %v1618_v4  ;;  %v1620_v36 = vmul.f32 %v2475_v61, %v6257_v7  ;;  %v6263_v7 = vld [vmem:[#allocation48_spill] sm:$0xff] }
 0x1f1   : > { %v1801_v34 = vmul.f32 %v4409_v29, %v1619_v39  ;;  %v2479_v45 = vpop.eup %2478  ;;  %v1621_v55 = vmul.f32 %v2475_v61, %v6258_v12  ;;  %v1622_v0 = vmul.f32 %v2475_v61, %v6259_v13  ;;  %v1623_v3 = vmul.f32 %v2475_v61, %v6260_v40  ;;  %v6264_v12 = vld [vmem:[#allocation52_spill] sm:$0xff] }
 0x1f2   : > { %v1980_v46 = vadd.f32 %v4400_v1, %v1798_v56  ;;  %v1981_v57 = vadd.f32 %v4402_v53, %v1799_v8  ;;  %v1982_v21 = vadd.f32 %v4413_v30, %v1800_v28  ;;  %v1802_v62 = vmul.f32 %v4385_v49, %v1620_v36  ;;  %v6261_v56 = vld [vmem:[#allocation41_spill] sm:$0xff]  ;;  %v6262_v28 = vld [vmem:[#allocation42_spill] sm:$0xff] }
 0x1f3   : > { %v2481_v26 = vpop.eup %2480  ;;  %v1983_v19 = vadd.f32 %v4415_v58, %v1801_v34  ;;  %v1803_v4 = vmul.f32 %v4395_v5, %v1621_v55  ;;  %v1804_v27 = vmul.f32 %v4397_v50, %v1622_v0  ;;  %v1805_v39 = vmul.f32 %v4409_v29, %v1623_v3 }
 0x1f4   : > { %v5006_v60 = vpop.eup %2482  ;;  %2140 = vst [vmem:[%s4464_s7 + $0x200] sm:$0xff] %v1980_v46  ;;  %2141 = vst [vmem:[%s4464_s7 + $0x208] sm:$0xff] %v1981_v57  ;;  %v1624_v8 = vmul.f32 %v2477_v47, %v6261_v56  ;;  %v1625_v34 = vmul.f32 %v2477_v47, %v6262_v28  ;;  %v1626_v36 = vmul.f32 %v2477_v47, %v6263_v7  ;;  %v6267_v7 = vld [vmem:[#allocation45_spill] sm:$0xff]  ;;  %vm1357_vm10 = vcmp.eq.f32.partialorder %v4992_v14, inf }
 0x1f5   : > { %v5012_v61 = vpop.eup %2484  ;;  %2142 = vst [vmem:[%s4464_s7 + $0x210] sm:$0xff] %v1982_v21  ;;  %2143 = vst [vmem:[%s4464_s7 + $0x218] sm:$0xff] %v1983_v19  ;;  %v1627_v55 = vmul.f32 %v2477_v47, %v6264_v12  ;;  %v1984_v0 = vadd.f32 %v4400_v1, %v1802_v62  ;;  %v1985_v40 = vadd.f32 %v4402_v53, %v1803_v4  ;;  %v6265_v62 = vld [vmem:[#allocation38_spill] sm:$0xff]  ;;  %vm1359_vm13 = vcmp.eq.f32.partialorder %v4992_v14, 0.0 }
 0x1f6   : > { %v5022_v13 = vpop.eup %2486  ;;  %v1986_v3 = vadd.f32 %v4413_v30, %v1804_v27  ;;  %v1987_v46 = vadd.f32 %v4415_v58, %v1805_v39  ;;  %v1806_v21 = vmul.f32 %v4385_v49, %v1624_v8  ;;  %v1807_v19 = vmul.f32 %v4395_v5, %v1625_v34  ;;  %v6266_v27 = vld [vmem:[#allocation39_spill] sm:$0xff] }
 0x1f7   : > { %v5028_v57 = vpop.eup %2488  ;;  %v1808_v56 = vmul.f32 %v4397_v50, %v1626_v36  ;;  %v1809_v47 = vmul.f32 %v4409_v29, %v1627_v55  ;;  %2144 = vst [vmem:[%s4464_s7 + $0x220] sm:$0xff] %v1984_v0  ;;  %2145 = vst [vmem:[%s4464_s7 + $0x228] sm:$0xff] %v1985_v40  ;;  %v1628_v4 = vmul.f32 %v2479_v45, %v6265_v62  ;;  %v6268_v8 = vld [vmem:[#allocation51_spill] sm:$0xff] }
 0x1f8   : > { %v5034_v28 = vpop.eup %2490  ;;  %2146 = vst [vmem:[%s4464_s7 + $0x230] sm:$0xff] %v1986_v3  ;;  %2147 = vst [vmem:[%s4464_s7 + $0x238] sm:$0xff] %v1987_v46  ;;  %v1629_v39 = vmul.f32 %v2479_v45, %v6266_v27  ;;  %v1630_v12 = vmul.f32 %v2479_v45, %v6267_v7  ;;  %v1631_v34 = vmul.f32 %v2479_v45, %v6268_v8  ;;  %v6272_v7 = vld [vmem:[#allocation60_spill] sm:$0xff] }
 0x1f9   : > { %v1988_v36 = vadd.f32 %v4400_v1, %v1806_v21  ;;  %v1989_v55 = vadd.f32 %v4402_v53, %v1807_v19  ;;  %v1990_v0 = vadd.f32 %v4413_v30, %v1808_v56  ;;  %v1991_v40 = vadd.f32 %v4415_v58, %v1809_v47  ;;  %v5049_v3 = vpop.eup %2492  ;;  %v6269_v21 = vld [vmem:[#allocation49_spill] sm:$0xff]  ;;  %v6270_v56 = vld [vmem:[#allocation50_spill] sm:$0xff] }
 0x1fa   : > { %v1810_v46 = vmul.f32 %v4385_v49, %v1628_v4  ;;  %v1811_v62 = vmul.f32 %v4395_v5, %v1629_v39  ;;  %v1812_v45 = vmul.f32 %v4397_v50, %v1630_v12  ;;  %v1813_v27 = vmul.f32 %v4409_v29, %v1631_v34  ;;  %v6271_v4 = vld [vmem:[#allocation56_spill] sm:$0xff] }
 0x1fb   : > { %2148 = vst [vmem:[%s4464_s7 + $0x240] sm:$0xff] %v1988_v36  ;;  %2149 = vst [vmem:[%s4464_s7 + $0x248] sm:$0xff] %v1989_v55  ;;  %v1632_v19 = vmul.f32 %v2481_v26, %v6269_v21  ;;  %v1633_v47 = vmul.f32 %v2481_v26, %v6270_v56  ;;  %v1634_v39 = vmul.f32 %v2481_v26, %v6271_v4 }
 0x1fc   : > { %2150 = vst [vmem:[%s4464_s7 + $0x250] sm:$0xff] %v1990_v0  ;;  %2151 = vst [vmem:[%s4464_s7 + $0x258] sm:$0xff] %v1991_v40  ;;  %v1635_v12 = vmul.f32 %v2481_v26, %v6272_v7  ;;  %v1992_v8 = vadd.f32 %v4400_v1, %v1810_v46  ;;  %v1993_v34 = vadd.f32 %v4402_v53, %v1811_v62  ;;  %v6273_v46 = vld [vmem:[#allocation46_spill] sm:$0xff] }
 0x1fd   : > { %v1994_v36 = vadd.f32 %v4413_v30, %v1812_v45  ;;  %v1995_v55 = vadd.f32 %v4415_v58, %v1813_v27  ;;  %v1814_v0 = vmul.f32 %v4385_v49, %v1632_v19  ;;  %v1815_v40 = vmul.f32 %v4395_v5, %v1633_v47  ;;  %v6274_v45 = vld [vmem:[#allocation47_spill] sm:$0xff]  ;;  %v6275_v19 = vld [vmem:[#allocation53_spill] sm:$0xff] }
 0x1fe   : > { %v1816_v21 = vmul.f32 %v4397_v50, %v1634_v39  ;;  %v1817_v26 = vmul.f32 %v4409_v29, %v1635_v12  ;;  %2152 = vst [vmem:[%s4464_s7 + $0x260] sm:$0xff] %v1992_v8  ;;  %2153 = vst [vmem:[%s4464_s7 + $0x268] sm:$0xff] %v1993_v34  ;;  %v1636_v62 = vmul.f32 %v5006_v60, %v6273_v46  ;;  %v6276_v47 = vld [vmem:[#allocation59_spill] sm:$0xff] }
 0x1ff   : > { %2154 = vst [vmem:[%s4464_s7 + $0x270] sm:$0xff] %v1994_v36  ;;  %2155 = vst [vmem:[%s4464_s7 + $0x278] sm:$0xff] %v1995_v55  ;;  %v1637_v27 = vmul.f32 %v5006_v60, %v6274_v45  ;;  %v1638_v56 = vmul.f32 %v5006_v60, %v6275_v19  ;;  %v1639_v4 = vmul.f32 %v5006_v60, %v6276_v47 }
 0x200   : > { %v1996_v39 = vadd.f32 %v4400_v1, %v1814_v0  ;;  %v1997_v7 = vadd.f32 %v4402_v53, %v1815_v40  ;;  %v1998_v12 = vadd.f32 %v4413_v30, %v1816_v21  ;;  %v1999_v8 = vadd.f32 %v4415_v58, %v1817_v26 }
 0x201   : > { %v1818_v34 = vmul.f32 %v4385_v49, %v1636_v62  ;;  %v1819_v60 = vmul.f32 %v4395_v5, %v1637_v27  ;;  %v1820_v36 = vmul.f32 %v4397_v50, %v1638_v56  ;;  %v1821_v55 = vmul.f32 %v4409_v29, %v1639_v4  ;;  %v1066_v56 = vpop.xlane.xlu0 %1065 }
 0x202   : > { %2156 = vst [vmem:[%s4464_s7 + $0x280] sm:$0xff] %v1996_v39  ;;  %2157 = vst [vmem:[%s4464_s7 + $0x288] sm:$0xff] %v1997_v7  ;;  %v1454_v0 = vadd.f32 1e-06, %v4986_v23  ;;  %v1316_v40 = vsel %vm1315_vm14, %v4771_v42, %v4989_v37  ;;  %v1321_v21 = vmul.f32 %v5012_v61, %v4956_v59  ;;  %v1328_v26 = vmul.f32 %v5022_v13, %v4958_v2 }
 0x203   : > { %2158 = vst [vmem:[%s4464_s7 + $0x290] sm:$0xff] %v1998_v12  ;;  %2159 = vst [vmem:[%s4464_s7 + $0x298] sm:$0xff] %v1999_v8  ;;  %v2000_v46 = vadd.f32 %v4400_v1, %v1818_v34  ;;  %v2001_v62 = vadd.f32 %v4402_v53, %v1819_v60  ;;  %v2002_v45 = vadd.f32 %v4413_v30, %v1820_v36 }
 0x204   : > { %v2003_v27 = vadd.f32 %v4415_v58, %v1821_v55  ;;  %2494 = vrcp.f32 %v1454_v0  ;;  %v1319_v23 = vsel %vm1317_vm15, %v1318_v32, %v1316_v40  ;;  %v1323_v37 = vsel %vm1322_vm0, %v4956_v59, %v1321_v21  ;;  %v6278_v21 = vld [vmem:[#allocation58_spill] sm:$0xff] }
 0x205   : > { %v1330_v61 = vsel %vm1329_vm1, %v4958_v2, %v1328_v26  ;;  %2160 = vst [vmem:[%s4464_s7 + $0x2a0] sm:$0xff] %v2000_v46  ;;  %2161 = vst [vmem:[%s4464_s7 + $0x2a8] sm:$0xff] %v2001_v62  ;;  %v1455_v13 = vadd.f32 1e-06, %v1319_v23  ;;  %v1326_v19 = vsel %vm1324_vm2, %v1325_v9, %v1323_v37  ;;  %v1335_v32 = vmul.f32 %v5028_v57, %v4960_v63  ;;  %v1071_v9 = vpop.xlane.xlu1 %1070  ;;  %v6279_v46 = vld [vmem:[#allocation64_spill] sm:$0xff] }
 0x206   : > { %2162 = vst [vmem:[%s4464_s7 + $0x2b0] sm:$0xff] %v2002_v45  ;;  %2163 = vst [vmem:[%s4464_s7 + $0x2b8] sm:$0xff] %v2003_v27  ;;  %v1333_v42 = vsel %vm1331_vm3, %v1332_v10, %v1330_v61  ;;  %v1456_v47 = vadd.f32 1e-06, %v1326_v19  ;;  %v1342_v39 = vmul.f32 %v5034_v28, %v4962_v18  ;;  %v1349_v7 = vmul.f32 %v5049_v3, %v4970_v43  ;;  %v6280_v45 = vld [vmem:[#allocation68_spill] sm:$0xff] }
 0x207   : > { %v1457_v4 = vadd.f32 1e-06, %v1333_v42  ;;  %2496 = vrcp.f32 %v1455_v13  ;;  %v1337_v59 = vsel %vm1336_vm4, %v4960_v63, %v1335_v32  ;;  %v1353_v2 = vand.u32 2147483648, %v4970_v43 }
 0x208   : > { %2498 = vrcp.f32 %v1456_v47  ;;  %v1340_v10 = vsel %vm1338_vm5, %v1339_v6, %v1337_v59  ;;  %v1344_v57 = vsel %vm1343_vm6, %v4962_v18, %v1342_v39  ;;  %v1351_v28 = vsel %vm1350_vm7, %v4970_v43, %v1349_v7  ;;  %v1076_v6 = vpop.xlane.xlu0 %1075  ;;  %v6282_v7 = vld [vmem:[#allocation55_spill] sm:$0xff] }
 0x209   : > { %2500 = vrcp.f32 %v1457_v4  ;;  %v1458_v3 = vadd.f32 1e-06, %v1340_v10  ;;  %v1347_v12 = vsel %vm1345_vm8, %v1346_v35, %v1344_v57  ;;  %v1354_v8 = vsel %vm1352_vm9, %v1353_v2, %v1351_v28  ;;  %v1081_v43 = vpop.xlane.xlu1 %1080  ;;  %v6277_v35 = vld [vmem:[#allocation57_spill] sm:$0xff]  ;;  %v6281_v4 = vld [vmem:[#allocation54_spill] sm:$0xff]  ;;  %v6284_v10 = vld [vmem:[#allocation67_spill] sm:$0xff] }
 0x20a   : > { %v1459_v34 = vadd.f32 1e-06, %v1347_v12  ;;  %v1460_v60 = vadd.f32 1e-06, %v1354_v8  ;;  %2502 = vrsqrt.f32 %v4992_v14  ;;  %v5166_v63 = vmul.f32 0.0019569471, %v1066_v56 }
 0x20b   : > { %2504 = vrcp.f32 %v1458_v3  ;;  %v5168_v36 = vmul.f32 0.0019569471, %v1071_v9  ;;  %v1360_v0 = vand.u32 2147483648, %v4992_v14  ;;  %v5172_v18 = vmul.f32 0.0019569471, %v1076_v6  ;;  %v6283_v2 = vld [vmem:[#allocation61_spill] sm:$0xff] }
 0x20c   : > { %2506 = vrcp.f32 %v1459_v34  ;;  %v1367_v23 = vand.u32 2147483648, %v5166_v63  ;;  %v5181_v61 = vmul.f32 0.0019569471, %v1081_v43  ;;  %vm1364_vm11 = vcmp.eq.f32.partialorder %v5166_v63, inf }
 0x20d   : > { %2508 = vrcp.f32 %v1460_v60  ;;  %v1374_v37 = vand.u32 2147483648, %v5168_v36  ;;  %vm1371_vm12 = vcmp.eq.f32.partialorder %v5168_v36, inf  ;;  %vm1366_vm14 = vcmp.eq.f32.partialorder %v5166_v63, 0.0 }
 0x20e   : > { %v2495_v55 = vpop.eup %2494  ;;  %2510 = vrsqrt.f32 %v5166_v63  ;;  %vm1373_vm15 = vcmp.eq.f32.partialorder %v5168_v36, 0.0  ;;  %vm1378_vm0 = vcmp.eq.f32.partialorder %v5172_v18, inf  ;;  %vm1380_vm1 = vcmp.eq.f32.partialorder %v5172_v18, 0.0 }
 0x20f   : > { %v1640_v40 = vmul.f32 %v2495_v55, %v6277_v35  ;;  %v1641_v26 = vmul.f32 %v2495_v55, %v6278_v21  ;;  %v1642_v62 = vmul.f32 %v2495_v55, %v6279_v46  ;;  %v1643_v27 = vmul.f32 %v2495_v55, %v6280_v45  ;;  %v6285_v21 = vld [vmem:[#allocation65_spill] sm:$0xff]  ;;  %v6286_v46 = vld [vmem:[#allocation66_spill] sm:$0xff] }
 0x210   : > { %2512 = vrsqrt.f32 %v5168_v36  ;;  %v6287_v45 = vld [vmem:[#allocation85_spill] sm:$0xff]  ;;  %vm1385_vm2 = vcmp.eq.f32.partialorder %v5181_v61, inf  ;;  %vm1387_vm3 = vcmp.eq.f32.partialorder %v5181_v61, 0.0 }
 0x211   : > { %v2497_v13 = vpop.eup %2496  ;;  %v1822_v19 = vmul.f32 %v4385_v49, %v1640_v40  ;;  %v1823_v42 = vmul.f32 %v4395_v5, %v1641_v26  ;;  %v1824_v32 = vmul.f32 %v4397_v50, %v1642_v62  ;;  %v1825_v56 = vmul.f32 %v4409_v29, %v1643_v27 }
 0x212   : > { %v2499_v47 = vpop.eup %2498  ;;  %v1644_v39 = vmul.f32 %v2497_v13, %v6281_v4  ;;  %v1645_v59 = vmul.f32 %v2497_v13, %v6282_v7  ;;  %v1646_v9 = vmul.f32 %v2497_v13, %v6283_v2  ;;  %v1647_v57 = vmul.f32 %v2497_v13, %v6284_v10  ;;  %v6288_v13 = vld [vmem:[#allocation86_spill] sm:$0xff] }
 0x213   : > { %v2501_v28 = vpop.eup %2500  ;;  %v2004_v3 = vadd.f32 %v4400_v1, %v1822_v19  ;;  %v2005_v12 = vadd.f32 %v4402_v53, %v1823_v42  ;;  %v2006_v8 = vadd.f32 %v4413_v30, %v1824_v32  ;;  %v2007_v34 = vadd.f32 %v4415_v58, %v1825_v56 }
 0x214   : > { %v5195_v60 = vpop.eup %2502  ;;  %v1826_v6 = vmul.f32 %v4385_v49, %v1644_v39  ;;  %v1827_v43 = vmul.f32 %v4395_v5, %v1645_v59  ;;  %v1828_v55 = vmul.f32 %v4397_v50, %v1646_v9  ;;  %v1829_v35 = vmul.f32 %v4409_v29, %v1647_v57  ;;  %v6289_v57 = vld [vmem:[#allocation62_spill] sm:$0xff] }
 0x215   : > { %v2505_v40 = vpop.eup %2504  ;;  %2164 = vst [vmem:[%s4464_s7 + $0x2c0] sm:$0xff] %v2004_v3  ;;  %2165 = vst [vmem:[%s4464_s7 + $0x2c8] sm:$0xff] %v2005_v12  ;;  %v1648_v26 = vmul.f32 %v2499_v47, %v6285_v21  ;;  %v1649_v62 = vmul.f32 %v2499_v47, %v6286_v46  ;;  %v1650_v27 = vmul.f32 %v2499_v47, %v6287_v45  ;;  %v6290_v12 = vld [vmem:[#allocation63_spill] sm:$0xff]  ;;  %2514 = vrsqrt.f32 %v5172_v18 }
 0x216   : > { %2166 = vst [vmem:[%s4464_s7 + $0x2d0] sm:$0xff] %v2006_v8  ;;  %2167 = vst [vmem:[%s4464_s7 + $0x2d8] sm:$0xff] %v2007_v34  ;;  %v1651_v19 = vmul.f32 %v2499_v47, %v6288_v13  ;;  %v2507_v42 = vpop.eup %2506  ;;  %v2008_v32 = vadd.f32 %v4400_v1, %v1826_v6  ;;  %v2009_v56 = vadd.f32 %v4402_v53, %v1827_v43  ;;  %v6291_v34 = vld [vmem:[#allocation87_spill] sm:$0xff]  ;;  %v6292_v43 = vld [vmem:[#allocation72_spill] sm:$0xff]  ;;  %2516 = vrsqrt.f32 %v5181_v61 }
 0x217   : > { %v2010_v4 = vadd.f32 %v4413_v30, %v1828_v55  ;;  %v2011_v39 = vadd.f32 %v4415_v58, %v1829_v35  ;;  %v5213_v7 = vpop.eup %2508  ;;  %v1830_v59 = vmul.f32 %v4385_v49, %v1648_v26  ;;  %v1831_v2 = vmul.f32 %v4395_v5, %v1649_v62 }
 0x218   : > { %v1832_v9 = vmul.f32 %v4397_v50, %v1650_v27  ;;  %v1833_v10 = vmul.f32 %v4409_v29, %v1651_v19  ;;  %v5219_v47 = vpop.eup %2510  ;;  %2168 = vst [vmem:[%s4464_s7 + $0x2e0] sm:$0xff] %v2008_v32  ;;  %2169 = vst [vmem:[%s4464_s7 + $0x2e8] sm:$0xff] %v2009_v56  ;;  %v1652_v3 = vmul.f32 %v2501_v28, %v6289_v57  ;;  %v6294_v56 = vld [vmem:[#allocation74_spill] sm:$0xff] }
 0x219   : > { %2170 = vst [vmem:[%s4464_s7 + $0x2f0] sm:$0xff] %v2010_v4  ;;  %2171 = vst [vmem:[%s4464_s7 + $0x2f8] sm:$0xff] %v2011_v39  ;;  %v1653_v8 = vmul.f32 %v2501_v28, %v6290_v12  ;;  %v1654_v6 = vmul.f32 %v2501_v28, %v6291_v34  ;;  %v1655_v55 = vmul.f32 %v2501_v28, %v6292_v43  ;;  %v6293_v28 = vld [vmem:[#allocation73_spill] sm:$0xff] }
 0x21a   : > { %v2012_v35 = vadd.f32 %v4400_v1, %v1830_v59  ;;  %v2013_v21 = vadd.f32 %v4402_v53, %v1831_v2  ;;  %v2014_v26 = vadd.f32 %v4413_v30, %v1832_v9  ;;  %v2015_v46 = vadd.f32 %v4415_v58, %v1833_v10  ;;  %v5233_v62 = vpop.eup %2512  ;;  %v6295_v39 = vld [vmem:[#allocation69_spill] sm:$0xff]  ;;  %v6296_v2 = vld [vmem:[#allocation75_spill] sm:$0xff] }
 0x21b   : > { %v1834_v45 = vmul.f32 %v4385_v49, %v1652_v3  ;;  %v1835_v27 = vmul.f32 %v4395_v5, %v1653_v8  ;;  %v1836_v13 = vmul.f32 %v4397_v50, %v1654_v6  ;;  %v1837_v19 = vmul.f32 %v4409_v29, %v1655_v55 }
 0x21c   : > { %2172 = vst [vmem:[%s4464_s7 + $0x300] sm:$0xff] %v2012_v35  ;;  %2173 = vst [vmem:[%s4464_s7 + $0x308] sm:$0xff] %v2013_v21  ;;  %v1656_v32 = vmul.f32 %v2505_v40, %v6293_v28  ;;  %v1657_v4 = vmul.f32 %v2505_v40, %v6294_v56  ;;  %v1658_v59 = vmul.f32 %v2505_v40, %v6295_v39  ;;  %v6298_v35 = vld [vmem:[#allocation71_spill] sm:$0xff] }
 0x21d   : > { %2174 = vst [vmem:[%s4464_s7 + $0x310] sm:$0xff] %v2014_v26  ;;  %2175 = vst [vmem:[%s4464_s7 + $0x318] sm:$0xff] %v2015_v46  ;;  %v1659_v9 = vmul.f32 %v2505_v40, %v6296_v2  ;;  %v2016_v10 = vadd.f32 %v4400_v1, %v1834_v45  ;;  %v2017_v57 = vadd.f32 %v4402_v53, %v1835_v27  ;;  %v6297_v40 = vld [vmem:[#allocation70_spill] sm:$0xff]  ;;  %v6299_v26 = vld [vmem:[#allocation89_spill] sm:$0xff] }
 0x21e   : > { %v2018_v3 = vadd.f32 %v4413_v30, %v1836_v13  ;;  %v2019_v12 = vadd.f32 %v4415_v58, %v1837_v19  ;;  %v1838_v8 = vmul.f32 %v4385_v49, %v1656_v32  ;;  %v1839_v34 = vmul.f32 %v4395_v5, %v1657_v4  ;;  %v6300_v45 = vld [vmem:[#allocation90_spill] sm:$0xff]  ;;  %v6301_v2 = vld [vmem:[#allocation80_spill] sm:$0xff] }
 0x21f   : > { %v1840_v6 = vmul.f32 %v4397_v50, %v1658_v59  ;;  %v1841_v43 = vmul.f32 %v4409_v29, %v1659_v9  ;;  %2176 = vst [vmem:[%s4464_s7 + $0x320] sm:$0xff] %v2016_v10  ;;  %2177 = vst [vmem:[%s4464_s7 + $0x328] sm:$0xff] %v2017_v57  ;;  %v1660_v55 = vmul.f32 %v2507_v42, %v6297_v40  ;;  %v1086_v59 = vpop.xlane.xlu0 %1085  ;;  %v6302_v10 = vld [vmem:[#allocation81_spill] sm:$0xff] }
 0x220   : > { %2178 = vst [vmem:[%s4464_s7 + $0x330] sm:$0xff] %v2018_v3  ;;  %2179 = vst [vmem:[%s4464_s7 + $0x338] sm:$0xff] %v2019_v12  ;;  %v1661_v21 = vmul.f32 %v2507_v42, %v6298_v35  ;;  %v1662_v46 = vmul.f32 %v2507_v42, %v6299_v26  ;;  %v1663_v27 = vmul.f32 %v2507_v42, %v6300_v45  ;;  %v6303_v3 = vld [vmem:[#allocation91_spill] sm:$0xff] }
 0x221   : > { %v2020_v13 = vadd.f32 %v4400_v1, %v1838_v8  ;;  %v2021_v19 = vadd.f32 %v4402_v53, %v1839_v34  ;;  %v2022_v28 = vadd.f32 %v4413_v30, %v1840_v6  ;;  %v2023_v32 = vadd.f32 %v4415_v58, %v1841_v43  ;;  %v6304_v8 = vld [vmem:[#allocation92_spill] sm:$0xff]  ;;  %v1091_v6 = vpop.xlane.xlu1 %1090 }
 0x222   : > { %v1842_v56 = vmul.f32 %v4385_v49, %v1660_v55  ;;  %v1843_v4 = vmul.f32 %v4395_v5, %v1661_v21  ;;  %v1844_v42 = vmul.f32 %v4397_v50, %v1662_v46  ;;  %v1845_v39 = vmul.f32 %v4409_v29, %v1663_v27 }
 0x223   : > { %2180 = vst [vmem:[%s4464_s7 + $0x340] sm:$0xff] %v2020_v13  ;;  %2181 = vst [vmem:[%s4464_s7 + $0x348] sm:$0xff] %v2021_v19  ;;  %v1664_v9 = vmul.f32 %v5213_v7, %v6301_v2  ;;  %v1665_v57 = vmul.f32 %v5213_v7, %v6302_v10  ;;  %v1666_v12 = vmul.f32 %v5213_v7, %v6303_v3 }
 0x224   : > { %2182 = vst [vmem:[%s4464_s7 + $0x350] sm:$0xff] %v2022_v28  ;;  %2183 = vst [vmem:[%s4464_s7 + $0x358] sm:$0xff] %v2023_v32  ;;  %v1667_v34 = vmul.f32 %v5213_v7, %v6304_v8  ;;  %v2024_v43 = vadd.f32 %v4400_v1, %v1842_v56  ;;  %v2025_v40 = vadd.f32 %v4402_v53, %v1843_v4  ;;  %v1096_v4 = vpop.xlane.xlu0 %1095  ;;  %v2515_v8 = vpop.eup %2514 }
 0x225   : > { %v2026_v55 = vadd.f32 %v4413_v30, %v1844_v42  ;;  %v2027_v35 = vadd.f32 %v4415_v58, %v1845_v39  ;;  %v1846_v21 = vmul.f32 %v4385_v49, %v1664_v9  ;;  %v1847_v26 = vmul.f32 %v4395_v5, %v1665_v57  ;;  %v1101_v10 = vpop.xlane.xlu1 %1100 }
 0x226   : > { %v1848_v46 = vmul.f32 %v4397_v50, %v1666_v12  ;;  %v1849_v45 = vmul.f32 %v4409_v29, %v1667_v34  ;;  %2184 = vst [vmem:[%s4464_s7 + $0x360] sm:$0xff] %v2024_v43  ;;  %2185 = vst [vmem:[%s4464_s7 + $0x368] sm:$0xff] %v2025_v40  ;;  %v1356_v7 = vmul.f32 %v5195_v60, %v4992_v14  ;;  %v5338_v9 = vmul.f32 0.0019569471, %v1086_v59 }
 0x227   : > { %2186 = vst [vmem:[%s4464_s7 + $0x370] sm:$0xff] %v2026_v55  ;;  %2187 = vst [vmem:[%s4464_s7 + $0x378] sm:$0xff] %v2027_v35  ;;  %v1363_v27 = vmul.f32 %v5219_v47, %v5166_v63  ;;  %v1370_v13 = vmul.f32 %v5233_v62, %v5168_v36  ;;  %v2028_v19 = vadd.f32 %v4400_v1, %v1846_v21  ;;  %v1381_v59 = vand.u32 2147483648, %v5172_v18 }
 0x228   : > { %v2029_v28 = vadd.f32 %v4402_v53, %v1847_v26  ;;  %v2030_v32 = vadd.f32 %v4413_v30, %v1848_v46  ;;  %v2031_v56 = vadd.f32 %v4415_v58, %v1849_v45  ;;  %v1358_v60 = vsel %vm1357_vm10, %v4992_v14, %v1356_v7  ;;  %v1106_v12 = vpop.xlane.xlu0 %1105 }
 0x229   : > { %v1365_v47 = vsel %vm1364_vm11, %v5166_v63, %v1363_v27  ;;  %v1372_v62 = vsel %vm1371_vm12, %v5168_v36, %v1370_v13  ;;  %2188 = vst [vmem:[%s4464_s7 + $0x380] sm:$0xff] %v2028_v19  ;;  %v1361_v42 = vsel %vm1359_vm13, %v1360_v0, %v1358_v60  ;;  %2518 = vrsqrt.f32 %v5338_v9 }
 0x22a   : > { %2189 = vst [vmem:[%s4464_s7 + $0x388] sm:$0xff] %v2029_v28  ;;  %2190 = vst [vmem:[%s4464_s7 + $0x390] sm:$0xff] %v2030_v32  ;;  %v1368_v39 = vsel %vm1366_vm14, %v1367_v23, %v1365_v47  ;;  %v1375_v2 = vsel %vm1373_vm15, %v1374_v37, %v1372_v62  ;;  %v1461_v57 = vadd.f32 1e-06, %v1361_v42  ;;  %v5341_v0 = vmul.f32 0.0019569471, %v1091_v6  ;;  %v1111_v23 = vpop.xlane.xlu1 %1110  ;;  %v2517_v6 = vpop.eup %2516 }
 0x22b   : > { %2191 = vst [vmem:[%s4464_s7 + $0x398] sm:$0xff] %v2031_v56  ;;  %v1462_v3 = vadd.f32 1e-06, %v1368_v39  ;;  %v1463_v14 = vadd.f32 1e-06, %v1375_v2  ;;  %v1377_v37 = vmul.f32 %v2515_v8, %v5172_v18  ;;  %v1388_v43 = vand.u32 2147483648, %v5181_v61 }
 0x22c   : > { %2520 = vrcp.f32 %v1461_v57  ;;  %v5343_v63 = vmul.f32 0.0019569471, %v1096_v4  ;;  %v5347_v36 = vmul.f32 0.0019569471, %v1101_v10  ;;  %v5352_v34 = vmul.f32 0.0019569471, %v1106_v12 }
 0x22d   : > { %2522 = vrcp.f32 %v1462_v3  ;;  %v5357_v40 = vmul.f32 0.0019569471, %v1111_v23  ;;  %v1379_v55 = vsel %vm1378_vm0, %v5172_v18, %v1377_v37  ;;  %v1384_v35 = vmul.f32 %v2517_v6, %v5181_v61  ;;  %v6305_v47 = vld [vmem:[#allocation77_spill] sm:$0xff]  ;;  %v6306_v4 = vld [vmem:[#allocation78_spill] sm:$0xff]  ;;  %v6307_v39 = vld [vmem:[#allocation79_spill] sm:$0xff] }
 0x22e   : > { %2524 = vrcp.f32 %v1463_v14  ;;  %v1395_v21 = vand.u32 2147483648, %v5338_v9  ;;  %v1382_v26 = vsel %vm1380_vm1, %v1381_v59, %v1379_v55  ;;  %v1402_v46 = vand.u32 2147483648, %v5341_v0  ;;  %v6308_v10 = vld [vmem:[#allocation83_spill] sm:$0xff] }
 0x22f   : > { %2526 = vrsqrt.f32 %v5341_v0  ;;  %v1409_v45 = vand.u32 2147483648, %v5343_v63  ;;  %v1386_v27 = vsel %vm1385_vm2, %v5181_v61, %v1384_v35  ;;  %vm1392_vm4 = vcmp.eq.f32.partialorder %v5338_v9, inf }
 0x230   : > { %2528 = vrsqrt.f32 %v5343_v63  ;;  %v1416_v18 = vand.u32 2147483648, %v5347_v36  ;;  %v1423_v13 = vand.u32 2147483648, %v5352_v34  ;;  %v1464_v28 = vadd.f32 1e-06, %v1382_v26 }
 0x231   : > { %2530 = vrsqrt.f32 %v5347_v36  ;;  %v1389_v32 = vsel %vm1387_vm3, %v1388_v43, %v1386_v27  ;;  %vm1394_vm5 = vcmp.eq.f32.partialorder %v5338_v9, 0.0  ;;  %vm1399_vm6 = vcmp.eq.f32.partialorder %v5341_v0, inf }
 0x232   : > { %2532 = vrsqrt.f32 %v5352_v34  ;;  %vm1401_vm7 = vcmp.eq.f32.partialorder %v5341_v0, 0.0  ;;  %vm1406_vm8 = vcmp.eq.f32.partialorder %v5343_v63, inf  ;;  %vm1408_vm9 = vcmp.eq.f32.partialorder %v5343_v63, 0.0 }
 0x233   : > { %v2519_v7 = vpop.eup %2518  ;;  %2534 = vrsqrt.f32 %v5357_v40  ;;  %vm1413_vm10 = vcmp.eq.f32.partialorder %v5347_v36, inf  ;;  %vm1415_vm11 = vcmp.eq.f32.partialorder %v5347_v36, 0.0  ;;  %vm1420_vm12 = vcmp.eq.f32.partialorder %v5352_v34, inf }
 0x234   : > { %v1391_v56 = vmul.f32 %v2519_v7, %v5338_v9  ;;  %vm1427_vm13 = vcmp.eq.f32.partialorder %v5357_v40, inf  ;;  %vm1422_vm14 = vcmp.eq.f32.partialorder %v5352_v34, 0.0  ;;  %2536 = vrcp.f32 %v1464_v28 }
 0x235   : > { %vm1429_vm15 = vcmp.eq.f32.partialorder %v5357_v40, 0.0 }
 0x236   : > { %v2521_v19 = vpop.eup %2520 }
 0x237   : > { %v2523_v60 = vpop.eup %2522  ;;  %v1668_v62 = vmul.f32 %v2521_v19, %v6305_v47  ;;  %v1669_v42 = vmul.f32 %v2521_v19, %v6306_v4  ;;  %v1670_v2 = vmul.f32 %v2521_v19, %v6307_v39  ;;  %v1671_v57 = vmul.f32 %v2521_v19, %v6308_v10 }
 0x238   : > { %v1672_v61 = vmul.f32 %v2523_v60, %v4020_v25  ;;  %v1673_v3 = vmul.f32 %v2523_v60, %v4024_v33  ;;  %v1674_v14 = vmul.f32 %v2523_v60, %v4192_v17  ;;  %v1675_v12 = vmul.f32 %v2523_v60, %v4196_v38  ;;  %v2525_v6 = vpop.eup %2524 }
 0x239   : > { %v1850_v23 = vmul.f32 %v4385_v49, %v1668_v62  ;;  %v1851_v8 = vmul.f32 %v4395_v5, %v1669_v42  ;;  %v1852_v37 = vmul.f32 %v4397_v50, %v1670_v2  ;;  %v1853_v59 = vmul.f32 %v4409_v29, %v1671_v57  ;;  %v2527_v43 = vpop.eup %2526  ;;  %v6309_v42 = vld [vmem:[#allocation84_spill] sm:$0xff]  ;;  %v6310_v2 = vld [vmem:[#allocation94_spill] sm:$0xff]  ;;  %v6311_v57 = vld [vmem:[#allocation95_spill] sm:$0xff] }
 0x23a   : > { %v1854_v25 = vmul.f32 %v4385_v49, %v1672_v61  ;;  %v1855_v33 = vmul.f32 %v4395_v5, %v1673_v3  ;;  %v1856_v17 = vmul.f32 %v4397_v50, %v1674_v14  ;;  %v1857_v38 = vmul.f32 %v4409_v29, %v1675_v12  ;;  %v2529_v62 = vpop.eup %2528 }
 0x23b   : > { %v2032_v55 = vadd.f32 %v4400_v1, %v1850_v23  ;;  %v2033_v35 = vadd.f32 %v4402_v53, %v1851_v8  ;;  %v2034_v26 = vadd.f32 %v4413_v30, %v1852_v37  ;;  %v2035_v7 = vadd.f32 %v4415_v58, %v1853_v59  ;;  %v2531_v3 = vpop.eup %2530 }
 0x23c   : > { %v2036_v27 = vadd.f32 %v4400_v1, %v1854_v25  ;;  %v2037_v19 = vadd.f32 %v4402_v53, %v1855_v33  ;;  %v2038_v60 = vadd.f32 %v4413_v30, %v1856_v17  ;;  %v2039_v47 = vadd.f32 %v4415_v58, %v1857_v38  ;;  %v2533_v23 = vpop.eup %2532 }
 0x23d   : > { %2192 = vst [vmem:[%s4464_s7 + $0x3a0] sm:$0xff] %v2032_v55  ;;  %2193 = vst [vmem:[%s4464_s7 + $0x3a8] sm:$0xff] %v2033_v35  ;;  %v1676_v4 = vmul.f32 %v2525_v6, %v4012_v11  ;;  %v1677_v39 = vmul.f32 %v2525_v6, %v6309_v42  ;;  %v1678_v10 = vmul.f32 %v2525_v6, %v6310_v2  ;;  %v1465_v14 = vadd.f32 1e-06, %v1389_v32  ;;  %v2535_v28 = vpop.eup %2534 }
 0x23e   : > { %2194 = vst [vmem:[%s4464_s7 + $0x3b0] sm:$0xff] %v2034_v26  ;;  %2195 = vst [vmem:[%s4464_s7 + $0x3b8] sm:$0xff] %v2035_v7  ;;  %v1679_v61 = vmul.f32 %v2525_v6, %v6311_v57  ;;  %v1393_v12 = vsel %vm1392_vm4, %v5338_v9, %v1391_v56  ;;  %v1398_v11 = vmul.f32 %v2527_v43, %v5341_v0 }
 0x23f   : > { %2196 = vst [vmem:[%s4464_s7 + $0x3c0] sm:$0xff] %v2036_v27  ;;  %2197 = vst [vmem:[%s4464_s7 + $0x3c8] sm:$0xff] %v2037_v19  ;;  %v1858_v8 = vmul.f32 %v4385_v49, %v1676_v4  ;;  %v1859_v37 = vmul.f32 %v4395_v5, %v1677_v39  ;;  %v1860_v59 = vmul.f32 %v4397_v50, %v1678_v10  ;;  %2538 = vrcp.f32 %v1465_v14  ;;  %v6312_v10 = vld [vmem:[#allocation99_spill] sm:$0xff] }
 0x240   : > { %2198 = vst [vmem:[%s4464_s7 + $0x3d0] sm:$0xff] %v2038_v60  ;;  %2199 = vst [vmem:[%s4464_s7 + $0x3d8] sm:$0xff] %v2039_v47  ;;  %v1861_v6 = vmul.f32 %v4409_v29, %v1679_v61  ;;  %v1396_v32 = vsel %vm1394_vm5, %v1395_v21, %v1393_v12  ;;  %v1400_v56 = vsel %vm1399_vm6, %v5341_v0, %v1398_v11  ;;  %v1430_v60 = vand.u32 2147483648, %v5357_v40  ;;  %v6313_v61 = vld [vmem:[#allocation100_spill] sm:$0xff] }
 0x241   : > { %v1405_v25 = vmul.f32 %v2529_v62, %v5343_v63  ;;  %v2040_v33 = vadd.f32 %v4400_v1, %v1858_v8  ;;  %v2041_v17 = vadd.f32 %v4402_v53, %v1859_v37  ;;  %v2042_v38 = vadd.f32 %v4413_v30, %v1860_v59  ;;  %v6315_v8 = vld [vmem:[#allocation101_spill] sm:$0xff]  ;;  %v6316_v59 = vld [vmem:[#allocation102_spill] sm:$0xff] }
 0x242   : > { %v2043_v43 = vadd.f32 %v4415_v58, %v1861_v6  ;;  %v1466_v55 = vadd.f32 1e-06, %v1396_v32  ;;  %v1403_v9 = vsel %vm1401_vm7, %v1402_v46, %v1400_v56  ;;  %v1412_v35 = vmul.f32 %v2531_v3, %v5347_v36 }
 0x243   : > { %v1407_v21 = vsel %vm1406_vm8, %v5343_v63, %v1405_v25  ;;  %2200 = vst [vmem:[%s4464_s7 + $0x3e0] sm:$0xff] %v2040_v33  ;;  %2201 = vst [vmem:[%s4464_s7 + $0x3e8] sm:$0xff] %v2041_v17  ;;  %v1467_v26 = vadd.f32 1e-06, %v1403_v9  ;;  %v1419_v27 = vmul.f32 %v2533_v23, %v5352_v34  ;;  %v1426_v0 = vmul.f32 %v2535_v28, %v5357_v40 }
 0x244   : > { %2202 = vst [vmem:[%s4464_s7 + $0x3f0] sm:$0xff] %v2042_v38  ;;  %2203 = vst [vmem:[%s4464_s7 + $0x3f8] sm:$0xff] %v2043_v43  ;;  %v1410_v7 = vsel %vm1408_vm9, %v1409_v45, %v1407_v21  ;;  %2540 = vrcp.f32 %v1466_v55  ;;  %v1414_v19 = vsel %vm1413_vm10, %v5347_v36, %v1412_v35 }
 0x245   : > { %v1468_v46 = vadd.f32 1e-06, %v1410_v7  ;;  %2542 = vrcp.f32 %v1467_v26  ;;  %v1417_v47 = vsel %vm1415_vm11, %v1416_v18, %v1414_v19  ;;  %v1421_v63 = vsel %vm1420_vm12, %v5352_v34, %v1419_v27  ;;  %v2537_v18 = vpop.eup %2536  ;;  %v6317_v26 = vld [vmem:[#allocation124_spill] sm:$0xff] }
 0x246   : > { %v1428_v45 = vsel %vm1427_vm13, %v5357_v40, %v1426_v0  ;;  %v1469_v62 = vadd.f32 1e-06, %v1417_v47  ;;  %v1424_v4 = vsel %vm1422_vm14, %v1423_v13, %v1421_v63  ;;  %v1680_v39 = vmul.f32 %v2537_v18, %v4072_v41 }
 0x247   : > { %2544 = vrcp.f32 %v1468_v46  ;;  %v1470_v42 = vadd.f32 1e-06, %v1424_v4  ;;  %v1431_v36 = vsel %vm1429_vm15, %v1430_v60, %v1428_v45  ;;  %v1681_v2 = vmul.f32 %v2537_v18, %v4076_v16  ;;  %v6314_v16 = vld [vmem:[#allocation76_spill] sm:$0xff] }
 0x248   : > { %2546 = vrcp.f32 %v1469_v62  ;;  %v1682_v57 = vmul.f32 %v2537_v18, %v6312_v10  ;;  %v1683_v3 = vmul.f32 %v2537_v18, %v6313_v61  ;;  %v5482_v12 = vadd.f32 1e-06, %v1431_v36 }
 0x249   : > { %v2539_v14 = vpop.eup %2538  ;;  %2548 = vrcp.f32 %v1470_v42  ;;  %v1862_v34 = vmul.f32 %v4385_v49, %v1680_v39  ;;  %v1863_v40 = vmul.f32 %v4395_v5, %v1681_v2 }
 0x24a   : > { %v1864_v13 = vmul.f32 %v4397_v50, %v1682_v57  ;;  %v1865_v11 = vmul.f32 %v4409_v29, %v1683_v3  ;;  %v1684_v41 = vmul.f32 %v2539_v14, %v4064_v52  ;;  %v1685_v23 = vmul.f32 %v2539_v14, %v6314_v16  ;;  %v6318_v3 = vld [vmem:[#allocation125_spill] sm:$0xff] }
 0x24b   : > { %v1686_v37 = vmul.f32 %v2539_v14, %v6315_v8  ;;  %v1687_v6 = vmul.f32 %v2539_v14, %v6316_v59  ;;  %v2044_v28 = vadd.f32 %v4400_v1, %v1862_v34  ;;  %v2045_v32 = vadd.f32 %v4402_v53, %v1863_v40  ;;  %v6319_v34 = vld [vmem:[#allocation126_spill] sm:$0xff] }
 0x24c   : > { %v2046_v56 = vadd.f32 %v4413_v30, %v1864_v13  ;;  %v2047_v25 = vadd.f32 %v4415_v58, %v1865_v11  ;;  %v1866_v17 = vmul.f32 %v4385_v49, %v1684_v41  ;;  %v1867_v52 = vmul.f32 %v4395_v5, %v1685_v23 }
 0x24d   : > { %v1868_v38 = vmul.f32 %v4397_v50, %v1686_v37  ;;  %v1869_v43 = vmul.f32 %v4409_v29, %v1687_v6  ;;  %2204 = vst [vmem:[%s4464_s7 + $0x400] sm:$0xff] %v2044_v28  ;;  %2205 = vst [vmem:[%s4464_s7 + $0x408] sm:$0xff] %v2045_v32  ;;  %v6320_v37 = vld [vmem:[#allocation82_spill] sm:$0xff]  ;;  %v6321_v6 = vld [vmem:[#allocation93_spill] sm:$0xff]  ;;  %2550 = vrcp.f32 %v5482_v12 }
 0x24e   : > { %v2541_v33 = vpop.eup %2540  ;;  %2206 = vst [vmem:[%s4464_s7 + $0x410] sm:$0xff] %v2046_v56  ;;  %2207 = vst [vmem:[%s4464_s7 + $0x418] sm:$0xff] %v2047_v25  ;;  %v2048_v27 = vadd.f32 %v4400_v1, %v1866_v17  ;;  %v2049_v0 = vadd.f32 %v4402_v53, %v1867_v52  ;;  %v6322_v32 = vld [vmem:[#allocation127_spill] sm:$0xff]  ;;  %v6323_v25 = vld [vmem:[#allocation128_spill] sm:$0xff] }
 0x24f   : > { %v2543_v55 = vpop.eup %2542  ;;  %v1688_v9 = vmul.f32 %v2541_v33, %v4124_v22  ;;  %v1689_v21 = vmul.f32 %v2541_v33, %v4128_v54  ;;  %v1690_v35 = vmul.f32 %v2541_v33, %v4276_v31  ;;  %v1691_v7 = vmul.f32 %v2541_v33, %v6317_v26  ;;  %v6324_v26 = vld [vmem:[#allocation97_spill] sm:$0xff] }
 0x250   : > { %v2050_v46 = vadd.f32 %v4413_v30, %v1868_v38  ;;  %v2051_v19 = vadd.f32 %v4415_v58, %v1869_v43  ;;  %2208 = vst [vmem:[%s4464_s7 + $0x420] sm:$0xff] %v2048_v27  ;;  %2209 = vst [vmem:[%s4464_s7 + $0x428] sm:$0xff] %v2049_v0  ;;  %v1692_v45 = vmul.f32 %v2543_v55, %v4116_v15  ;;  %v6325_v27 = vld [vmem:[#allocation98_spill] sm:$0xff] }
 0x251   : > { %v2545_v60 = vpop.eup %2544  ;;  %v1870_v47 = vmul.f32 %v4385_v49, %v1688_v9  ;;  %v1871_v22 = vmul.f32 %v4395_v5, %v1689_v21  ;;  %v1872_v54 = vmul.f32 %v4397_v50, %v1690_v35  ;;  %v1873_v63 = vmul.f32 %v4409_v29, %v1691_v7 }
 0x252   : > { %v2547_v31 = vpop.eup %2546  ;;  %2210 = vst [vmem:[%s4464_s7 + $0x430] sm:$0xff] %v2050_v46  ;;  %2211 = vst [vmem:[%s4464_s7 + $0x438] sm:$0xff] %v2051_v19  ;;  %v1693_v62 = vmul.f32 %v2543_v55, %v4120_v44  ;;  %v1694_v4 = vmul.f32 %v2543_v55, %v4292_v20  ;;  %v1695_v42 = vmul.f32 %v2543_v55, %v4296_v24  ;;  %v6326_v46 = vld [vmem:[#allocation129_spill] sm:$0xff] }
 0x253   : > { %v2052_v36 = vadd.f32 %v4400_v1, %v1870_v47  ;;  %v2053_v18 = vadd.f32 %v4402_v53, %v1871_v22  ;;  %v2054_v39 = vadd.f32 %v4413_v30, %v1872_v54  ;;  %v2055_v2 = vadd.f32 %v4415_v58, %v1873_v63  ;;  %v2549_v10 = vpop.eup %2548 }
 0x254   : > { %v1874_v57 = vmul.f32 %v4385_v49, %v1692_v45  ;;  %v1875_v15 = vmul.f32 %v4395_v5, %v1693_v62  ;;  %v1876_v61 = vmul.f32 %v4397_v50, %v1694_v4  ;;  %v1877_v44 = vmul.f32 %v4409_v29, %v1695_v42 }
 0x255   : > { %2212 = vst [vmem:[%s4464_s7 + $0x440] sm:$0xff] %v2052_v36  ;;  %2213 = vst [vmem:[%s4464_s7 + $0x448] sm:$0xff] %v2053_v18  ;;  %v1696_v20 = vmul.f32 %v2545_v60, %v4176_v48  ;;  %v1697_v24 = vmul.f32 %v2545_v60, %v4180_v51  ;;  %v1698_v14 = vmul.f32 %v2545_v60, %v6318_v3 }
 0x256   : > { %2214 = vst [vmem:[%s4464_s7 + $0x450] sm:$0xff] %v2054_v39  ;;  %2215 = vst [vmem:[%s4464_s7 + $0x458] sm:$0xff] %v2055_v2  ;;  %v1699_v40 = vmul.f32 %v2545_v60, %v6319_v34  ;;  %v2056_v13 = vadd.f32 %v4400_v1, %v1874_v57  ;;  %v2057_v11 = vadd.f32 %v4402_v53, %v1875_v15  ;;  %v6327_v60 = vld [vmem:[#allocation130_spill] sm:$0xff]  ;;  %v6328_v57 = vld [vmem:[#allocation96_spill] sm:$0xff] }
 0x257   : > { %v2058_v41 = vadd.f32 %v4413_v30, %v1876_v61  ;;  %v2059_v16 = vadd.f32 %v4415_v58, %v1877_v44  ;;  %v1878_v23 = vmul.f32 %v4385_v49, %v1696_v20  ;;  %v1879_v8 = vmul.f32 %v4395_v5, %v1697_v24  ;;  %v6329_v61 = vld [vmem:[#allocation88_spill] sm:$0xff]  ;;  %v6330_v44 = vld [vmem:[#allocation131_spill] sm:$0xff] }
 0x258   : > { %v1880_v48 = vmul.f32 %v4397_v50, %v1698_v14  ;;  %v1881_v51 = vmul.f32 %v4409_v29, %v1699_v40  ;;  %2216 = vst [vmem:[%s4464_s7 + $0x460] sm:$0xff] %v2056_v13  ;;  %2217 = vst [vmem:[%s4464_s7 + $0x468] sm:$0xff] %v2057_v11  ;;  %v1700_v59 = vmul.f32 %v2547_v31, %v6320_v37  ;;  %v6331_v24 = vld [vmem:[#allocation132_spill] sm:$0xff] }
 0x259   : > { %2218 = vst [vmem:[%s4464_s7 + $0x470] sm:$0xff] %v2058_v41  ;;  %2219 = vst [vmem:[%s4464_s7 + $0x478] sm:$0xff] %v2059_v16  ;;  %v1701_v28 = vmul.f32 %v2547_v31, %v6321_v6  ;;  %v1702_v56 = vmul.f32 %v2547_v31, %v6322_v32  ;;  %v1703_v33 = vmul.f32 %v2547_v31, %v6323_v25 }
 0x25a   : > { %v2060_v17 = vadd.f32 %v4400_v1, %v1878_v23  ;;  %v2061_v52 = vadd.f32 %v4402_v53, %v1879_v8  ;;  %v2062_v38 = vadd.f32 %v4413_v30, %v1880_v48  ;;  %v2063_v43 = vadd.f32 %v4415_v58, %v1881_v51 }
 0x25b   : > { %v1882_v55 = vmul.f32 %v4385_v49, %v1700_v59  ;;  %v1883_v9 = vmul.f32 %v4395_v5, %v1701_v28  ;;  %v1884_v21 = vmul.f32 %v4397_v50, %v1702_v56  ;;  %v1885_v35 = vmul.f32 %v4409_v29, %v1703_v33 }
 0x25c   : > { %2220 = vst [vmem:[%s4464_s7 + $0x480] sm:$0xff] %v2060_v17  ;;  %2221 = vst [vmem:[%s4464_s7 + $0x488] sm:$0xff] %v2061_v52  ;;  %v1704_v7 = vmul.f32 %v2549_v10, %v6324_v26  ;;  %v1705_v0 = vmul.f32 %v2549_v10, %v6325_v27  ;;  %v1706_v19 = vmul.f32 %v2549_v10, %v6326_v46 }
 0x25d   : > { %2222 = vst [vmem:[%s4464_s7 + $0x490] sm:$0xff] %v2062_v38  ;;  %2223 = vst [vmem:[%s4464_s7 + $0x498] sm:$0xff] %v2063_v43  ;;  %v1707_v47 = vmul.f32 %v2549_v10, %v6327_v60  ;;  %v2064_v22 = vadd.f32 %v4400_v1, %v1882_v55  ;;  %v2065_v54 = vadd.f32 %v4402_v53, %v1883_v9  ;;  %v2551_v10 = vpop.eup %2550 }
 0x25e   : > { %v2066_v63 = vadd.f32 %v4413_v30, %v1884_v21  ;;  %v2067_v31 = vadd.f32 %v4415_v58, %v1885_v35  ;;  %v1886_v45 = vmul.f32 %v4385_v49, %v1704_v7  ;;  %v1887_v62 = vmul.f32 %v4395_v5, %v1705_v0 }
 0x25f   : > { %v1888_v4 = vmul.f32 %v4397_v50, %v1706_v19  ;;  %v1889_v42 = vmul.f32 %v4409_v29, %v1707_v47  ;;  %2224 = vst [vmem:[%s4464_s7 + $0x4a0] sm:$0xff] %v2064_v22  ;;  %2225 = vst [vmem:[%s4464_s7 + $0x4a8] sm:$0xff] %v2065_v54  ;;  %v1708_v15 = vmul.f32 %v2551_v10, %v6328_v57 }
 0x260   : > { %2226 = vst [vmem:[%s4464_s7 + $0x4b0] sm:$0xff] %v2066_v63  ;;  %2227 = vst [vmem:[%s4464_s7 + $0x4b8] sm:$0xff] %v2067_v31  ;;  %v2068_v36 = vadd.f32 %v4400_v1, %v1886_v45  ;;  %v2069_v18 = vadd.f32 %v4402_v53, %v1887_v62  ;;  %v1709_v12 = vmul.f32 %v2551_v10, %v6329_v61 }
 0x261   : > { %v2070_v39 = vadd.f32 %v4413_v30, %v1888_v4  ;;  %v2071_v2 = vadd.f32 %v4415_v58, %v1889_v42  ;;  %v1710_v20 = vmul.f32 %v2551_v10, %v6330_v44  ;;  %v1711_v3 = vmul.f32 %v2551_v10, %v6331_v24 }
 0x262   : > { %2228 = vst [vmem:[%s4464_s7 + $0x4c0] sm:$0xff] %v2068_v36  ;;  %2229 = vst [vmem:[%s4464_s7 + $0x4c8] sm:$0xff] %v2069_v18  ;;  %v1890_v14 = vmul.f32 %v4385_v49, %v1708_v15  ;;  %v1891_v34 = vmul.f32 %v4395_v5, %v1709_v12 }
 0x263   : > { %2230 = vst [vmem:[%s4464_s7 + $0x4d0] sm:$0xff] %v2070_v39  ;;  %2231 = vst [vmem:[%s4464_s7 + $0x4d8] sm:$0xff] %v2071_v2  ;;  %v1892_v40 = vmul.f32 %v4397_v50, %v1710_v20  ;;  %v1893_v13 = vmul.f32 %v4409_v29, %v1711_v3 }
 0x264   : > { %v2072_v11 = vadd.f32 %v4400_v1, %v1890_v14  ;;  %v2073_v49 = vadd.f32 %v4402_v53, %v1891_v34 }
 0x265   : > { %v2074_v5 = vadd.f32 %v4413_v30, %v1892_v40  ;;  %v2075_v50 = vadd.f32 %v4415_v58, %v1893_v13 }
 0x266   : > { %2232 = vst [vmem:[%s4464_s7 + $0x4e0] sm:$0xff] %v2072_v11  ;;  %2233 = vst [vmem:[%s4464_s7 + $0x4e8] sm:$0xff] %v2073_v49 }
 0x267   : > { %2234 = vst [vmem:[%s4464_s7 + $0x4f0] sm:$0xff] %v2074_v5  ;;  %2235 = vst [vmem:[%s4464_s7 + $0x4f8] sm:$0xff] %v2075_v50 }
 0x268   : > { %2619 = shalt.err (!%p2616_p2)
}
 0x269   : > { %s2620_s8 = scalar_lea.hbm %s5606_s20, 20480  ;;  %s2624_s22 = scalar_lea.hbm %s5663_s3, 40960 }
 0x26a   : > { %p2621_p4 = scmp.ne.s32.totalorder %s5606_s20, %s2620_s8  ;;  %p2625_p9 = scmp.lt.u32.totalorder %s5606_s20, %s5663_s3 }
 0x26b   : > { %p2626_p1 = scmp.lt.u32.totalorder %s2624_s22, %s2620_s8  ;;  %p2628_p6 = scmp.lt.u32.totalorder %s2620_s8, %s5606_s20 }
 0x26c   : > { %p2622_p5 = pnand %p2621_p4, %p6332_p11 }
 0x26d   : > { %p2627_p3 = por %p2626_p1, %p2625_p9 }
 0x26e   : > { %p2623_p7 = pneg %p2622_p5 }
 0x26f   : > { %p2629_p12 = por %p2628_p6, %p2627_p3 }
 0x271   : > { %p2630_p13 = pnand %p2629_p12, %p2623_p7 }
 0x273   : > { %2633 = shalt.err (!%p2630_p13)
}
 0x274   : > { %s2678_s6 = smov 512   ;;  %s2679_s7 = smov 32  }
 0x275   : > { %2344 = dma.vmem_to_hbm [thread:$0]  (%p6332_p11), %s5608_s17, 20480, %s5606_s20, %s2237_s25, %s2678_s6, %s2678_s6, %s2679_s7  }
 0x276 PF: > { %s2266_s11 = sand.u32 1, %s2660_s12   ;;  %p6333_p8 = scmp.ne.s32.totalorder %s5887_s24, 0 }
 0x277   : > { %p6334_p10 = scmp.ge.s32.totalorder %s2672_s15, 2  ;;  %s2267_s16 = scalar_lea.sflag [#allocation4], %s2266_s11 }
 0x279   : > { %p2351_p0 = pnand %p6334_p10, %p6333_p8 }
 0x27b   : > { %2655 = dma.done.wait (!%p2351_p0), %s2267_s16, 20480  }
 0x27c   : > { %2657 = vsyncadd (!%p2351_p0), %s2267_s16, 4294946816  ;;  %p16_p2 = scmp.ge.s32.totalorder %s2725_s18, 4   ;;  %s6335_s12 = smov %s2664_s13 }
 0x27d   : > { %s6336_s13 = smov %s2668_s14  ;;  %s6337_s14 = smov %s2737_s21 }
 0x27e   : > { %s6338_s15 = smov %s2725_s18  ;;  %18 = sbr.rel (!%p16_p2) target bundleno = 5 (0x5), region = 77 }
 0x285   :  { %2272 = vsyncpa [#allocation3], 1 }
 0x286   :  { %2274 = vsyncpa [#allocation3 + $0x1], 1 }
 0x287   :  { %2275 = vsyncpa [#allocation4], 1 }
 0x288   :  { %2277 = vsyncpa [#allocation4 + $0x1], 1 }

</bundles_post_ra>
